<compile_context>
chip_gen: v5e
topology: v5e:2x2
jax: 0.10.0
libtpu: 0.0.40
codegen_flags: <defaults>
</compile_context>

<pallas_src>
import functools
import math

import jax
import jax.numpy as jnp
import numpy as np
from jax import lax
from jax.experimental import pallas as pl
from jax.experimental.pallas import tpu as pltpu

EPS = 1e-5
TB_DEFAULT = 8  # sequences per grid step (multiple of 8 -> tile-exact reshapes)


# ----- small math helpers (pure jnp: usable in the kernel and in the reference) -----
def _silu(x):
    return x * (1.0 / (1.0 + jnp.exp(-x)))


def _softplus(x):
    # matches torch.nn.functional.softplus with threshold=20
    return jnp.where(x > 20.0, x, jnp.log(1.0 + jnp.exp(x)))


def _rmsnorm(x, w):
    return x * lax.rsqrt(jnp.mean(x * x, axis=-1, keepdims=True) + EPS) * w


# ----------------------------------------------------------------------------
# Pallas kernel: full forward pass for one tile of TB sequences
# ----------------------------------------------------------------------------
def mamba_classifier_kernel(
    x_ref,            # (L, TB, d_model)   embedded tokens (l-major)
    norm1_w_ref,      # (1, d_model)       pre-block RMSNorm weight
    in_x_w_ref,       # (d_model, d_inner) in_proj (conv branch), bf16
    in_z_w_ref,       # (d_model, d_inner) in_proj (gate branch), bf16
    conv_w_ref,       # (d_conv, d_inner)  depthwise conv taps, f32
    conv_b_ref,       # (1, d_inner)
    xproj_dt_w_ref,   # (d_inner, dt_rank) bf16
    xproj_B_w_ref,    # (d_inner, d_state) bf16
    xproj_C_w_ref,    # (d_inner, d_state) bf16
    dt_w_ref,         # (dt_rank, d_inner) bf16
    dt_b_ref,         # (1, d_inner)
    A_neg_ref,        # (d_state, d_inner) = -exp(A_log), precomputed in the wrapper
    D_ref,            # (1, d_inner)
    out_w_ref,        # (d_inner, d_model) bf16
    normf_w_ref,      # (1, d_model)       final RMSNorm weight
    fc_w_ref,         # (d_model, n_pad)   bf16, zero-padded to 128 lanes
    fc_b_ref,         # (1, n_pad)
    o_ref,            # (L, TB, n_pad)     lane-dense logits
    xpad_ref,         # VMEM ((d_conv-1)*TB + L*TB, d_inner)  zero-padded conv input
    dA_ref,           # VMEM (L, d_state, TB, d_inner)        exp(delta * A)
    dBu_ref,          # VMEM (L, d_state, TB, d_inner)        delta * u * B
    cb_ref,           # VMEM (L, d_state, TB, d_inner)        C lane-broadcast
    y_ref,            # VMEM (L, TB, d_inner)                 scan outputs
    *,
    d_conv: int,
):
    L, TB, d_model = x_ref.shape
    N = L * TB
    d_inner = in_x_w_ref.shape[1]
    d_state = A_neg_ref.shape[0]
    n_pad = o_ref.shape[-1]

    # (L, TB, d_model) -> (N, d_model); TB is a multiple of 8 so this is tile-exact.
    x = x_ref[...].reshape(N, d_model)

    # ---- pre-block RMSNorm + in_proj (bf16 MXU matmuls, f32 accumulation) ----
    xn = _rmsnorm(x, norm1_w_ref[...])
    xn_b = xn.astype(jnp.bfloat16)
    xs = jnp.dot(xn_b, in_x_w_ref[...], preferred_element_type=jnp.float32)
    z = jnp.dot(xn_b, in_z_w_ref[...], preferred_element_type=jnp.float32)

    # ---- causal depthwise Conv1d via zero-padded VMEM scratch ----
    # Row index in the flattened layout is l*TB + b, so a shift of s timesteps is a
    # shift of s*TB rows; tap k reads rows [k*TB, k*TB + N) of the padded buffer.
    P = (d_conv - 1) * TB
    xpad_ref[pl.ds(0, P), :] = jnp.zeros((P, d_inner), jnp.float32)
    xpad_ref[pl.ds(P, N), :] = xs
    conv_w = conv_w_ref[...]
    xc = jnp.broadcast_to(conv_b_ref[...], (N, d_inner))
    for k in range(d_conv):                         # static taps -> aligned loads + FMA
        xc = xc + xpad_ref[pl.ds(k * TB, N), :] * conv_w[k:k + 1, :]
    x_act = _silu(xc)                               # (N, d_inner), f32
    xab = x_act.astype(jnp.bfloat16)

    # ---- input-dependent SSM parameters ----
    delta_r = jnp.dot(xab, xproj_dt_w_ref[...], preferred_element_type=jnp.float32)
    delta = _softplus(
        jnp.dot(delta_r.astype(jnp.bfloat16), dt_w_ref[...],
                preferred_element_type=jnp.float32) + dt_b_ref[...]
    )                                               # (N, d_inner)
    Bmat = jnp.dot(xab, xproj_B_w_ref[...], preferred_element_type=jnp.float32)
    Cmat = jnp.dot(xab, xproj_C_w_ref[...], preferred_element_type=jnp.float32)

    # ---- precompute all EUP / broadcast work OUTSIDE the serial recurrence ----
    delta3 = delta.reshape(L, TB, d_inner)
    du3 = (delta * x_act).reshape(L, TB, d_inner)
    B3 = Bmat.reshape(L, TB, d_state)
    C3 = Cmat.reshape(L, TB, d_state)
    A_neg = A_neg_ref[...]                          # (d_state, d_inner)
    for s in range(d_state):                        # d_state is small & static (16)
        a_row = A_neg[s:s + 1, :]                   # (1, d_inner)
        dA_ref[:, pl.ds(s, 1)] = jnp.exp(delta3 * a_row).reshape(L, 1, TB, d_inner)
        dBu_ref[:, pl.ds(s, 1)] = (du3 * B3[:, :, s:s + 1]).reshape(L, 1, TB, d_inner)
        cb_ref[:, pl.ds(s, 1)] = jnp.broadcast_to(
            C3[:, :, s:s + 1], (L, TB, d_inner)).reshape(L, 1, TB, d_inner)

    # ---- selective scan: fori_loop with pure multiply-add-reduce body ----
    def scan_step(t, h):
        dA_t = dA_ref[t]                            # (d_state, TB, d_inner)
        dBu_t = dBu_ref[t]
        cb_t = cb_ref[t]
        h = dA_t * h + dBu_t
        y_ref[t] = jnp.sum(h * cb_t, axis=0)        # (TB, d_inner)
        return h

    h0 = jnp.zeros((d_state, TB, d_inner), jnp.float32)
    lax.fori_loop(0, L, scan_step, h0)

    y = y_ref[...].reshape(N, d_inner)
    y = y + x_act * D_ref[...]
    y = y * _silu(z)

    # ---- out_proj + residual + final RMSNorm + classifier head ----
    res = x + jnp.dot(y.astype(jnp.bfloat16), out_w_ref[...],
                      preferred_element_type=jnp.float32)
    hn = _rmsnorm(res, normf_w_ref[...])
    logits = jnp.dot(hn.astype(jnp.bfloat16), fc_w_ref[...],
                     preferred_element_type=jnp.float32) + fc_b_ref[...]
    o_ref[...] = logits.reshape(L, TB, n_pad)       # lane-dense (n_pad = 128) store


# ----------------------------------------------------------------------------
# Wrapper
# ----------------------------------------------------------------------------
def _replicated_spec(arr):
    n = arr.ndim
    return pl.BlockSpec(arr.shape, lambda b, n=n: (0,) * n)


def mamba_classifier_forward(tokens, params, *, d_conv, block_b=TB_DEFAULT):
    assert block_b % 8 == 0
    # TODO(synk): nn.Embedding lookup is a gather; done in plain JAX glue, not in-kernel.
    emb = jnp.take(params["emb"], tokens, axis=0)          # (B, L, d_model)
    B, L, d_model = emb.shape
    n_classes = params["fc_w"].shape[1]
    n_pad = ((n_classes + 127) // 128) * 128               # lane-dense logits
    d_state, d_inner = params["A_logT"].shape

    TB = block_b
    Bp = ((B + TB - 1) // TB) * TB
    if Bp != B:
        emb = jnp.pad(emb, ((0, Bp - B), (0, 0), (0, 0)))  # zero rows: stay finite
    # l-major layout: a (L, TB, d_model) block flattens to (L*TB, d_model) rows.
    emb_t = jnp.transpose(emb, (1, 0, 2))                  # (L, Bp, d_model)

    bf = jnp.bfloat16
    # Hoisted weight-only transforms (input independent): -exp(A_log), fc padding, bf16.
    A_neg = -jnp.exp(params["A_logT"])                     # (d_state, d_inner)
    fc_w_pad = (jnp.zeros((d_model, n_pad), jnp.float32)
                .at[:, :n_classes].set(params["fc_w"])).astype(bf)
    fc_b_pad = (jnp.zeros((1, n_pad), jnp.float32)
                .at[:, :n_classes].set(params["fc_b"]))

    weights = [
        params["norm1_w"],
        params["in_x_w"].astype(bf), params["in_z_w"].astype(bf),
        params["conv_w"], params["conv_b"],
        params["xproj_dt_w"].astype(bf), params["xproj_B_w"].astype(bf),
        params["xproj_C_w"].astype(bf),
        params["dt_w"].astype(bf), params["dt_b"],
        A_neg, params["D"],
        params["out_w"].astype(bf), params["normf_w"],
        fc_w_pad, fc_b_pad,
    ]

    in_specs = [pl.BlockSpec((L, TB, d_model), lambda b: (0, b, 0))]
    # Weights are grid-invariant (constant index map) so they are fetched once; at toy
    # sizes the default double-buffer VMEM overhead is negligible.
    in_specs += [_replicated_spec(w) for w in weights]
    out_spec = pl.BlockSpec((L, TB, n_pad), lambda b: (0, b, 0))

    P = (d_conv - 1) * TB
    scratch = [
        pltpu.VMEM((P + L * TB, d_inner), jnp.float32),      # zero-padded conv input
        pltpu.VMEM((L, d_state, TB, d_inner), jnp.float32),  # exp(delta*A)
        pltpu.VMEM((L, d_state, TB, d_inner), jnp.float32),  # delta*u*B
        pltpu.VMEM((L, d_state, TB, d_inner), jnp.float32),  # C broadcast
        pltpu.VMEM((L, TB, d_inner), jnp.float32),           # scan outputs y
    ]

    kernel = functools.partial(mamba_classifier_kernel, d_conv=d_conv)
    out = pl.pallas_call(
        kernel,
        out_shape=jax.ShapeDtypeStruct((L, Bp, n_pad), jnp.float32),
        grid_spec=pltpu.PrefetchScalarGridSpec(
            num_scalar_prefetch=0,
            grid=(Bp // TB,),
            in_specs=in_specs,
            out_specs=out_spec,
            scratch_shapes=scratch,
        ),
        compiler_params=pltpu.CompilerParams(
            dimension_semantics=("parallel",),   # independent batch tiles (v7x: 2 TCs)
        ),
    )(emb_t, *weights)
    # back to (B, L, n_classes)
    return jnp.transpose(out, (1, 0, 2))[:B, :, :n_classes]


# ----------------------------------------------------------------------------
# Deterministic parameter init (synthetic; mirrors the shapes the module implies)
# ----------------------------------------------------------------------------
def init_params(key, n_tokens, d_model, n_classes, d_inner, d_state, d_conv, dt_rank):
    ks = jax.random.split(key, 12)

    def nrm(k, shape, scale):
        return jax.random.normal(k, shape, jnp.float32) * scale

    a_log = jnp.log(jnp.arange(1, d_state + 1, dtype=jnp.float32))
    return dict(
        emb=nrm(ks[0], (n_tokens, d_model), 0.1),
        norm1_w=jnp.ones((1, d_model), jnp.float32),
        in_x_w=nrm(ks[1], (d_model, d_inner), 1.0 / math.sqrt(d_model)),
        in_z_w=nrm(ks[2], (d_model, d_inner), 1.0 / math.sqrt(d_model)),
        conv_w=nrm(ks[3], (d_conv, d_inner), 1.0 / math.sqrt(d_conv)),
        conv_b=nrm(ks[4], (1, d_inner), 0.1),
        xproj_dt_w=nrm(ks[5], (d_inner, dt_rank), 1.0 / math.sqrt(d_inner)),
        xproj_B_w=nrm(ks[6], (d_inner, d_state), 1.0 / math.sqrt(d_inner)),
        xproj_C_w=nrm(ks[7], (d_inner, d_state), 1.0 / math.sqrt(d_inner)),
        dt_w=nrm(ks[8], (dt_rank, d_inner), 1.0 / math.sqrt(dt_rank)),
        dt_b=nrm(ks[9], (1, d_inner), 0.1),
        A_logT=jnp.tile(a_log[:, None], (1, d_inner)),    # (d_state, d_inner)
        D=jnp.ones((1, d_inner), jnp.float32),
        out_w=nrm(ks[10], (d_inner, d_model), 1.0 / math.sqrt(d_inner)),
        normf_w=jnp.ones((1, d_model), jnp.float32),
        fc_w=nrm(ks[11], (d_model, n_classes), 1.0 / math.sqrt(d_model)),
        fc_b=jnp.zeros((1, n_classes), jnp.float32),
    )


# ----------------------------------------------------------------------------
# Pure-JAX reference (same math and same bf16-input / f32-accum matmul policy as the
# kernel, so the correctness check isolates the Pallas implementation itself).
# ----------------------------------------------------------------------------
def reference_forward(tokens, p, d_conv):
    bf = jnp.bfloat16

    def mm(a, w):
        return jnp.dot(a.astype(bf), w.astype(bf), preferred_element_type=jnp.float32)

    x = jnp.take(p["emb"], tokens, axis=0)         # (B, L, D)
    B, L, _ = x.shape
    xn = _rmsnorm(x, p["norm1_w"][0])
    xs = mm(xn, p["in_x_w"])
    z = mm(xn, p["in_z_w"])

    xp = jnp.pad(xs, ((0, 0), (d_conv - 1, 0), (0, 0)))
    acc = jnp.broadcast_to(p["conv_b"][0], xs.shape)
    for k in range(d_conv):
        acc = acc + xp[:, k:k + L, :] * p["conv_w"][k]
    x_act = _silu(acc)

    delta = _softplus(mm(mm(x_act, p["xproj_dt_w"]), p["dt_w"]) + p["dt_b"][0])
    Bm = mm(x_act, p["xproj_B_w"])
    Cm = mm(x_act, p["xproj_C_w"])
    A = -jnp.exp(p["A_logT"].T)                    # (d_inner, d_state)

    h = jnp.zeros((B, A.shape[0], A.shape[1]), jnp.float32)
    ys = []
    for t in range(L):
        dA = jnp.exp(delta[:, t, :, None] * A)
        dBu = delta[:, t, :, None] * x_act[:, t, :, None] * Bm[:, t, None, :]
        h = dA * h + dBu
        ys.append(jnp.sum(h * Cm[:, t, None, :], axis=-1))
    y = jnp.stack(ys, axis=1) + x_act * p["D"][0]
    y = y * _silu(z)

    res = x + mm(y, p["out_w"])
    hn = _rmsnorm(res, p["normf_w"][0])
    return mm(hn, p["fc_w"]) + p["fc_b"][0]


if __name__ == "__main__":
    B, L = 2, 8
    n_tokens, n_embed, n_classes = 64, 32, 10
    d_inner, d_state, d_conv = 2 * n_embed, 16, 4
    dt_rank = math.ceil(n_embed / 16)

    key = jax.random.PRNGKey(0)
    kp, kt = jax.random.split(key)
    params = init_params(kp, n_tokens, n_embed, n_classes,
                         d_inner, d_state, d_conv, dt_rank)
    tokens = jax.random.randint(kt, (B, L), 0, n_tokens)

    out = mamba_classifier_forward(tokens, params, d_conv=d_conv)
    out = jax.block_until_ready(out)
    assert out.shape == (B, L, n_classes)

    ref = reference_forward(tokens, params, d_conv)
    np.testing.assert_allclose(np.asarray(out), np.asarray(ref), rtol=5e-3, atol=5e-3)

    print("KERNEL_OK")
</pallas_src>

<mosaic_0001>
module attributes {stable_mosaic.version = 11 : i64} {
  func.func @mamba_classifier_kernel(%arg0: i32, %arg1: memref<8x8x32xf32, #tpu.memory_space<vmem>>, %arg2: memref<1x32xf32, #tpu.memory_space<vmem>>, %arg3: memref<32x64xbf16, #tpu.memory_space<vmem>>, %arg4: memref<32x64xbf16, #tpu.memory_space<vmem>>, %arg5: memref<4x64xf32, #tpu.memory_space<vmem>>, %arg6: memref<1x64xf32, #tpu.memory_space<vmem>>, %arg7: memref<64x2xbf16, #tpu.memory_space<vmem>>, %arg8: memref<64x16xbf16, #tpu.memory_space<vmem>>, %arg9: memref<64x16xbf16, #tpu.memory_space<vmem>>, %arg10: memref<2x64xbf16, #tpu.memory_space<vmem>>, %arg11: memref<1x64xf32, #tpu.memory_space<vmem>>, %arg12: memref<16x64xf32, #tpu.memory_space<vmem>>, %arg13: memref<1x64xf32, #tpu.memory_space<vmem>>, %arg14: memref<64x32xbf16, #tpu.memory_space<vmem>>, %arg15: memref<1x32xf32, #tpu.memory_space<vmem>>, %arg16: memref<32x128xbf16, #tpu.memory_space<vmem>>, %arg17: memref<1x128xf32, #tpu.memory_space<vmem>>, %arg18: memref<8x8x128xf32, #tpu.memory_space<vmem>>, %arg19: memref<88x64xf32, #tpu.memory_space<vmem>>, %arg20: memref<8x16x8x64xf32, #tpu.memory_space<vmem>>, %arg21: memref<8x16x8x64xf32, #tpu.memory_space<vmem>>, %arg22: memref<8x16x8x64xf32, #tpu.memory_space<vmem>>, %arg23: memref<8x8x64xf32, #tpu.memory_space<vmem>>) attributes {dimension_semantics = [#tpu.dimension_semantics<parallel>], iteration_bounds = array<i64: 1>, scalar_prefetch = 0 : i64, scratch_operands = 5 : i64, tpu.core_type = #tpu.core_type<tc>, window_params = [{transform_indices = @transform_0, window_bounds = array<i64: 8, 8, 32>}, {pipeline_mode = #tpu.pipeline_mode<synchronous>, transform_indices = @transform_1, window_bounds = array<i64: 1, 32>}, {pipeline_mode = #tpu.pipeline_mode<synchronous>, transform_indices = @transform_2, window_bounds = array<i64: 32, 64>}, {pipeline_mode = #tpu.pipeline_mode<synchronous>, transform_indices = @transform_3, window_bounds = array<i64: 32, 64>}, {pipeline_mode = #tpu.pipeline_mode<synchronous>, transform_indices = @transform_4, window_bounds = array<i64: 4, 64>}, {pipeline_mode = #tpu.pipeline_mode<synchronous>, transform_indices = @transform_5, window_bounds = array<i64: 1, 64>}, {pipeline_mode = #tpu.pipeline_mode<synchronous>, transform_indices = @transform_6, window_bounds = array<i64: 64, 2>}, {pipeline_mode = #tpu.pipeline_mode<synchronous>, transform_indices = @transform_7, window_bounds = array<i64: 64, 16>}, {pipeline_mode = #tpu.pipeline_mode<synchronous>, transform_indices = @transform_8, window_bounds = array<i64: 64, 16>}, {pipeline_mode = #tpu.pipeline_mode<synchronous>, transform_indices = @transform_9, window_bounds = array<i64: 2, 64>}, {pipeline_mode = #tpu.pipeline_mode<synchronous>, transform_indices = @transform_10, window_bounds = array<i64: 1, 64>}, {pipeline_mode = #tpu.pipeline_mode<synchronous>, transform_indices = @transform_11, window_bounds = array<i64: 16, 64>}, {pipeline_mode = #tpu.pipeline_mode<synchronous>, transform_indices = @transform_12, window_bounds = array<i64: 1, 64>}, {pipeline_mode = #tpu.pipeline_mode<synchronous>, transform_indices = @transform_13, window_bounds = array<i64: 64, 32>}, {pipeline_mode = #tpu.pipeline_mode<synchronous>, transform_indices = @transform_14, window_bounds = array<i64: 1, 32>}, {pipeline_mode = #tpu.pipeline_mode<synchronous>, transform_indices = @transform_15, window_bounds = array<i64: 32, 128>}, {pipeline_mode = #tpu.pipeline_mode<synchronous>, transform_indices = @transform_16, window_bounds = array<i64: 1, 128>}, {transform_indices = @transform_17, window_bounds = array<i64: 8, 8, 128>}]} {
    %c0 = arith.constant 0 : index
    %c0_0 = arith.constant 0 : index
    %c0_1 = arith.constant 0 : index
    %0 = vector.load %arg1[%c0, %c0_0, %c0_1] : memref<8x8x32xf32, #tpu.memory_space<vmem>>, vector<8x8x32xf32>
    %1 = vector.shape_cast %0 : vector<8x8x32xf32> to vector<64x32xf32>
    %c0_2 = arith.constant 0 : index
    %c0_3 = arith.constant 0 : index
    %2 = vector.load %arg2[%c0_2, %c0_3] : memref<1x32xf32, #tpu.memory_space<vmem>>, vector<1x32xf32>
    %3 = arith.mulf %1, %1 : vector<64x32xf32>
    %cst = arith.constant dense<0.000000e+00> : vector<64xf32>
    %4 = vector.multi_reduction <add>, %3, %cst [1] : vector<64x32xf32> to vector<64xf32>
    %5 = vector.shape_cast %4 : vector<64xf32> to vector<64x1xf32>
    %cst_4 = arith.constant 3.200000e+01 : f32
    %6 = vector.broadcast %cst_4 : f32 to vector<64x1xf32>
    %7 = arith.divf %5, %6 : vector<64x1xf32>
    %cst_5 = arith.constant 9.99999974E-6 : f32
    %8 = vector.broadcast %cst_5 : f32 to vector<64x1xf32>
    %9 = arith.addf %7, %8 : vector<64x1xf32>
    %10 = math.rsqrt %9 : vector<64x1xf32>
    %11 = vector.broadcast %10 : vector<64x1xf32> to vector<64x32xf32>
    %12 = arith.mulf %1, %11 : vector<64x32xf32>
    %13 = vector.broadcast %2 : vector<1x32xf32> to vector<64x32xf32>
    %14 = arith.mulf %12, %13 : vector<64x32xf32>
    %15 = arith.truncf %14 : vector<64x32xf32> to vector<64x32xbf16>
    %c0_6 = arith.constant 0 : index
    %c0_7 = arith.constant 0 : index
    %16 = vector.load %arg3[%c0_6, %c0_7] : memref<32x64xbf16, #tpu.memory_space<vmem>>, vector<32x64xbf16>
    %cst_8 = arith.constant dense<0.000000e+00> : vector<64x64xf32>
    %17 = tpu.matmul %15, %16, %cst_8 {dimension_numbers = #tpu.dot_dimension_numbers<[1], [0], [0], [1], [0, 0, 1, 1], [], []>} : vector<64x32xbf16>, vector<32x64xbf16>, vector<64x64xf32> -> vector<64x64xf32>
    %c0_9 = arith.constant 0 : index
    %c0_10 = arith.constant 0 : index
    %18 = vector.load %arg4[%c0_9, %c0_10] : memref<32x64xbf16, #tpu.memory_space<vmem>>, vector<32x64xbf16>
    %cst_11 = arith.constant dense<0.000000e+00> : vector<64x64xf32>
    %19 = tpu.matmul %15, %18, %cst_11 {dimension_numbers = #tpu.dot_dimension_numbers<[1], [0], [0], [1], [0, 0, 1, 1], [], []>} : vector<64x32xbf16>, vector<32x64xbf16>, vector<64x64xf32> -> vector<64x64xf32>
    %cst_12 = arith.constant 0.000000e+00 : f32
    %20 = vector.broadcast %cst_12 : f32 to vector<24x64xf32>
    %c0_13 = arith.constant 0 : index
    %c0_14 = arith.constant 0 : index
    %21 = vector.load %arg19[%c0_13, %c0_14] : memref<88x64xf32, #tpu.memory_space<vmem>>, vector<24x64xf32>
    tpu.vector_store %arg19[%c0_13, %c0_14], %20 {strides = array<i32>} : memref<88x64xf32, #tpu.memory_space<vmem>>, vector<24x64xf32>,
    %c24 = arith.constant 24 : index
    %c0_15 = arith.constant 0 : index
    %22 = vector.load %arg19[%c24, %c0_15] : memref<88x64xf32, #tpu.memory_space<vmem>>, vector<64x64xf32>
    tpu.vector_store %arg19[%c24, %c0_15], %17 {strides = array<i32>} : memref<88x64xf32, #tpu.memory_space<vmem>>, vector<64x64xf32>,
    %c0_16 = arith.constant 0 : index
    %c0_17 = arith.constant 0 : index
    %23 = vector.load %arg5[%c0_16, %c0_17] : memref<4x64xf32, #tpu.memory_space<vmem>>, vector<4x64xf32>
    %c0_18 = arith.constant 0 : index
    %c0_19 = arith.constant 0 : index
    %24 = vector.load %arg6[%c0_18, %c0_19] : memref<1x64xf32, #tpu.memory_space<vmem>>, vector<1x64xf32>
    %25 = vector.shape_cast %24 : vector<1x64xf32> to vector<1x64xf32>
    %26 = vector.broadcast %25 : vector<1x64xf32> to vector<64x64xf32>
    %c0_20 = arith.constant 0 : index
    %c0_21 = arith.constant 0 : index
    %27 = vector.load %arg19[%c0_20, %c0_21] : memref<88x64xf32, #tpu.memory_space<vmem>>, vector<64x64xf32>
    %28 = vector.extract_strided_slice %23 {offsets = [0, 0], sizes = [1, 64], strides = [1, 1]} : vector<4x64xf32> to vector<1x64xf32>
    %29 = vector.broadcast %28 : vector<1x64xf32> to vector<64x64xf32>
    %30 = arith.mulf %27, %29 : vector<64x64xf32>
    %31 = arith.addf %26, %30 : vector<64x64xf32>
    %c8 = arith.constant 8 : index
    %c0_22 = arith.constant 0 : index
    %32 = vector.load %arg19[%c8, %c0_22] : memref<88x64xf32, #tpu.memory_space<vmem>>, vector<64x64xf32>
    %33 = vector.extract_strided_slice %23 {offsets = [1, 0], sizes = [1, 64], strides = [1, 1]} : vector<4x64xf32> to vector<1x64xf32>
    %34 = vector.broadcast %33 : vector<1x64xf32> to vector<64x64xf32>
    %35 = arith.mulf %32, %34 : vector<64x64xf32>
    %36 = arith.addf %31, %35 : vector<64x64xf32>
    %c16 = arith.constant 16 : index
    %c0_23 = arith.constant 0 : index
    %37 = vector.load %arg19[%c16, %c0_23] : memref<88x64xf32, #tpu.memory_space<vmem>>, vector<64x64xf32>
    %38 = vector.extract_strided_slice %23 {offsets = [2, 0], sizes = [1, 64], strides = [1, 1]} : vector<4x64xf32> to vector<1x64xf32>
    %39 = vector.broadcast %38 : vector<1x64xf32> to vector<64x64xf32>
    %40 = arith.mulf %37, %39 : vector<64x64xf32>
    %41 = arith.addf %36, %40 : vector<64x64xf32>
    %c24_24 = arith.constant 24 : index
    %c0_25 = arith.constant 0 : index
    %42 = vector.load %arg19[%c24_24, %c0_25] : memref<88x64xf32, #tpu.memory_space<vmem>>, vector<64x64xf32>
    %43 = vector.extract_strided_slice %23 {offsets = [3, 0], sizes = [1, 64], strides = [1, 1]} : vector<4x64xf32> to vector<1x64xf32>
    %44 = vector.broadcast %43 : vector<1x64xf32> to vector<64x64xf32>
    %45 = arith.mulf %42, %44 : vector<64x64xf32>
    %46 = arith.addf %41, %45 : vector<64x64xf32>
    %cst_26 = arith.constant 0.000000e+00 : f32
    %47 = vector.broadcast %cst_26 : f32 to vector<64x64xf32>
    %48 = arith.subf %47, %46 : vector<64x64xf32>
    %49 = math.exp %48 : vector<64x64xf32>
    %cst_27 = arith.constant 1.000000e+00 : f32
    %50 = vector.broadcast %cst_27 : f32 to vector<64x64xf32>
    %51 = arith.addf %50, %49 : vector<64x64xf32>
    %cst_28 = arith.constant 1.000000e+00 : f32
    %52 = vector.broadcast %cst_28 : f32 to vector<64x64xf32>
    %53 = arith.divf %52, %51 : vector<64x64xf32>
    %54 = arith.mulf %46, %53 : vector<64x64xf32>
    %55 = arith.truncf %54 : vector<64x64xf32> to vector<64x64xbf16>
    %c0_29 = arith.constant 0 : index
    %c0_30 = arith.constant 0 : index
    %56 = vector.load %arg7[%c0_29, %c0_30] : memref<64x2xbf16, #tpu.memory_space<vmem>>, vector<64x2xbf16>
    %cst_31 = arith.constant dense<0.000000e+00> : vector<64x2xf32>
    %57 = tpu.matmul %55, %56, %cst_31 {dimension_numbers = #tpu.dot_dimension_numbers<[1], [0], [0], [1], [0, 0, 1, 1], [], []>} : vector<64x64xbf16>, vector<64x2xbf16>, vector<64x2xf32> -> vector<64x2xf32>
    %58 = arith.truncf %57 : vector<64x2xf32> to vector<64x2xbf16>
    %c0_32 = arith.constant 0 : index
    %c0_33 = arith.constant 0 : index
    %59 = vector.load %arg10[%c0_32, %c0_33] : memref<2x64xbf16, #tpu.memory_space<vmem>>, vector<2x64xbf16>
    %cst_34 = arith.constant dense<0.000000e+00> : vector<64x64xf32>
    %60 = tpu.matmul %58, %59, %cst_34 {dimension_numbers = #tpu.dot_dimension_numbers<[1], [0], [0], [1], [0, 0, 1, 1], [], []>} : vector<64x2xbf16>, vector<2x64xbf16>, vector<64x64xf32> -> vector<64x64xf32>
    %c0_35 = arith.constant 0 : index
    %c0_36 = arith.constant 0 : index
    %61 = vector.load %arg11[%c0_35, %c0_36] : memref<1x64xf32, #tpu.memory_space<vmem>>, vector<1x64xf32>
    %62 = vector.broadcast %61 : vector<1x64xf32> to vector<64x64xf32>
    %63 = arith.addf %60, %62 : vector<64x64xf32>
    %cst_37 = arith.constant 2.000000e+01 : f32
    %64 = vector.broadcast %cst_37 : f32 to vector<64x64xf32>
    %65 = arith.cmpf ogt, %63, %64 : vector<64x64xf32>
    %66 = math.exp %63 : vector<64x64xf32>
    %cst_38 = arith.constant 1.000000e+00 : f32
    %67 = vector.broadcast %cst_38 : f32 to vector<64x64xf32>
    %68 = arith.addf %67, %66 : vector<64x64xf32>
    %69 = math.log %68 : vector<64x64xf32>
    %70 = arith.select %65, %63, %69 : vector<64x64xi1>, vector<64x64xf32>
    %c0_39 = arith.constant 0 : index
    %c0_40 = arith.constant 0 : index
    %71 = vector.load %arg8[%c0_39, %c0_40] : memref<64x16xbf16, #tpu.memory_space<vmem>>, vector<64x16xbf16>
    %cst_41 = arith.constant dense<0.000000e+00> : vector<64x16xf32>
    %72 = tpu.matmul %55, %71, %cst_41 {dimension_numbers = #tpu.dot_dimension_numbers<[1], [0], [0], [1], [0, 0, 1, 1], [], []>} : vector<64x64xbf16>, vector<64x16xbf16>, vector<64x16xf32> -> vector<64x16xf32>
    %c0_42 = arith.constant 0 : index
    %c0_43 = arith.constant 0 : index
    %73 = vector.load %arg9[%c0_42, %c0_43] : memref<64x16xbf16, #tpu.memory_space<vmem>>, vector<64x16xbf16>
    %cst_44 = arith.constant dense<0.000000e+00> : vector<64x16xf32>
    %74 = tpu.matmul %55, %73, %cst_44 {dimension_numbers = #tpu.dot_dimension_numbers<[1], [0], [0], [1], [0, 0, 1, 1], [], []>} : vector<64x64xbf16>, vector<64x16xbf16>, vector<64x16xf32> -> vector<64x16xf32>
    %75 = vector.shape_cast %70 : vector<64x64xf32> to vector<8x8x64xf32>
    %76 = arith.mulf %70, %54 : vector<64x64xf32>
    %77 = vector.shape_cast %76 : vector<64x64xf32> to vector<8x8x64xf32>
    %78 = vector.shape_cast %72 : vector<64x16xf32> to vector<8x8x16xf32>
    %79 = vector.shape_cast %74 : vector<64x16xf32> to vector<8x8x16xf32>
    %c0_45 = arith.constant 0 : index
    %c0_46 = arith.constant 0 : index
    %80 = vector.load %arg12[%c0_45, %c0_46] : memref<16x64xf32, #tpu.memory_space<vmem>>, vector<16x64xf32>
    %81 = vector.extract_strided_slice %80 {offsets = [0, 0], sizes = [1, 64], strides = [1, 1]} : vector<16x64xf32> to vector<1x64xf32>
    %82 = vector.shape_cast %81 : vector<1x64xf32> to vector<1x1x64xf32>
    %83 = vector.broadcast %82 : vector<1x1x64xf32> to vector<8x8x64xf32>
    %84 = arith.mulf %75, %83 : vector<8x8x64xf32>
    %85 = math.exp %84 : vector<8x8x64xf32>
    %86 = vector.shape_cast %85 : vector<8x8x64xf32> to vector<8x1x8x64xf32>
    %c0_47 = arith.constant 0 : index
    %c0_48 = arith.constant 0 : index
    %c0_49 = arith.constant 0 : index
    %c0_50 = arith.constant 0 : index
    %87 = vector.load %arg20[%c0_47, %c0_48, %c0_49, %c0_50] : memref<8x16x8x64xf32, #tpu.memory_space<vmem>>, vector<8x1x8x64xf32>
    tpu.vector_store %arg20[%c0_47, %c0_48, %c0_49, %c0_50], %86 {strides = array<i32>} : memref<8x16x8x64xf32, #tpu.memory_space<vmem>>, vector<8x1x8x64xf32>,
    %88 = vector.extract_strided_slice %78 {offsets = [0, 0, 0], sizes = [8, 8, 1], strides = [1, 1, 1]} : vector<8x8x16xf32> to vector<8x8x1xf32>
    %89 = vector.broadcast %88 : vector<8x8x1xf32> to vector<8x8x64xf32>
    %90 = arith.mulf %77, %89 : vector<8x8x64xf32>
    %91 = vector.shape_cast %90 : vector<8x8x64xf32> to vector<8x1x8x64xf32>
    %c0_51 = arith.constant 0 : index
    %c0_52 = arith.constant 0 : index
    %c0_53 = arith.constant 0 : index
    %c0_54 = arith.constant 0 : index
    %92 = vector.load %arg21[%c0_51, %c0_52, %c0_53, %c0_54] : memref<8x16x8x64xf32, #tpu.memory_space<vmem>>, vector<8x1x8x64xf32>
    tpu.vector_store %arg21[%c0_51, %c0_52, %c0_53, %c0_54], %91 {strides = array<i32>} : memref<8x16x8x64xf32, #tpu.memory_space<vmem>>, vector<8x1x8x64xf32>,
    %93 = vector.extract_strided_slice %79 {offsets = [0, 0, 0], sizes = [8, 8, 1], strides = [1, 1, 1]} : vector<8x8x16xf32> to vector<8x8x1xf32>
    %94 = vector.shape_cast %93 : vector<8x8x1xf32> to vector<8x8x1xf32>
    %95 = vector.broadcast %94 : vector<8x8x1xf32> to vector<8x8x64xf32>
    %96 = vector.shape_cast %95 : vector<8x8x64xf32> to vector<8x1x8x64xf32>
    %c0_55 = arith.constant 0 : index
    %c0_56 = arith.constant 0 : index
    %c0_57 = arith.constant 0 : index
    %c0_58 = arith.constant 0 : index
    %97 = vector.load %arg22[%c0_55, %c0_56, %c0_57, %c0_58] : memref<8x16x8x64xf32, #tpu.memory_space<vmem>>, vector<8x1x8x64xf32>
    tpu.vector_store %arg22[%c0_55, %c0_56, %c0_57, %c0_58], %96 {strides = array<i32>} : memref<8x16x8x64xf32, #tpu.memory_space<vmem>>, vector<8x1x8x64xf32>,
    %98 = vector.extract_strided_slice %80 {offsets = [1, 0], sizes = [1, 64], strides = [1, 1]} : vector<16x64xf32> to vector<1x64xf32>
    %99 = vector.shape_cast %98 : vector<1x64xf32> to vector<1x1x64xf32>
    %100 = vector.broadcast %99 : vector<1x1x64xf32> to vector<8x8x64xf32>
    %101 = arith.mulf %75, %100 : vector<8x8x64xf32>
    %102 = math.exp %101 : vector<8x8x64xf32>
    %103 = vector.shape_cast %102 : vector<8x8x64xf32> to vector<8x1x8x64xf32>
    %c0_59 = arith.constant 0 : index
    %c1 = arith.constant 1 : index
    %c0_60 = arith.constant 0 : index
    %c0_61 = arith.constant 0 : index
    %104 = vector.load %arg20[%c0_59, %c1, %c0_60, %c0_61] : memref<8x16x8x64xf32, #tpu.memory_space<vmem>>, vector<8x1x8x64xf32>
    tpu.vector_store %arg20[%c0_59, %c1, %c0_60, %c0_61], %103 {strides = array<i32>} : memref<8x16x8x64xf32, #tpu.memory_space<vmem>>, vector<8x1x8x64xf32>,
    %105 = vector.extract_strided_slice %78 {offsets = [0, 0, 1], sizes = [8, 8, 1], strides = [1, 1, 1]} : vector<8x8x16xf32> to vector<8x8x1xf32>
    %106 = vector.broadcast %105 : vector<8x8x1xf32> to vector<8x8x64xf32>
    %107 = arith.mulf %77, %106 : vector<8x8x64xf32>
    %108 = vector.shape_cast %107 : vector<8x8x64xf32> to vector<8x1x8x64xf32>
    %c0_62 = arith.constant 0 : index
    %c1_63 = arith.constant 1 : index
    %c0_64 = arith.constant 0 : index
    %c0_65 = arith.constant 0 : index
    %109 = vector.load %arg21[%c0_62, %c1_63, %c0_64, %c0_65] : memref<8x16x8x64xf32, #tpu.memory_space<vmem>>, vector<8x1x8x64xf32>
    tpu.vector_store %arg21[%c0_62, %c1_63, %c0_64, %c0_65], %108 {strides = array<i32>} : memref<8x16x8x64xf32, #tpu.memory_space<vmem>>, vector<8x1x8x64xf32>,
    %110 = vector.extract_strided_slice %79 {offsets = [0, 0, 1], sizes = [8, 8, 1], strides = [1, 1, 1]} : vector<8x8x16xf32> to vector<8x8x1xf32>
    %111 = vector.shape_cast %110 : vector<8x8x1xf32> to vector<8x8x1xf32>
    %112 = vector.broadcast %111 : vector<8x8x1xf32> to vector<8x8x64xf32>
    %113 = vector.shape_cast %112 : vector<8x8x64xf32> to vector<8x1x8x64xf32>
    %c0_66 = arith.constant 0 : index
    %c1_67 = arith.constant 1 : index
    %c0_68 = arith.constant 0 : index
    %c0_69 = arith.constant 0 : index
    %114 = vector.load %arg22[%c0_66, %c1_67, %c0_68, %c0_69] : memref<8x16x8x64xf32, #tpu.memory_space<vmem>>, vector<8x1x8x64xf32>
    tpu.vector_store %arg22[%c0_66, %c1_67, %c0_68, %c0_69], %113 {strides = array<i32>} : memref<8x16x8x64xf32, #tpu.memory_space<vmem>>, vector<8x1x8x64xf32>,
    %115 = vector.extract_strided_slice %80 {offsets = [2, 0], sizes = [1, 64], strides = [1, 1]} : vector<16x64xf32> to vector<1x64xf32>
    %116 = vector.shape_cast %115 : vector<1x64xf32> to vector<1x1x64xf32>
    %117 = vector.broadcast %116 : vector<1x1x64xf32> to vector<8x8x64xf32>
    %118 = arith.mulf %75, %117 : vector<8x8x64xf32>
    %119 = math.exp %118 : vector<8x8x64xf32>
    %120 = vector.shape_cast %119 : vector<8x8x64xf32> to vector<8x1x8x64xf32>
    %c0_70 = arith.constant 0 : index
    %c2 = arith.constant 2 : index
    %c0_71 = arith.constant 0 : index
    %c0_72 = arith.constant 0 : index
    %121 = vector.load %arg20[%c0_70, %c2, %c0_71, %c0_72] : memref<8x16x8x64xf32, #tpu.memory_space<vmem>>, vector<8x1x8x64xf32>
    tpu.vector_store %arg20[%c0_70, %c2, %c0_71, %c0_72], %120 {strides = array<i32>} : memref<8x16x8x64xf32, #tpu.memory_space<vmem>>, vector<8x1x8x64xf32>,
    %122 = vector.extract_strided_slice %78 {offsets = [0, 0, 2], sizes = [8, 8, 1], strides = [1, 1, 1]} : vector<8x8x16xf32> to vector<8x8x1xf32>
    %123 = vector.broadcast %122 : vector<8x8x1xf32> to vector<8x8x64xf32>
    %124 = arith.mulf %77, %123 : vector<8x8x64xf32>
    %125 = vector.shape_cast %124 : vector<8x8x64xf32> to vector<8x1x8x64xf32>
    %c0_73 = arith.constant 0 : index
    %c2_74 = arith.constant 2 : index
    %c0_75 = arith.constant 0 : index
    %c0_76 = arith.constant 0 : index
    %126 = vector.load %arg21[%c0_73, %c2_74, %c0_75, %c0_76] : memref<8x16x8x64xf32, #tpu.memory_space<vmem>>, vector<8x1x8x64xf32>
    tpu.vector_store %arg21[%c0_73, %c2_74, %c0_75, %c0_76], %125 {strides = array<i32>} : memref<8x16x8x64xf32, #tpu.memory_space<vmem>>, vector<8x1x8x64xf32>,
    %127 = vector.extract_strided_slice %79 {offsets = [0, 0, 2], sizes = [8, 8, 1], strides = [1, 1, 1]} : vector<8x8x16xf32> to vector<8x8x1xf32>
    %128 = vector.shape_cast %127 : vector<8x8x1xf32> to vector<8x8x1xf32>
    %129 = vector.broadcast %128 : vector<8x8x1xf32> to vector<8x8x64xf32>
    %130 = vector.shape_cast %129 : vector<8x8x64xf32> to vector<8x1x8x64xf32>
    %c0_77 = arith.constant 0 : index
    %c2_78 = arith.constant 2 : index
    %c0_79 = arith.constant 0 : index
    %c0_80 = arith.constant 0 : index
    %131 = vector.load %arg22[%c0_77, %c2_78, %c0_79, %c0_80] : memref<8x16x8x64xf32, #tpu.memory_space<vmem>>, vector<8x1x8x64xf32>
    tpu.vector_store %arg22[%c0_77, %c2_78, %c0_79, %c0_80], %130 {strides = array<i32>} : memref<8x16x8x64xf32, #tpu.memory_space<vmem>>, vector<8x1x8x64xf32>,
    %132 = vector.extract_strided_slice %80 {offsets = [3, 0], sizes = [1, 64], strides = [1, 1]} : vector<16x64xf32> to vector<1x64xf32>
    %133 = vector.shape_cast %132 : vector<1x64xf32> to vector<1x1x64xf32>
    %134 = vector.broadcast %133 : vector<1x1x64xf32> to vector<8x8x64xf32>
    %135 = arith.mulf %75, %134 : vector<8x8x64xf32>
    %136 = math.exp %135 : vector<8x8x64xf32>
    %137 = vector.shape_cast %136 : vector<8x8x64xf32> to vector<8x1x8x64xf32>
    %c0_81 = arith.constant 0 : index
    %c3 = arith.constant 3 : index
    %c0_82 = arith.constant 0 : index
    %c0_83 = arith.constant 0 : index
    %138 = vector.load %arg20[%c0_81, %c3, %c0_82, %c0_83] : memref<8x16x8x64xf32, #tpu.memory_space<vmem>>, vector<8x1x8x64xf32>
    tpu.vector_store %arg20[%c0_81, %c3, %c0_82, %c0_83], %137 {strides = array<i32>} : memref<8x16x8x64xf32, #tpu.memory_space<vmem>>, vector<8x1x8x64xf32>,
    %139 = vector.extract_strided_slice %78 {offsets = [0, 0, 3], sizes = [8, 8, 1], strides = [1, 1, 1]} : vector<8x8x16xf32> to vector<8x8x1xf32>
    %140 = vector.broadcast %139 : vector<8x8x1xf32> to vector<8x8x64xf32>
    %141 = arith.mulf %77, %140 : vector<8x8x64xf32>
    %142 = vector.shape_cast %141 : vector<8x8x64xf32> to vector<8x1x8x64xf32>
    %c0_84 = arith.constant 0 : index
    %c3_85 = arith.constant 3 : index
    %c0_86 = arith.constant 0 : index
    %c0_87 = arith.constant 0 : index
    %143 = vector.load %arg21[%c0_84, %c3_85, %c0_86, %c0_87] : memref<8x16x8x64xf32, #tpu.memory_space<vmem>>, vector<8x1x8x64xf32>
    tpu.vector_store %arg21[%c0_84, %c3_85, %c0_86, %c0_87], %142 {strides = array<i32>} : memref<8x16x8x64xf32, #tpu.memory_space<vmem>>, vector<8x1x8x64xf32>,
    %144 = vector.extract_strided_slice %79 {offsets = [0, 0, 3], sizes = [8, 8, 1], strides = [1, 1, 1]} : vector<8x8x16xf32> to vector<8x8x1xf32>
    %145 = vector.shape_cast %144 : vector<8x8x1xf32> to vector<8x8x1xf32>
    %146 = vector.broadcast %145 : vector<8x8x1xf32> to vector<8x8x64xf32>
    %147 = vector.shape_cast %146 : vector<8x8x64xf32> to vector<8x1x8x64xf32>
    %c0_88 = arith.constant 0 : index
    %c3_89 = arith.constant 3 : index
    %c0_90 = arith.constant 0 : index
    %c0_91 = arith.constant 0 : index
    %148 = vector.load %arg22[%c0_88, %c3_89, %c0_90, %c0_91] : memref<8x16x8x64xf32, #tpu.memory_space<vmem>>, vector<8x1x8x64xf32>
    tpu.vector_store %arg22[%c0_88, %c3_89, %c0_90, %c0_91], %147 {strides = array<i32>} : memref<8x16x8x64xf32, #tpu.memory_space<vmem>>, vector<8x1x8x64xf32>,
    %149 = vector.extract_strided_slice %80 {offsets = [4, 0], sizes = [1, 64], strides = [1, 1]} : vector<16x64xf32> to vector<1x64xf32>
    %150 = vector.shape_cast %149 : vector<1x64xf32> to vector<1x1x64xf32>
    %151 = vector.broadcast %150 : vector<1x1x64xf32> to vector<8x8x64xf32>
    %152 = arith.mulf %75, %151 : vector<8x8x64xf32>
    %153 = math.exp %152 : vector<8x8x64xf32>
    %154 = vector.shape_cast %153 : vector<8x8x64xf32> to vector<8x1x8x64xf32>
    %c0_92 = arith.constant 0 : index
    %c4 = arith.constant 4 : index
    %c0_93 = arith.constant 0 : index
    %c0_94 = arith.constant 0 : index
    %155 = vector.load %arg20[%c0_92, %c4, %c0_93, %c0_94] : memref<8x16x8x64xf32, #tpu.memory_space<vmem>>, vector<8x1x8x64xf32>
    tpu.vector_store %arg20[%c0_92, %c4, %c0_93, %c0_94], %154 {strides = array<i32>} : memref<8x16x8x64xf32, #tpu.memory_space<vmem>>, vector<8x1x8x64xf32>,
    %156 = vector.extract_strided_slice %78 {offsets = [0, 0, 4], sizes = [8, 8, 1], strides = [1, 1, 1]} : vector<8x8x16xf32> to vector<8x8x1xf32>
    %157 = vector.broadcast %156 : vector<8x8x1xf32> to vector<8x8x64xf32>
    %158 = arith.mulf %77, %157 : vector<8x8x64xf32>
    %159 = vector.shape_cast %158 : vector<8x8x64xf32> to vector<8x1x8x64xf32>
    %c0_95 = arith.constant 0 : index
    %c4_96 = arith.constant 4 : index
    %c0_97 = arith.constant 0 : index
    %c0_98 = arith.constant 0 : index
    %160 = vector.load %arg21[%c0_95, %c4_96, %c0_97, %c0_98] : memref<8x16x8x64xf32, #tpu.memory_space<vmem>>, vector<8x1x8x64xf32>
    tpu.vector_store %arg21[%c0_95, %c4_96, %c0_97, %c0_98], %159 {strides = array<i32>} : memref<8x16x8x64xf32, #tpu.memory_space<vmem>>, vector<8x1x8x64xf32>,
    %161 = vector.extract_strided_slice %79 {offsets = [0, 0, 4], sizes = [8, 8, 1], strides = [1, 1, 1]} : vector<8x8x16xf32> to vector<8x8x1xf32>
    %162 = vector.shape_cast %161 : vector<8x8x1xf32> to vector<8x8x1xf32>
    %163 = vector.broadcast %162 : vector<8x8x1xf32> to vector<8x8x64xf32>
    %164 = vector.shape_cast %163 : vector<8x8x64xf32> to vector<8x1x8x64xf32>
    %c0_99 = arith.constant 0 : index
    %c4_100 = arith.constant 4 : index
    %c0_101 = arith.constant 0 : index
    %c0_102 = arith.constant 0 : index
    %165 = vector.load %arg22[%c0_99, %c4_100, %c0_101, %c0_102] : memref<8x16x8x64xf32, #tpu.memory_space<vmem>>, vector<8x1x8x64xf32>
    tpu.vector_store %arg22[%c0_99, %c4_100, %c0_101, %c0_102], %164 {strides = array<i32>} : memref<8x16x8x64xf32, #tpu.memory_space<vmem>>, vector<8x1x8x64xf32>,
    %166 = vector.extract_strided_slice %80 {offsets = [5, 0], sizes = [1, 64], strides = [1, 1]} : vector<16x64xf32> to vector<1x64xf32>
    %167 = vector.shape_cast %166 : vector<1x64xf32> to vector<1x1x64xf32>
    %168 = vector.broadcast %167 : vector<1x1x64xf32> to vector<8x8x64xf32>
    %169 = arith.mulf %75, %168 : vector<8x8x64xf32>
    %170 = math.exp %169 : vector<8x8x64xf32>
    %171 = vector.shape_cast %170 : vector<8x8x64xf32> to vector<8x1x8x64xf32>
    %c0_103 = arith.constant 0 : index
    %c5 = arith.constant 5 : index
    %c0_104 = arith.constant 0 : index
    %c0_105 = arith.constant 0 : index
    %172 = vector.load %arg20[%c0_103, %c5, %c0_104, %c0_105] : memref<8x16x8x64xf32, #tpu.memory_space<vmem>>, vector<8x1x8x64xf32>
    tpu.vector_store %arg20[%c0_103, %c5, %c0_104, %c0_105], %171 {strides = array<i32>} : memref<8x16x8x64xf32, #tpu.memory_space<vmem>>, vector<8x1x8x64xf32>,
    %173 = vector.extract_strided_slice %78 {offsets = [0, 0, 5], sizes = [8, 8, 1], strides = [1, 1, 1]} : vector<8x8x16xf32> to vector<8x8x1xf32>
    %174 = vector.broadcast %173 : vector<8x8x1xf32> to vector<8x8x64xf32>
    %175 = arith.mulf %77, %174 : vector<8x8x64xf32>
    %176 = vector.shape_cast %175 : vector<8x8x64xf32> to vector<8x1x8x64xf32>
    %c0_106 = arith.constant 0 : index
    %c5_107 = arith.constant 5 : index
    %c0_108 = arith.constant 0 : index
    %c0_109 = arith.constant 0 : index
    %177 = vector.load %arg21[%c0_106, %c5_107, %c0_108, %c0_109] : memref<8x16x8x64xf32, #tpu.memory_space<vmem>>, vector<8x1x8x64xf32>
    tpu.vector_store %arg21[%c0_106, %c5_107, %c0_108, %c0_109], %176 {strides = array<i32>} : memref<8x16x8x64xf32, #tpu.memory_space<vmem>>, vector<8x1x8x64xf32>,
    %178 = vector.extract_strided_slice %79 {offsets = [0, 0, 5], sizes = [8, 8, 1], strides = [1, 1, 1]} : vector<8x8x16xf32> to vector<8x8x1xf32>
    %179 = vector.shape_cast %178 : vector<8x8x1xf32> to vector<8x8x1xf32>
    %180 = vector.broadcast %179 : vector<8x8x1xf32> to vector<8x8x64xf32>
    %181 = vector.shape_cast %180 : vector<8x8x64xf32> to vector<8x1x8x64xf32>
    %c0_110 = arith.constant 0 : index
    %c5_111 = arith.constant 5 : index
    %c0_112 = arith.constant 0 : index
    %c0_113 = arith.constant 0 : index
    %182 = vector.load %arg22[%c0_110, %c5_111, %c0_112, %c0_113] : memref<8x16x8x64xf32, #tpu.memory_space<vmem>>, vector<8x1x8x64xf32>
    tpu.vector_store %arg22[%c0_110, %c5_111, %c0_112, %c0_113], %181 {strides = array<i32>} : memref<8x16x8x64xf32, #tpu.memory_space<vmem>>, vector<8x1x8x64xf32>,
    %183 = vector.extract_strided_slice %80 {offsets = [6, 0], sizes = [1, 64], strides = [1, 1]} : vector<16x64xf32> to vector<1x64xf32>
    %184 = vector.shape_cast %183 : vector<1x64xf32> to vector<1x1x64xf32>
    %185 = vector.broadcast %184 : vector<1x1x64xf32> to vector<8x8x64xf32>
    %186 = arith.mulf %75, %185 : vector<8x8x64xf32>
    %187 = math.exp %186 : vector<8x8x64xf32>
    %188 = vector.shape_cast %187 : vector<8x8x64xf32> to vector<8x1x8x64xf32>
    %c0_114 = arith.constant 0 : index
    %c6 = arith.constant 6 : index
    %c0_115 = arith.constant 0 : index
    %c0_116 = arith.constant 0 : index
    %189 = vector.load %arg20[%c0_114, %c6, %c0_115, %c0_116] : memref<8x16x8x64xf32, #tpu.memory_space<vmem>>, vector<8x1x8x64xf32>
    tpu.vector_store %arg20[%c0_114, %c6, %c0_115, %c0_116], %188 {strides = array<i32>} : memref<8x16x8x64xf32, #tpu.memory_space<vmem>>, vector<8x1x8x64xf32>,
    %190 = vector.extract_strided_slice %78 {offsets = [0, 0, 6], sizes = [8, 8, 1], strides = [1, 1, 1]} : vector<8x8x16xf32> to vector<8x8x1xf32>
    %191 = vector.broadcast %190 : vector<8x8x1xf32> to vector<8x8x64xf32>
    %192 = arith.mulf %77, %191 : vector<8x8x64xf32>
    %193 = vector.shape_cast %192 : vector<8x8x64xf32> to vector<8x1x8x64xf32>
    %c0_117 = arith.constant 0 : index
    %c6_118 = arith.constant 6 : index
    %c0_119 = arith.constant 0 : index
    %c0_120 = arith.constant 0 : index
    %194 = vector.load %arg21[%c0_117, %c6_118, %c0_119, %c0_120] : memref<8x16x8x64xf32, #tpu.memory_space<vmem>>, vector<8x1x8x64xf32>
    tpu.vector_store %arg21[%c0_117, %c6_118, %c0_119, %c0_120], %193 {strides = array<i32>} : memref<8x16x8x64xf32, #tpu.memory_space<vmem>>, vector<8x1x8x64xf32>,
    %195 = vector.extract_strided_slice %79 {offsets = [0, 0, 6], sizes = [8, 8, 1], strides = [1, 1, 1]} : vector<8x8x16xf32> to vector<8x8x1xf32>
    %196 = vector.shape_cast %195 : vector<8x8x1xf32> to vector<8x8x1xf32>
    %197 = vector.broadcast %196 : vector<8x8x1xf32> to vector<8x8x64xf32>
    %198 = vector.shape_cast %197 : vector<8x8x64xf32> to vector<8x1x8x64xf32>
    %c0_121 = arith.constant 0 : index
    %c6_122 = arith.constant 6 : index
    %c0_123 = arith.constant 0 : index
    %c0_124 = arith.constant 0 : index
    %199 = vector.load %arg22[%c0_121, %c6_122, %c0_123, %c0_124] : memref<8x16x8x64xf32, #tpu.memory_space<vmem>>, vector<8x1x8x64xf32>
    tpu.vector_store %arg22[%c0_121, %c6_122, %c0_123, %c0_124], %198 {strides = array<i32>} : memref<8x16x8x64xf32, #tpu.memory_space<vmem>>, vector<8x1x8x64xf32>,
    %200 = vector.extract_strided_slice %80 {offsets = [7, 0], sizes = [1, 64], strides = [1, 1]} : vector<16x64xf32> to vector<1x64xf32>
    %201 = vector.shape_cast %200 : vector<1x64xf32> to vector<1x1x64xf32>
    %202 = vector.broadcast %201 : vector<1x1x64xf32> to vector<8x8x64xf32>
    %203 = arith.mulf %75, %202 : vector<8x8x64xf32>
    %204 = math.exp %203 : vector<8x8x64xf32>
    %205 = vector.shape_cast %204 : vector<8x8x64xf32> to vector<8x1x8x64xf32>
    %c0_125 = arith.constant 0 : index
    %c7 = arith.constant 7 : index
    %c0_126 = arith.constant 0 : index
    %c0_127 = arith.constant 0 : index
    %206 = vector.load %arg20[%c0_125, %c7, %c0_126, %c0_127] : memref<8x16x8x64xf32, #tpu.memory_space<vmem>>, vector<8x1x8x64xf32>
    tpu.vector_store %arg20[%c0_125, %c7, %c0_126, %c0_127], %205 {strides = array<i32>} : memref<8x16x8x64xf32, #tpu.memory_space<vmem>>, vector<8x1x8x64xf32>,
    %207 = vector.extract_strided_slice %78 {offsets = [0, 0, 7], sizes = [8, 8, 1], strides = [1, 1, 1]} : vector<8x8x16xf32> to vector<8x8x1xf32>
    %208 = vector.broadcast %207 : vector<8x8x1xf32> to vector<8x8x64xf32>
    %209 = arith.mulf %77, %208 : vector<8x8x64xf32>
    %210 = vector.shape_cast %209 : vector<8x8x64xf32> to vector<8x1x8x64xf32>
    %c0_128 = arith.constant 0 : index
    %c7_129 = arith.constant 7 : index
    %c0_130 = arith.constant 0 : index
    %c0_131 = arith.constant 0 : index
    %211 = vector.load %arg21[%c0_128, %c7_129, %c0_130, %c0_131] : memref<8x16x8x64xf32, #tpu.memory_space<vmem>>, vector<8x1x8x64xf32>
    tpu.vector_store %arg21[%c0_128, %c7_129, %c0_130, %c0_131], %210 {strides = array<i32>} : memref<8x16x8x64xf32, #tpu.memory_space<vmem>>, vector<8x1x8x64xf32>,
    %212 = vector.extract_strided_slice %79 {offsets = [0, 0, 7], sizes = [8, 8, 1], strides = [1, 1, 1]} : vector<8x8x16xf32> to vector<8x8x1xf32>
    %213 = vector.shape_cast %212 : vector<8x8x1xf32> to vector<8x8x1xf32>
    %214 = vector.broadcast %213 : vector<8x8x1xf32> to vector<8x8x64xf32>
    %215 = vector.shape_cast %214 : vector<8x8x64xf32> to vector<8x1x8x64xf32>
    %c0_132 = arith.constant 0 : index
    %c7_133 = arith.constant 7 : index
    %c0_134 = arith.constant 0 : index
    %c0_135 = arith.constant 0 : index
    %216 = vector.load %arg22[%c0_132, %c7_133, %c0_134, %c0_135] : memref<8x16x8x64xf32, #tpu.memory_space<vmem>>, vector<8x1x8x64xf32>
    tpu.vector_store %arg22[%c0_132, %c7_133, %c0_134, %c0_135], %215 {strides = array<i32>} : memref<8x16x8x64xf32, #tpu.memory_space<vmem>>, vector<8x1x8x64xf32>,
    %217 = vector.extract_strided_slice %80 {offsets = [8, 0], sizes = [1, 64], strides = [1, 1]} : vector<16x64xf32> to vector<1x64xf32>
    %218 = vector.shape_cast %217 : vector<1x64xf32> to vector<1x1x64xf32>
    %219 = vector.broadcast %218 : vector<1x1x64xf32> to vector<8x8x64xf32>
    %220 = arith.mulf %75, %219 : vector<8x8x64xf32>
    %221 = math.exp %220 : vector<8x8x64xf32>
    %222 = vector.shape_cast %221 : vector<8x8x64xf32> to vector<8x1x8x64xf32>
    %c0_136 = arith.constant 0 : index
    %c8_137 = arith.constant 8 : index
    %c0_138 = arith.constant 0 : index
    %c0_139 = arith.constant 0 : index
    %223 = vector.load %arg20[%c0_136, %c8_137, %c0_138, %c0_139] : memref<8x16x8x64xf32, #tpu.memory_space<vmem>>, vector<8x1x8x64xf32>
    tpu.vector_store %arg20[%c0_136, %c8_137, %c0_138, %c0_139], %222 {strides = array<i32>} : memref<8x16x8x64xf32, #tpu.memory_space<vmem>>, vector<8x1x8x64xf32>,
    %224 = vector.extract_strided_slice %78 {offsets = [0, 0, 8], sizes = [8, 8, 1], strides = [1, 1, 1]} : vector<8x8x16xf32> to vector<8x8x1xf32>
    %225 = vector.broadcast %224 : vector<8x8x1xf32> to vector<8x8x64xf32>
    %226 = arith.mulf %77, %225 : vector<8x8x64xf32>
    %227 = vector.shape_cast %226 : vector<8x8x64xf32> to vector<8x1x8x64xf32>
    %c0_140 = arith.constant 0 : index
    %c8_141 = arith.constant 8 : index
    %c0_142 = arith.constant 0 : index
    %c0_143 = arith.constant 0 : index
    %228 = vector.load %arg21[%c0_140, %c8_141, %c0_142, %c0_143] : memref<8x16x8x64xf32, #tpu.memory_space<vmem>>, vector<8x1x8x64xf32>
    tpu.vector_store %arg21[%c0_140, %c8_141, %c0_142, %c0_143], %227 {strides = array<i32>} : memref<8x16x8x64xf32, #tpu.memory_space<vmem>>, vector<8x1x8x64xf32>,
    %229 = vector.extract_strided_slice %79 {offsets = [0, 0, 8], sizes = [8, 8, 1], strides = [1, 1, 1]} : vector<8x8x16xf32> to vector<8x8x1xf32>
    %230 = vector.shape_cast %229 : vector<8x8x1xf32> to vector<8x8x1xf32>
    %231 = vector.broadcast %230 : vector<8x8x1xf32> to vector<8x8x64xf32>
    %232 = vector.shape_cast %231 : vector<8x8x64xf32> to vector<8x1x8x64xf32>
    %c0_144 = arith.constant 0 : index
    %c8_145 = arith.constant 8 : index
    %c0_146 = arith.constant 0 : index
    %c0_147 = arith.constant 0 : index
    %233 = vector.load %arg22[%c0_144, %c8_145, %c0_146, %c0_147] : memref<8x16x8x64xf32, #tpu.memory_space<vmem>>, vector<8x1x8x64xf32>
    tpu.vector_store %arg22[%c0_144, %c8_145, %c0_146, %c0_147], %232 {strides = array<i32>} : memref<8x16x8x64xf32, #tpu.memory_space<vmem>>, vector<8x1x8x64xf32>,
    %234 = vector.extract_strided_slice %80 {offsets = [9, 0], sizes = [1, 64], strides = [1, 1]} : vector<16x64xf32> to vector<1x64xf32>
    %235 = vector.shape_cast %234 : vector<1x64xf32> to vector<1x1x64xf32>
    %236 = vector.broadcast %235 : vector<1x1x64xf32> to vector<8x8x64xf32>
    %237 = arith.mulf %75, %236 : vector<8x8x64xf32>
    %238 = math.exp %237 : vector<8x8x64xf32>
    %239 = vector.shape_cast %238 : vector<8x8x64xf32> to vector<8x1x8x64xf32>
    %c0_148 = arith.constant 0 : index
    %c9 = arith.constant 9 : index
    %c0_149 = arith.constant 0 : index
    %c0_150 = arith.constant 0 : index
    %240 = vector.load %arg20[%c0_148, %c9, %c0_149, %c0_150] : memref<8x16x8x64xf32, #tpu.memory_space<vmem>>, vector<8x1x8x64xf32>
    tpu.vector_store %arg20[%c0_148, %c9, %c0_149, %c0_150], %239 {strides = array<i32>} : memref<8x16x8x64xf32, #tpu.memory_space<vmem>>, vector<8x1x8x64xf32>,
    %241 = vector.extract_strided_slice %78 {offsets = [0, 0, 9], sizes = [8, 8, 1], strides = [1, 1, 1]} : vector<8x8x16xf32> to vector<8x8x1xf32>
    %242 = vector.broadcast %241 : vector<8x8x1xf32> to vector<8x8x64xf32>
    %243 = arith.mulf %77, %242 : vector<8x8x64xf32>
    %244 = vector.shape_cast %243 : vector<8x8x64xf32> to vector<8x1x8x64xf32>
    %c0_151 = arith.constant 0 : index
    %c9_152 = arith.constant 9 : index
    %c0_153 = arith.constant 0 : index
    %c0_154 = arith.constant 0 : index
    %245 = vector.load %arg21[%c0_151, %c9_152, %c0_153, %c0_154] : memref<8x16x8x64xf32, #tpu.memory_space<vmem>>, vector<8x1x8x64xf32>
    tpu.vector_store %arg21[%c0_151, %c9_152, %c0_153, %c0_154], %244 {strides = array<i32>} : memref<8x16x8x64xf32, #tpu.memory_space<vmem>>, vector<8x1x8x64xf32>,
    %246 = vector.extract_strided_slice %79 {offsets = [0, 0, 9], sizes = [8, 8, 1], strides = [1, 1, 1]} : vector<8x8x16xf32> to vector<8x8x1xf32>
    %247 = vector.shape_cast %246 : vector<8x8x1xf32> to vector<8x8x1xf32>
    %248 = vector.broadcast %247 : vector<8x8x1xf32> to vector<8x8x64xf32>
    %249 = vector.shape_cast %248 : vector<8x8x64xf32> to vector<8x1x8x64xf32>
    %c0_155 = arith.constant 0 : index
    %c9_156 = arith.constant 9 : index
    %c0_157 = arith.constant 0 : index
    %c0_158 = arith.constant 0 : index
    %250 = vector.load %arg22[%c0_155, %c9_156, %c0_157, %c0_158] : memref<8x16x8x64xf32, #tpu.memory_space<vmem>>, vector<8x1x8x64xf32>
    tpu.vector_store %arg22[%c0_155, %c9_156, %c0_157, %c0_158], %249 {strides = array<i32>} : memref<8x16x8x64xf32, #tpu.memory_space<vmem>>, vector<8x1x8x64xf32>,
    %251 = vector.extract_strided_slice %80 {offsets = [10, 0], sizes = [1, 64], strides = [1, 1]} : vector<16x64xf32> to vector<1x64xf32>
    %252 = vector.shape_cast %251 : vector<1x64xf32> to vector<1x1x64xf32>
    %253 = vector.broadcast %252 : vector<1x1x64xf32> to vector<8x8x64xf32>
    %254 = arith.mulf %75, %253 : vector<8x8x64xf32>
    %255 = math.exp %254 : vector<8x8x64xf32>
    %256 = vector.shape_cast %255 : vector<8x8x64xf32> to vector<8x1x8x64xf32>
    %c0_159 = arith.constant 0 : index
    %c10 = arith.constant 10 : index
    %c0_160 = arith.constant 0 : index
    %c0_161 = arith.constant 0 : index
    %257 = vector.load %arg20[%c0_159, %c10, %c0_160, %c0_161] : memref<8x16x8x64xf32, #tpu.memory_space<vmem>>, vector<8x1x8x64xf32>
    tpu.vector_store %arg20[%c0_159, %c10, %c0_160, %c0_161], %256 {strides = array<i32>} : memref<8x16x8x64xf32, #tpu.memory_space<vmem>>, vector<8x1x8x64xf32>,
    %258 = vector.extract_strided_slice %78 {offsets = [0, 0, 10], sizes = [8, 8, 1], strides = [1, 1, 1]} : vector<8x8x16xf32> to vector<8x8x1xf32>
    %259 = vector.broadcast %258 : vector<8x8x1xf32> to vector<8x8x64xf32>
    %260 = arith.mulf %77, %259 : vector<8x8x64xf32>
    %261 = vector.shape_cast %260 : vector<8x8x64xf32> to vector<8x1x8x64xf32>
    %c0_162 = arith.constant 0 : index
    %c10_163 = arith.constant 10 : index
    %c0_164 = arith.constant 0 : index
    %c0_165 = arith.constant 0 : index
    %262 = vector.load %arg21[%c0_162, %c10_163, %c0_164, %c0_165] : memref<8x16x8x64xf32, #tpu.memory_space<vmem>>, vector<8x1x8x64xf32>
    tpu.vector_store %arg21[%c0_162, %c10_163, %c0_164, %c0_165], %261 {strides = array<i32>} : memref<8x16x8x64xf32, #tpu.memory_space<vmem>>, vector<8x1x8x64xf32>,
    %263 = vector.extract_strided_slice %79 {offsets = [0, 0, 10], sizes = [8, 8, 1], strides = [1, 1, 1]} : vector<8x8x16xf32> to vector<8x8x1xf32>
    %264 = vector.shape_cast %263 : vector<8x8x1xf32> to vector<8x8x1xf32>
    %265 = vector.broadcast %264 : vector<8x8x1xf32> to vector<8x8x64xf32>
    %266 = vector.shape_cast %265 : vector<8x8x64xf32> to vector<8x1x8x64xf32>
    %c0_166 = arith.constant 0 : index
    %c10_167 = arith.constant 10 : index
    %c0_168 = arith.constant 0 : index
    %c0_169 = arith.constant 0 : index
    %267 = vector.load %arg22[%c0_166, %c10_167, %c0_168, %c0_169] : memref<8x16x8x64xf32, #tpu.memory_space<vmem>>, vector<8x1x8x64xf32>
    tpu.vector_store %arg22[%c0_166, %c10_167, %c0_168, %c0_169], %266 {strides = array<i32>} : memref<8x16x8x64xf32, #tpu.memory_space<vmem>>, vector<8x1x8x64xf32>,
    %268 = vector.extract_strided_slice %80 {offsets = [11, 0], sizes = [1, 64], strides = [1, 1]} : vector<16x64xf32> to vector<1x64xf32>
    %269 = vector.shape_cast %268 : vector<1x64xf32> to vector<1x1x64xf32>
    %270 = vector.broadcast %269 : vector<1x1x64xf32> to vector<8x8x64xf32>
    %271 = arith.mulf %75, %270 : vector<8x8x64xf32>
    %272 = math.exp %271 : vector<8x8x64xf32>
    %273 = vector.shape_cast %272 : vector<8x8x64xf32> to vector<8x1x8x64xf32>
    %c0_170 = arith.constant 0 : index
    %c11 = arith.constant 11 : index
    %c0_171 = arith.constant 0 : index
    %c0_172 = arith.constant 0 : index
    %274 = vector.load %arg20[%c0_170, %c11, %c0_171, %c0_172] : memref<8x16x8x64xf32, #tpu.memory_space<vmem>>, vector<8x1x8x64xf32>
    tpu.vector_store %arg20[%c0_170, %c11, %c0_171, %c0_172], %273 {strides = array<i32>} : memref<8x16x8x64xf32, #tpu.memory_space<vmem>>, vector<8x1x8x64xf32>,
    %275 = vector.extract_strided_slice %78 {offsets = [0, 0, 11], sizes = [8, 8, 1], strides = [1, 1, 1]} : vector<8x8x16xf32> to vector<8x8x1xf32>
    %276 = vector.broadcast %275 : vector<8x8x1xf32> to vector<8x8x64xf32>
    %277 = arith.mulf %77, %276 : vector<8x8x64xf32>
    %278 = vector.shape_cast %277 : vector<8x8x64xf32> to vector<8x1x8x64xf32>
    %c0_173 = arith.constant 0 : index
    %c11_174 = arith.constant 11 : index
    %c0_175 = arith.constant 0 : index
    %c0_176 = arith.constant 0 : index
    %279 = vector.load %arg21[%c0_173, %c11_174, %c0_175, %c0_176] : memref<8x16x8x64xf32, #tpu.memory_space<vmem>>, vector<8x1x8x64xf32>
    tpu.vector_store %arg21[%c0_173, %c11_174, %c0_175, %c0_176], %278 {strides = array<i32>} : memref<8x16x8x64xf32, #tpu.memory_space<vmem>>, vector<8x1x8x64xf32>,
    %280 = vector.extract_strided_slice %79 {offsets = [0, 0, 11], sizes = [8, 8, 1], strides = [1, 1, 1]} : vector<8x8x16xf32> to vector<8x8x1xf32>
    %281 = vector.shape_cast %280 : vector<8x8x1xf32> to vector<8x8x1xf32>
    %282 = vector.broadcast %281 : vector<8x8x1xf32> to vector<8x8x64xf32>
    %283 = vector.shape_cast %282 : vector<8x8x64xf32> to vector<8x1x8x64xf32>
    %c0_177 = arith.constant 0 : index
    %c11_178 = arith.constant 11 : index
    %c0_179 = arith.constant 0 : index
    %c0_180 = arith.constant 0 : index
    %284 = vector.load %arg22[%c0_177, %c11_178, %c0_179, %c0_180] : memref<8x16x8x64xf32, #tpu.memory_space<vmem>>, vector<8x1x8x64xf32>
    tpu.vector_store %arg22[%c0_177, %c11_178, %c0_179, %c0_180], %283 {strides = array<i32>} : memref<8x16x8x64xf32, #tpu.memory_space<vmem>>, vector<8x1x8x64xf32>,
    %285 = vector.extract_strided_slice %80 {offsets = [12, 0], sizes = [1, 64], strides = [1, 1]} : vector<16x64xf32> to vector<1x64xf32>
    %286 = vector.shape_cast %285 : vector<1x64xf32> to vector<1x1x64xf32>
    %287 = vector.broadcast %286 : vector<1x1x64xf32> to vector<8x8x64xf32>
    %288 = arith.mulf %75, %287 : vector<8x8x64xf32>
    %289 = math.exp %288 : vector<8x8x64xf32>
    %290 = vector.shape_cast %289 : vector<8x8x64xf32> to vector<8x1x8x64xf32>
    %c0_181 = arith.constant 0 : index
    %c12 = arith.constant 12 : index
    %c0_182 = arith.constant 0 : index
    %c0_183 = arith.constant 0 : index
    %291 = vector.load %arg20[%c0_181, %c12, %c0_182, %c0_183] : memref<8x16x8x64xf32, #tpu.memory_space<vmem>>, vector<8x1x8x64xf32>
    tpu.vector_store %arg20[%c0_181, %c12, %c0_182, %c0_183], %290 {strides = array<i32>} : memref<8x16x8x64xf32, #tpu.memory_space<vmem>>, vector<8x1x8x64xf32>,
    %292 = vector.extract_strided_slice %78 {offsets = [0, 0, 12], sizes = [8, 8, 1], strides = [1, 1, 1]} : vector<8x8x16xf32> to vector<8x8x1xf32>
    %293 = vector.broadcast %292 : vector<8x8x1xf32> to vector<8x8x64xf32>
    %294 = arith.mulf %77, %293 : vector<8x8x64xf32>
    %295 = vector.shape_cast %294 : vector<8x8x64xf32> to vector<8x1x8x64xf32>
    %c0_184 = arith.constant 0 : index
    %c12_185 = arith.constant 12 : index
    %c0_186 = arith.constant 0 : index
    %c0_187 = arith.constant 0 : index
    %296 = vector.load %arg21[%c0_184, %c12_185, %c0_186, %c0_187] : memref<8x16x8x64xf32, #tpu.memory_space<vmem>>, vector<8x1x8x64xf32>
    tpu.vector_store %arg21[%c0_184, %c12_185, %c0_186, %c0_187], %295 {strides = array<i32>} : memref<8x16x8x64xf32, #tpu.memory_space<vmem>>, vector<8x1x8x64xf32>,
    %297 = vector.extract_strided_slice %79 {offsets = [0, 0, 12], sizes = [8, 8, 1], strides = [1, 1, 1]} : vector<8x8x16xf32> to vector<8x8x1xf32>
    %298 = vector.shape_cast %297 : vector<8x8x1xf32> to vector<8x8x1xf32>
    %299 = vector.broadcast %298 : vector<8x8x1xf32> to vector<8x8x64xf32>
    %300 = vector.shape_cast %299 : vector<8x8x64xf32> to vector<8x1x8x64xf32>
    %c0_188 = arith.constant 0 : index
    %c12_189 = arith.constant 12 : index
    %c0_190 = arith.constant 0 : index
    %c0_191 = arith.constant 0 : index
    %301 = vector.load %arg22[%c0_188, %c12_189, %c0_190, %c0_191] : memref<8x16x8x64xf32, #tpu.memory_space<vmem>>, vector<8x1x8x64xf32>
    tpu.vector_store %arg22[%c0_188, %c12_189, %c0_190, %c0_191], %300 {strides = array<i32>} : memref<8x16x8x64xf32, #tpu.memory_space<vmem>>, vector<8x1x8x64xf32>,
    %302 = vector.extract_strided_slice %80 {offsets = [13, 0], sizes = [1, 64], strides = [1, 1]} : vector<16x64xf32> to vector<1x64xf32>
    %303 = vector.shape_cast %302 : vector<1x64xf32> to vector<1x1x64xf32>
    %304 = vector.broadcast %303 : vector<1x1x64xf32> to vector<8x8x64xf32>
    %305 = arith.mulf %75, %304 : vector<8x8x64xf32>
    %306 = math.exp %305 : vector<8x8x64xf32>
    %307 = vector.shape_cast %306 : vector<8x8x64xf32> to vector<8x1x8x64xf32>
    %c0_192 = arith.constant 0 : index
    %c13 = arith.constant 13 : index
    %c0_193 = arith.constant 0 : index
    %c0_194 = arith.constant 0 : index
    %308 = vector.load %arg20[%c0_192, %c13, %c0_193, %c0_194] : memref<8x16x8x64xf32, #tpu.memory_space<vmem>>, vector<8x1x8x64xf32>
    tpu.vector_store %arg20[%c0_192, %c13, %c0_193, %c0_194], %307 {strides = array<i32>} : memref<8x16x8x64xf32, #tpu.memory_space<vmem>>, vector<8x1x8x64xf32>,
    %309 = vector.extract_strided_slice %78 {offsets = [0, 0, 13], sizes = [8, 8, 1], strides = [1, 1, 1]} : vector<8x8x16xf32> to vector<8x8x1xf32>
    %310 = vector.broadcast %309 : vector<8x8x1xf32> to vector<8x8x64xf32>
    %311 = arith.mulf %77, %310 : vector<8x8x64xf32>
    %312 = vector.shape_cast %311 : vector<8x8x64xf32> to vector<8x1x8x64xf32>
    %c0_195 = arith.constant 0 : index
    %c13_196 = arith.constant 13 : index
    %c0_197 = arith.constant 0 : index
    %c0_198 = arith.constant 0 : index
    %313 = vector.load %arg21[%c0_195, %c13_196, %c0_197, %c0_198] : memref<8x16x8x64xf32, #tpu.memory_space<vmem>>, vector<8x1x8x64xf32>
    tpu.vector_store %arg21[%c0_195, %c13_196, %c0_197, %c0_198], %312 {strides = array<i32>} : memref<8x16x8x64xf32, #tpu.memory_space<vmem>>, vector<8x1x8x64xf32>,
    %314 = vector.extract_strided_slice %79 {offsets = [0, 0, 13], sizes = [8, 8, 1], strides = [1, 1, 1]} : vector<8x8x16xf32> to vector<8x8x1xf32>
    %315 = vector.shape_cast %314 : vector<8x8x1xf32> to vector<8x8x1xf32>
    %316 = vector.broadcast %315 : vector<8x8x1xf32> to vector<8x8x64xf32>
    %317 = vector.shape_cast %316 : vector<8x8x64xf32> to vector<8x1x8x64xf32>
    %c0_199 = arith.constant 0 : index
    %c13_200 = arith.constant 13 : index
    %c0_201 = arith.constant 0 : index
    %c0_202 = arith.constant 0 : index
    %318 = vector.load %arg22[%c0_199, %c13_200, %c0_201, %c0_202] : memref<8x16x8x64xf32, #tpu.memory_space<vmem>>, vector<8x1x8x64xf32>
    tpu.vector_store %arg22[%c0_199, %c13_200, %c0_201, %c0_202], %317 {strides = array<i32>} : memref<8x16x8x64xf32, #tpu.memory_space<vmem>>, vector<8x1x8x64xf32>,
    %319 = vector.extract_strided_slice %80 {offsets = [14, 0], sizes = [1, 64], strides = [1, 1]} : vector<16x64xf32> to vector<1x64xf32>
    %320 = vector.shape_cast %319 : vector<1x64xf32> to vector<1x1x64xf32>
    %321 = vector.broadcast %320 : vector<1x1x64xf32> to vector<8x8x64xf32>
    %322 = arith.mulf %75, %321 : vector<8x8x64xf32>
    %323 = math.exp %322 : vector<8x8x64xf32>
    %324 = vector.shape_cast %323 : vector<8x8x64xf32> to vector<8x1x8x64xf32>
    %c0_203 = arith.constant 0 : index
    %c14 = arith.constant 14 : index
    %c0_204 = arith.constant 0 : index
    %c0_205 = arith.constant 0 : index
    %325 = vector.load %arg20[%c0_203, %c14, %c0_204, %c0_205] : memref<8x16x8x64xf32, #tpu.memory_space<vmem>>, vector<8x1x8x64xf32>
    tpu.vector_store %arg20[%c0_203, %c14, %c0_204, %c0_205], %324 {strides = array<i32>} : memref<8x16x8x64xf32, #tpu.memory_space<vmem>>, vector<8x1x8x64xf32>,
    %326 = vector.extract_strided_slice %78 {offsets = [0, 0, 14], sizes = [8, 8, 1], strides = [1, 1, 1]} : vector<8x8x16xf32> to vector<8x8x1xf32>
    %327 = vector.broadcast %326 : vector<8x8x1xf32> to vector<8x8x64xf32>
    %328 = arith.mulf %77, %327 : vector<8x8x64xf32>
    %329 = vector.shape_cast %328 : vector<8x8x64xf32> to vector<8x1x8x64xf32>
    %c0_206 = arith.constant 0 : index
    %c14_207 = arith.constant 14 : index
    %c0_208 = arith.constant 0 : index
    %c0_209 = arith.constant 0 : index
    %330 = vector.load %arg21[%c0_206, %c14_207, %c0_208, %c0_209] : memref<8x16x8x64xf32, #tpu.memory_space<vmem>>, vector<8x1x8x64xf32>
    tpu.vector_store %arg21[%c0_206, %c14_207, %c0_208, %c0_209], %329 {strides = array<i32>} : memref<8x16x8x64xf32, #tpu.memory_space<vmem>>, vector<8x1x8x64xf32>,
    %331 = vector.extract_strided_slice %79 {offsets = [0, 0, 14], sizes = [8, 8, 1], strides = [1, 1, 1]} : vector<8x8x16xf32> to vector<8x8x1xf32>
    %332 = vector.shape_cast %331 : vector<8x8x1xf32> to vector<8x8x1xf32>
    %333 = vector.broadcast %332 : vector<8x8x1xf32> to vector<8x8x64xf32>
    %334 = vector.shape_cast %333 : vector<8x8x64xf32> to vector<8x1x8x64xf32>
    %c0_210 = arith.constant 0 : index
    %c14_211 = arith.constant 14 : index
    %c0_212 = arith.constant 0 : index
    %c0_213 = arith.constant 0 : index
    %335 = vector.load %arg22[%c0_210, %c14_211, %c0_212, %c0_213] : memref<8x16x8x64xf32, #tpu.memory_space<vmem>>, vector<8x1x8x64xf32>
    tpu.vector_store %arg22[%c0_210, %c14_211, %c0_212, %c0_213], %334 {strides = array<i32>} : memref<8x16x8x64xf32, #tpu.memory_space<vmem>>, vector<8x1x8x64xf32>,
    %336 = vector.extract_strided_slice %80 {offsets = [15, 0], sizes = [1, 64], strides = [1, 1]} : vector<16x64xf32> to vector<1x64xf32>
    %337 = vector.shape_cast %336 : vector<1x64xf32> to vector<1x1x64xf32>
    %338 = vector.broadcast %337 : vector<1x1x64xf32> to vector<8x8x64xf32>
    %339 = arith.mulf %75, %338 : vector<8x8x64xf32>
    %340 = math.exp %339 : vector<8x8x64xf32>
    %341 = vector.shape_cast %340 : vector<8x8x64xf32> to vector<8x1x8x64xf32>
    %c0_214 = arith.constant 0 : index
    %c15 = arith.constant 15 : index
    %c0_215 = arith.constant 0 : index
    %c0_216 = arith.constant 0 : index
    %342 = vector.load %arg20[%c0_214, %c15, %c0_215, %c0_216] : memref<8x16x8x64xf32, #tpu.memory_space<vmem>>, vector<8x1x8x64xf32>
    tpu.vector_store %arg20[%c0_214, %c15, %c0_215, %c0_216], %341 {strides = array<i32>} : memref<8x16x8x64xf32, #tpu.memory_space<vmem>>, vector<8x1x8x64xf32>,
    %343 = vector.extract_strided_slice %78 {offsets = [0, 0, 15], sizes = [8, 8, 1], strides = [1, 1, 1]} : vector<8x8x16xf32> to vector<8x8x1xf32>
    %344 = vector.broadcast %343 : vector<8x8x1xf32> to vector<8x8x64xf32>
    %345 = arith.mulf %77, %344 : vector<8x8x64xf32>
    %346 = vector.shape_cast %345 : vector<8x8x64xf32> to vector<8x1x8x64xf32>
    %c0_217 = arith.constant 0 : index
    %c15_218 = arith.constant 15 : index
    %c0_219 = arith.constant 0 : index
    %c0_220 = arith.constant 0 : index
    %347 = vector.load %arg21[%c0_217, %c15_218, %c0_219, %c0_220] : memref<8x16x8x64xf32, #tpu.memory_space<vmem>>, vector<8x1x8x64xf32>
    tpu.vector_store %arg21[%c0_217, %c15_218, %c0_219, %c0_220], %346 {strides = array<i32>} : memref<8x16x8x64xf32, #tpu.memory_space<vmem>>, vector<8x1x8x64xf32>,
    %348 = vector.extract_strided_slice %79 {offsets = [0, 0, 15], sizes = [8, 8, 1], strides = [1, 1, 1]} : vector<8x8x16xf32> to vector<8x8x1xf32>
    %349 = vector.shape_cast %348 : vector<8x8x1xf32> to vector<8x8x1xf32>
    %350 = vector.broadcast %349 : vector<8x8x1xf32> to vector<8x8x64xf32>
    %351 = vector.shape_cast %350 : vector<8x8x64xf32> to vector<8x1x8x64xf32>
    %c0_221 = arith.constant 0 : index
    %c15_222 = arith.constant 15 : index
    %c0_223 = arith.constant 0 : index
    %c0_224 = arith.constant 0 : index
    %352 = vector.load %arg22[%c0_221, %c15_222, %c0_223, %c0_224] : memref<8x16x8x64xf32, #tpu.memory_space<vmem>>, vector<8x1x8x64xf32>
    tpu.vector_store %arg22[%c0_221, %c15_222, %c0_223, %c0_224], %351 {strides = array<i32>} : memref<8x16x8x64xf32, #tpu.memory_space<vmem>>, vector<8x1x8x64xf32>,
    %cst_225 = arith.constant 0.000000e+00 : f32
    %353 = vector.broadcast %cst_225 : f32 to vector<16x8x64xf32>
    %c0_i32 = arith.constant 0 : i32
    %c8_i32 = arith.constant 8 : i32
    %354 = arith.addi %c0_i32, %c8_i32 : i32
    %c1_i32 = arith.constant 1 : i32
    %355 = scf.for %arg24 = %c0_i32 to %354 step %c1_i32 iter_args(%arg25 = %353) -> (vector<16x8x64xf32>)  : i32 {
      %396 = arith.index_cast %arg24 : i32 to index
      %c0_251 = arith.constant 0 : index
      %c0_252 = arith.constant 0 : index
      %c0_253 = arith.constant 0 : index
      %397 = vector.load %arg20[%396, %c0_251, %c0_252, %c0_253] : memref<8x16x8x64xf32, #tpu.memory_space<vmem>>, vector<1x16x8x64xf32>
      %398 = vector.shape_cast %397 : vector<1x16x8x64xf32> to vector<16x8x64xf32>
      %399 = arith.index_cast %arg24 : i32 to index
      %c0_254 = arith.constant 0 : index
      %c0_255 = arith.constant 0 : index
      %c0_256 = arith.constant 0 : index
      %400 = vector.load %arg21[%399, %c0_254, %c0_255, %c0_256] : memref<8x16x8x64xf32, #tpu.memory_space<vmem>>, vector<1x16x8x64xf32>
      %401 = vector.shape_cast %400 : vector<1x16x8x64xf32> to vector<16x8x64xf32>
      %402 = arith.index_cast %arg24 : i32 to index
      %c0_257 = arith.constant 0 : index
      %c0_258 = arith.constant 0 : index
      %c0_259 = arith.constant 0 : index
      %403 = vector.load %arg22[%402, %c0_257, %c0_258, %c0_259] : memref<8x16x8x64xf32, #tpu.memory_space<vmem>>, vector<1x16x8x64xf32>
      %404 = vector.shape_cast %403 : vector<1x16x8x64xf32> to vector<16x8x64xf32>
      %405 = arith.mulf %398, %arg25 : vector<16x8x64xf32>
      %406 = arith.addf %405, %401 : vector<16x8x64xf32>
      %407 = arith.mulf %406, %404 : vector<16x8x64xf32>
      %cst_260 = arith.constant dense<0.000000e+00> : vector<8x64xf32>
      %408 = vector.multi_reduction <add>, %407, %cst_260 [0] : vector<16x8x64xf32> to vector<8x64xf32>
      %409 = arith.index_cast %arg24 : i32 to index
      %c0_261 = arith.constant 0 : index
      %c0_262 = arith.constant 0 : index
      %410 = vector.load %arg23[%409, %c0_261, %c0_262] : memref<8x8x64xf32, #tpu.memory_space<vmem>>, vector<1x8x64xf32>
      %411 = vector.shape_cast %410 : vector<1x8x64xf32> to vector<8x64xf32>
      %412 = vector.shape_cast %408 : vector<8x64xf32> to vector<1x8x64xf32>
      tpu.vector_store %arg23[%409, %c0_261, %c0_262], %412 {strides = array<i32>} : memref<8x8x64xf32, #tpu.memory_space<vmem>>, vector<1x8x64xf32>,
      scf.yield %406 : vector<16x8x64xf32>
    }
    %c8_i32_226 = arith.constant 8 : i32
    %c0_227 = arith.constant 0 : index
    %c0_228 = arith.constant 0 : index
    %c0_229 = arith.constant 0 : index
    %356 = vector.load %arg23[%c0_227, %c0_228, %c0_229] : memref<8x8x64xf32, #tpu.memory_space<vmem>>, vector<8x8x64xf32>
    %357 = vector.shape_cast %356 : vector<8x8x64xf32> to vector<64x64xf32>
    %c0_230 = arith.constant 0 : index
    %c0_231 = arith.constant 0 : index
    %358 = vector.load %arg13[%c0_230, %c0_231] : memref<1x64xf32, #tpu.memory_space<vmem>>, vector<1x64xf32>
    %359 = vector.broadcast %358 : vector<1x64xf32> to vector<64x64xf32>
    %360 = arith.mulf %54, %359 : vector<64x64xf32>
    %361 = arith.addf %357, %360 : vector<64x64xf32>
    %cst_232 = arith.constant 0.000000e+00 : f32
    %362 = vector.broadcast %cst_232 : f32 to vector<64x64xf32>
    %363 = arith.subf %362, %19 : vector<64x64xf32>
    %364 = math.exp %363 : vector<64x64xf32>
    %cst_233 = arith.constant 1.000000e+00 : f32
    %365 = vector.broadcast %cst_233 : f32 to vector<64x64xf32>
    %366 = arith.addf %365, %364 : vector<64x64xf32>
    %cst_234 = arith.constant 1.000000e+00 : f32
    %367 = vector.broadcast %cst_234 : f32 to vector<64x64xf32>
    %368 = arith.divf %367, %366 : vector<64x64xf32>
    %369 = arith.mulf %19, %368 : vector<64x64xf32>
    %370 = arith.mulf %361, %369 : vector<64x64xf32>
    %371 = arith.truncf %370 : vector<64x64xf32> to vector<64x64xbf16>
    %c0_235 = arith.constant 0 : index
    %c0_236 = arith.constant 0 : index
    %372 = vector.load %arg14[%c0_235, %c0_236] : memref<64x32xbf16, #tpu.memory_space<vmem>>, vector<64x32xbf16>
    %cst_237 = arith.constant dense<0.000000e+00> : vector<64x32xf32>
    %373 = tpu.matmul %371, %372, %cst_237 {dimension_numbers = #tpu.dot_dimension_numbers<[1], [0], [0], [1], [0, 0, 1, 1], [], []>} : vector<64x64xbf16>, vector<64x32xbf16>, vector<64x32xf32> -> vector<64x32xf32>
    %374 = arith.addf %1, %373 : vector<64x32xf32>
    %c0_238 = arith.constant 0 : index
    %c0_239 = arith.constant 0 : index
    %375 = vector.load %arg15[%c0_238, %c0_239] : memref<1x32xf32, #tpu.memory_space<vmem>>, vector<1x32xf32>
    %376 = arith.mulf %374, %374 : vector<64x32xf32>
    %cst_240 = arith.constant dense<0.000000e+00> : vector<64xf32>
    %377 = vector.multi_reduction <add>, %376, %cst_240 [1] : vector<64x32xf32> to vector<64xf32>
    %378 = vector.shape_cast %377 : vector<64xf32> to vector<64x1xf32>
    %cst_241 = arith.constant 3.200000e+01 : f32
    %379 = vector.broadcast %cst_241 : f32 to vector<64x1xf32>
    %380 = arith.divf %378, %379 : vector<64x1xf32>
    %cst_242 = arith.constant 9.99999974E-6 : f32
    %381 = vector.broadcast %cst_242 : f32 to vector<64x1xf32>
    %382 = arith.addf %380, %381 : vector<64x1xf32>
    %383 = math.rsqrt %382 : vector<64x1xf32>
    %384 = vector.broadcast %383 : vector<64x1xf32> to vector<64x32xf32>
    %385 = arith.mulf %374, %384 : vector<64x32xf32>
    %386 = vector.broadcast %375 : vector<1x32xf32> to vector<64x32xf32>
    %387 = arith.mulf %385, %386 : vector<64x32xf32>
    %388 = arith.truncf %387 : vector<64x32xf32> to vector<64x32xbf16>
    %c0_243 = arith.constant 0 : index
    %c0_244 = arith.constant 0 : index
    %389 = vector.load %arg16[%c0_243, %c0_244] : memref<32x128xbf16, #tpu.memory_space<vmem>>, vector<32x128xbf16>
    %cst_245 = arith.constant dense<0.000000e+00> : vector<64x128xf32>
    %390 = tpu.matmul %388, %389, %cst_245 {dimension_numbers = #tpu.dot_dimension_numbers<[1], [0], [0], [1], [0, 0, 1, 1], [], []>} : vector<64x32xbf16>, vector<32x128xbf16>, vector<64x128xf32> -> vector<64x128xf32>
    %c0_246 = arith.constant 0 : index
    %c0_247 = arith.constant 0 : index
    %391 = vector.load %arg17[%c0_246, %c0_247] : memref<1x128xf32, #tpu.memory_space<vmem>>, vector<1x128xf32>
    %392 = vector.broadcast %391 : vector<1x128xf32> to vector<64x128xf32>
    %393 = arith.addf %390, %392 : vector<64x128xf32>
    %394 = vector.shape_cast %393 : vector<64x128xf32> to vector<8x8x128xf32>
    %c0_248 = arith.constant 0 : index
    %c0_249 = arith.constant 0 : index
    %c0_250 = arith.constant 0 : index
    %395 = vector.load %arg18[%c0_248, %c0_249, %c0_250] : memref<8x8x128xf32, #tpu.memory_space<vmem>>, vector<8x8x128xf32>
    tpu.vector_store %arg18[%c0_248, %c0_249, %c0_250], %394 {strides = array<i32>} : memref<8x8x128xf32, #tpu.memory_space<vmem>>, vector<8x8x128xf32>,
    return
  }
  func.func @transform_0(%arg0: i32) -> (i32, i32, i32) {
    %c0_i32 = arith.constant 0 : i32
    %c0_i32_0 = arith.constant 0 : i32
    %c0_i32_1 = arith.constant 0 : i32
    return %c0_i32, %arg0, %c0_i32_0 : i32, i32, i32
  }
  func.func @transform_1(%arg0: i32) -> (i32, i32) {
    %c0_i32 = arith.constant 0 : i32
    %c0_i32_0 = arith.constant 0 : i32
    %c0_i32_1 = arith.constant 0 : i32
    return %c0_i32, %c0_i32_0 : i32, i32
  }
  func.func @transform_2(%arg0: i32) -> (i32, i32) {
    %c0_i32 = arith.constant 0 : i32
    %c0_i32_0 = arith.constant 0 : i32
    %c0_i32_1 = arith.constant 0 : i32
    return %c0_i32, %c0_i32_0 : i32, i32
  }
  func.func @transform_3(%arg0: i32) -> (i32, i32) {
    %c0_i32 = arith.constant 0 : i32
    %c0_i32_0 = arith.constant 0 : i32
    %c0_i32_1 = arith.constant 0 : i32
    return %c0_i32, %c0_i32_0 : i32, i32
  }
  func.func @transform_4(%arg0: i32) -> (i32, i32) {
    %c0_i32 = arith.constant 0 : i32
    %c0_i32_0 = arith.constant 0 : i32
    %c0_i32_1 = arith.constant 0 : i32
    return %c0_i32, %c0_i32_0 : i32, i32
  }
  func.func @transform_5(%arg0: i32) -> (i32, i32) {
    %c0_i32 = arith.constant 0 : i32
    %c0_i32_0 = arith.constant 0 : i32
    %c0_i32_1 = arith.constant 0 : i32
    return %c0_i32, %c0_i32_0 : i32, i32
  }
  func.func @transform_6(%arg0: i32) -> (i32, i32) {
    %c0_i32 = arith.constant 0 : i32
    %c0_i32_0 = arith.constant 0 : i32
    %c0_i32_1 = arith.constant 0 : i32
    return %c0_i32, %c0_i32_0 : i32, i32
  }
  func.func @transform_7(%arg0: i32) -> (i32, i32) {
    %c0_i32 = arith.constant 0 : i32
    %c0_i32_0 = arith.constant 0 : i32
    %c0_i32_1 = arith.constant 0 : i32
    return %c0_i32, %c0_i32_0 : i32, i32
  }
  func.func @transform_8(%arg0: i32) -> (i32, i32) {
    %c0_i32 = arith.constant 0 : i32
    %c0_i32_0 = arith.constant 0 : i32
    %c0_i32_1 = arith.constant 0 : i32
    return %c0_i32, %c0_i32_0 : i32, i32
  }
  func.func @transform_9(%arg0: i32) -> (i32, i32) {
    %c0_i32 = arith.constant 0 : i32
    %c0_i32_0 = arith.constant 0 : i32
    %c0_i32_1 = arith.constant 0 : i32
    return %c0_i32, %c0_i32_0 : i32, i32
  }
  func.func @transform_10(%arg0: i32) -> (i32, i32) {
    %c0_i32 = arith.constant 0 : i32
    %c0_i32_0 = arith.constant 0 : i32
    %c0_i32_1 = arith.constant 0 : i32
    return %c0_i32, %c0_i32_0 : i32, i32
  }
  func.func @transform_11(%arg0: i32) -> (i32, i32) {
    %c0_i32 = arith.constant 0 : i32
    %c0_i32_0 = arith.constant 0 : i32
    %c0_i32_1 = arith.constant 0 : i32
    return %c0_i32, %c0_i32_0 : i32, i32
  }
  func.func @transform_12(%arg0: i32) -> (i32, i32) {
    %c0_i32 = arith.constant 0 : i32
    %c0_i32_0 = arith.constant 0 : i32
    %c0_i32_1 = arith.constant 0 : i32
    return %c0_i32, %c0_i32_0 : i32, i32
  }
  func.func @transform_13(%arg0: i32) -> (i32, i32) {
    %c0_i32 = arith.constant 0 : i32
    %c0_i32_0 = arith.constant 0 : i32
    %c0_i32_1 = arith.constant 0 : i32
    return %c0_i32, %c0_i32_0 : i32, i32
  }
  func.func @transform_14(%arg0: i32) -> (i32, i32) {
    %c0_i32 = arith.constant 0 : i32
    %c0_i32_0 = arith.constant 0 : i32
    %c0_i32_1 = arith.constant 0 : i32
    return %c0_i32, %c0_i32_0 : i32, i32
  }
  func.func @transform_15(%arg0: i32) -> (i32, i32) {
    %c0_i32 = arith.constant 0 : i32
    %c0_i32_0 = arith.constant 0 : i32
    %c0_i32_1 = arith.constant 0 : i32
    return %c0_i32, %c0_i32_0 : i32, i32
  }
  func.func @transform_16(%arg0: i32) -> (i32, i32) {
    %c0_i32 = arith.constant 0 : i32
    %c0_i32_0 = arith.constant 0 : i32
    %c0_i32_1 = arith.constant 0 : i32
    return %c0_i32, %c0_i32_0 : i32, i32
  }
  func.func @transform_17(%arg0: i32) -> (i32, i32, i32) {
    %c0_i32 = arith.constant 0 : i32
    %c0_i32_0 = arith.constant 0 : i32
    %c0_i32_1 = arith.constant 0 : i32
    return %c0_i32, %arg0, %c0_i32_0 : i32, i32, i32
  }
}

</mosaic_0001>

<bundles_post_ra>
// kernel: tpu_custom_call.1
= control target key start
LH: loop header
LB: loop body
LE: loop exit
PB: predicated region body
PF: predicated region fallthrough
CT: control target
= control target key end

     0   :  { %s7248_s0 = inlined_call_operand.vmem [shape: f32[8,8,32], index: 0, kind: input, shape index: {}]   ;;  %s7249_s1 = inlined_call_operand.vmem [shape: f32[1,32], index: 1, kind: input, shape index: {}]   ;;  %s7250_s2 = inlined_call_operand.vmem [shape: bf16[32,64], index: 2, kind: input, shape index: {}]   ;;  %s7251_s3 = inlined_call_operand.vmem [shape: bf16[32,64], index: 3, kind: input, shape index: {}]   ;;  %s7252_s4 = inlined_call_operand.hbm [shape: f32[4,64], index: 4, kind: input, shape index: {}]   ;;  %s7253_s5 = inlined_call_operand.vmem [shape: f32[1,64], index: 5, kind: input, shape index: {}]   ;;  %s7254_s6 = inlined_call_operand.vmem [shape: bf16[64,2], index: 6, kind: input, shape index: {}]   ;;  %s7255_s7 = inlined_call_operand.vmem [shape: bf16[64,16], index: 7, kind: input, shape index: {}]   ;;  %s7256_s8 = inlined_call_operand.vmem [shape: bf16[64,16], index: 8, kind: input, shape index: {}]   ;;  %s7257_s9 = inlined_call_operand.vmem [shape: bf16[2,64], index: 9, kind: input, shape index: {}]   ;;  %s7258_s10 = inlined_call_operand.vmem [shape: f32[1,64], index: 10, kind: input, shape index: {}]   ;;  %s7259_s11 = inlined_call_operand.vmem [shape: f32[16,64], index: 11, kind: input, shape index: {}]   ;;  %s7260_s12 = inlined_call_operand.vmem [shape: f32[1,64], index: 12, kind: input, shape index: {}]   ;;  %s7261_s13 = inlined_call_operand.vmem [shape: bf16[64,32], index: 13, kind: input, shape index: {}]   ;;  %s7262_s14 = inlined_call_operand.vmem [shape: f32[1,32], index: 14, kind: input, shape index: {}]   ;;  %s7263_s15 = inlined_call_operand.vmem [shape: bf16[32,128], index: 15, kind: input, shape index: {}]   ;;  %s7264_s16 = inlined_call_operand.vmem [shape: f32[1,128], index: 16, kind: input, shape index: {}]   ;;  %s7265_s17 = inlined_call_operand.hbm [shape: f32[8,8,128], index: 17, kind: output, shape index: {}]  }
   0x1   :  { %7325 = sst [smem:[#allocation40_spill]] %s7248_s0 }
   0x2   :  { %7326 = sst [smem:[#allocation41_spill]] %s7249_s1 }
   0x3   :  { %22 = vsyncpa [#allocation8], 0 }
   0x4   :  { %23 = vsyncpa [#allocation9], 0  ;;  %s37_s26 = sshll.u32 %s7252_s4, 4  ;;  %s4784_s27 = smov [#allocation7]   ;;  %s38_s26 = int_to_ptr.hbm [resolvable:$true] %s37_s26 }
   0x5   :  { %s39_s28 = sshll.u32 %s4784_s27, 4  ;;  %s40_s28 = int_to_ptr.vmem [resolvable:$true] %s39_s28 }
   0x6   :  { %42 = dma.hbm_to_vmem [thread:$0]  %s38_s26, 64, %s40_s28, [#allocation8]  }
   0x7   :  { %4712 = dma.done.wait [#allocation8], 64  }
   0x8   :  { %4713 = vsyncadd [#allocation8], 4294967232  ;;  %s7327_s30 = sld [smem:[#allocation40_spill]]  ;;  %vm89_vm0 = vcmask 261120   ;;  %v4785_v24 = vmov 32.0   ;;  %v3776_v30 = vld [vmem:[%s7250_s2 + $0x8] sm:$0xff] }
   0x9   :  { %4206 = vrcp.f32 %v4785_v24  ;;  %v3778_v31 = vld [vmem:[%s7251_s3 + $0x8] sm:$0xff]  ;;  %274 = vmatpush.bf16.msra.mxu0 %v3776_v30  ;;  %v3775_v33 = vld [vmem:[%s7250_s2] sm:$0xff]  ;;  %s7337_s22 = sld [smem:[#allocation41_spill]] }
   0xa   :  { %319 = vmatpush.bf16.msra.mxu1 %v3778_v31  ;;  %v3777_v34 = vld [vmem:[%s7251_s3] sm:$0xff] }
   0xd   :  { %275 = vmatpush.bf16.msra.mxu0 %v3775_v33 }
   0xe   :  { %v4902_v0 = vld [vmem:[%s7327_s30] sm:$0xff]  ;;  %v4907_v1 = vld [vmem:[%s7327_s30 + $0x10] sm:$0xff]  ;;  %v4921_v5 = vld [vmem:[%s7327_s30 + $0x8] sm:$0xff]  ;;  %320 = vmatpush.bf16.msra.mxu1 %v3777_v34 }
   0xf   :  { %7328 = vst [vmem:[#allocation13_spill] sm:$0xff] %v4902_v0  ;;  %v81_v2 = vmul.f32 %v4902_v0, %v4902_v0  ;;  %v83_v3 = vmul.f32 %v4907_v1, %v4907_v1  ;;  %v4916_v4 = vld [vmem:[%s7327_s30 + $0x20] sm:$0xff]  ;;  %v4926_v6 = vld [vmem:[%s7327_s30 + $0x18] sm:$0xff]  ;;  %v4935_v10 = vld [vmem:[%s7327_s30 + $0x28] sm:$0xff]  ;;  %v82_v12 = vmul.f32 %v4921_v5, %v4921_v5  ;;  %v4207_v25 = vpop.eup %4206 }
  0x10   :  { %7329 = vst [vmem:[#allocation14_spill] sm:$0xff] %v4907_v1  ;;  %v85_v7 = vmul.f32 %v4916_v4, %v4916_v4  ;;  %v84_v13 = vmul.f32 %v4926_v6, %v4926_v6  ;;  %v86_v14 = vmul.f32 %v4935_v10, %v4935_v10  ;;  %v4950_v18 = vld [vmem:[%s7327_s30 + $0x38] sm:$0xff]  ;;  %v4955_v19 = vld [vmem:[%s7327_s30 + $0x30] sm:$0xff]  ;;  %v115_v26 = vmul.f32 32.0, %v4207_v25 }
  0x11   :  { %7330 = vst [vmem:[#allocation15_spill] sm:$0xff] %v4916_v4  ;;  %v90_v8 = vsel %vm89_vm0, %v81_v2, 0.0  ;;  %v96_v9 = vsel %vm89_vm0, %v83_v3, 0.0  ;;  %v93_v15 = vsel %vm89_vm0, %v82_v12, 0.0  ;;  %v88_v20 = vmul.f32 %v4950_v18, %v4950_v18 }
  0x12   :  { %7331 = vst [vmem:[#allocation16_spill] sm:$0xff] %v4921_v5  ;;  %91 = vadd.xlane.f32.xlu0 %v90_v8  ;;  %97 = vadd.xlane.f32.xlu1 %v96_v9  ;;  %v102_v11 = vsel %vm89_vm0, %v85_v7, 0.0  ;;  %v99_v16 = vsel %vm89_vm0, %v84_v13, 0.0  ;;  %v105_v17 = vsel %vm89_vm0, %v86_v14, 0.0  ;;  %v87_v21 = vmul.f32 %v4955_v19, %v4955_v19 }
  0x13   :  { %7332 = vst [vmem:[#allocation17_spill] sm:$0xff] %v4926_v6  ;;  %103 = vadd.xlane.f32.xlu2 %v102_v11  ;;  %v111_v22 = vsel %vm89_vm0, %v88_v20, 0.0  ;;  %v116_v27 = vsub.f32 1.0, %v115_v26  ;;  %vm119_vm1 = vweird.f32 %v4207_v25 }
  0x14   :  { %7333 = vst [vmem:[#allocation18_spill] sm:$0xff] %v4935_v10  ;;  %v108_v23 = vsel %vm89_vm0, %v87_v21, 0.0 }
  0x15   :  { %7334 = vst [vmem:[#allocation19_spill] sm:$0xff] %v4950_v18  ;;  %v117_v28 = vmul.f32 %v4207_v25, %v116_v27 }
  0x16   :  { %7335 = vst [vmem:[#allocation20_spill] sm:$0xff] %v4955_v19 }
  0x17   :  { %v118_v29 = vadd.f32 %v4207_v25, %v117_v28 }
  0x19   :  { %v4969_v32 = vsel %vm119_vm1, %v4207_v25, %v118_v29 }
  0x1a   :  { %94 = vadd.xlane.f32.xlu0 %v93_v15  ;;  %100 = vadd.xlane.f32.xlu1 %v99_v16  ;;  %7336 = vst [vmem:[#allocation21_spill] sm:$0xff] %v4969_v32 }
  0x1b   :  { %106 = vadd.xlane.f32.xlu2 %v105_v17  ;;  %v5001_v17 = vld [vmem:[%s7337_s22] ss:$0 sm:$0xff] }
  0x22   :  { %112 = vadd.xlane.f32.xlu1 %v111_v22  ;;  %109 = vadd.xlane.f32.xlu0 %v108_v23 }
  0x85   :  { %v92_v35 = vpop.xlane.xlu0 %91  ;;  %v98_v36 = vpop.xlane.xlu1 %97 }
  0x86   :  { %v121_v37 = vmul.f32 %v4969_v32, %v92_v35  ;;  %v123_v38 = vmul.f32 %v4969_v32, %v98_v36  ;;  %v104_v41 = vpop.xlane.xlu2 %103 }
  0x87   :  { %v125_v54 = vmul.f32 %v4969_v32, %v104_v41 }
  0x88   :  { %v129_v39 = vadd.f32 1e-05, %v121_v37  ;;  %v4979_v40 = vadd.f32 1e-05, %v123_v38 }
  0x89   :  { %v4990_v61 = vadd.f32 1e-05, %v125_v54 }
  0x8a   :  { %4208 = vrsqrt.f32 %v129_v39  ;;  %vm143_vm3 = vweird.f32 %v129_v39  ;;  %vm163_vm8 = vweird.f32 %v4979_v40 }
  0x8b   :  { %4210 = vrsqrt.f32 %v4979_v40  ;;  %vm183_vm14 = vweird.f32 %v4990_v61 }
  0x8d   :  { %v95_v42 = vpop.xlane.xlu0 %94  ;;  %v101_v43 = vpop.xlane.xlu1 %100 }
  0x8e   :  { %v122_v44 = vmul.f32 %v4969_v32, %v95_v42  ;;  %v124_v45 = vmul.f32 %v4969_v32, %v101_v43  ;;  %v107_v52 = vpop.xlane.xlu2 %106 }
  0x8f   :  { %v126_v56 = vmul.f32 %v4969_v32, %v107_v52 }
  0x90   :  { %v4209_v46 = vpop.eup %4208  ;;  %v130_v47 = vadd.f32 1e-05, %v122_v44  ;;  %v132_v48 = vadd.f32 1e-05, %v124_v45 }
  0x91   :  { %v138_v49 = vmul.f32 %v4209_v46, %v129_v39  ;;  %v4984_v50 = vpop.eup %4210  ;;  %v4993_v2 = vadd.f32 1e-05, %v126_v56  ;;  %vm144_vm2 = vweird.f32 %v4209_v46 }
  0x92   :  { %4212 = vrsqrt.f32 %v130_v47  ;;  %v158_v55 = vmul.f32 %v4984_v50, %v4979_v40  ;;  %vm145_vm4 = vmor %vm143_vm3, %vm144_vm2  ;;  %vm153_vm6 = vweird.f32 %v130_v47  ;;  %vm164_vm9 = vweird.f32 %v4984_v50 }
  0x93   :  { %v139_v51 = vmul.f32 %v4209_v46, %v138_v49  ;;  %4214 = vrsqrt.f32 %v132_v48  ;;  %vm173_vm10 = vweird.f32 %v132_v48  ;;  %vm165_vm12 = vmor %vm163_vm8, %vm164_vm9  ;;  %vm193_vm1 = vweird.f32 %v4993_v2 }
  0x94   :  { %v159_v62 = vmul.f32 %v4984_v50, %v158_v55  ;;  %4216 = vrsqrt.f32 %v4990_v61 }
  0x95   :  { %v140_v53 = vmul.f32 0.5, %v139_v51  ;;  %4218 = vrsqrt.f32 %v4993_v2  ;;  %v113_v20 = vpop.xlane.xlu1 %112  ;;  %v110_v25 = vpop.xlane.xlu0 %109 }
  0x96   :  { %v160_v11 = vmul.f32 0.5, %v159_v62  ;;  %v128_v28 = vmul.f32 %v4969_v32, %v113_v20  ;;  %v127_v31 = vmul.f32 %v4969_v32, %v110_v25 }
  0x97   :  { %v141_v57 = vsub.f32 1.5, %v140_v53 }
  0x98   :  { %v4213_v58 = vpop.eup %4212  ;;  %v161_v22 = vsub.f32 1.5, %v160_v11  ;;  %v136_v38 = vadd.f32 1e-05, %v128_v28  ;;  %v135_v39 = vadd.f32 1e-05, %v127_v31  ;;  %v3789_v28 = vld [vmem:[%s7256_s8 + $0x10] sm:$0xff] }
  0x99   :  { %v4215_v59 = vpop.eup %4214  ;;  %v148_v60 = vmul.f32 %v4213_v58, %v130_v47  ;;  %v142_v3 = vmul.f32 %v4209_v46, %v141_v57  ;;  %vm154_vm5 = vweird.f32 %v4213_v58 }
  0x9a   :  { %v168_v63 = vmul.f32 %v4215_v59, %v132_v48  ;;  %vm155_vm7 = vmor %vm153_vm6, %vm154_vm5  ;;  %v4217_v21 = vpop.eup %4216  ;;  %vm174_vm11 = vweird.f32 %v4215_v59  ;;  %v162_v33 = vmul.f32 %v4984_v50, %v161_v22  ;;  %4220 = vrsqrt.f32 %v136_v38 }
  0x9b   :  { %v149_v7 = vmul.f32 %v4213_v58, %v148_v60  ;;  %v146_v14 = vsel %vm145_vm4, %v4209_v46, %v142_v3  ;;  %v4219_v26 = vpop.eup %4218  ;;  %v178_v35 = vmul.f32 %v4217_v21, %v4990_v61  ;;  %vm175_vm13 = vmor %vm173_vm10, %vm174_vm11  ;;  %4222 = vrsqrt.f32 %v135_v39 }
  0x9c   :  { %v169_v8 = vmul.f32 %v4215_v59, %v168_v63  ;;  %v217_v16 = vmul.f32 %v146_v14, %v4902_v0  ;;  %v188_v36 = vmul.f32 %v4219_v26, %v4993_v2  ;;  %v166_v42 = vsel %vm165_vm12, %v4984_v50, %v162_v33  ;;  %v5053_v33 = vld [vmem:[%s7253_s5] ss:$0 sm:$0xff] }
  0x9d   :  { %v150_v9 = vmul.f32 0.5, %v149_v7  ;;  %v179_v40 = vmul.f32 %v4217_v21, %v178_v35  ;;  %v219_v44 = vmul.f32 %v166_v42, %v4907_v1  ;;  %vm184_vm15 = vweird.f32 %v4217_v21 }
  0x9e   :  { %v170_v13 = vmul.f32 0.5, %v169_v8  ;;  %v228_v29 = vmul.f32 %v5001_v17, %v217_v16  ;;  %v189_v41 = vmul.f32 %v4219_v26, %v188_v36  ;;  %vm194_vm2 = vweird.f32 %v4219_v26  ;;  %vm185_vm3 = vmor %vm183_vm14, %vm184_vm15 }
  0x9f   :  { %v151_v12 = vsub.f32 1.5, %v150_v9  ;;  %v180_v46 = vmul.f32 0.5, %v179_v40  ;;  %v230_v48 = vmul.f32 %v5001_v17, %v219_v44  ;;  %vm195_vm4 = vmor %vm193_vm1, %vm194_vm2  ;;  %vm213_vm5 = vweird.f32 %v136_v38 }
  0xa0   :  { %v171_v23 = vsub.f32 1.5, %v170_v13  ;;  %v190_v47 = vmul.f32 0.5, %v189_v41  ;;  %v4221_v51 = vpop.eup %4220  ;;  %vm342_vm11 = vcmask 523264   ;;  %v7362_v1 = vmov 2  }
  0xa1   :  { %v152_v15 = vmul.f32 %v4213_v58, %v151_v12  ;;  %v181_v52 = vsub.f32 1.5, %v180_v46  ;;  %v4223_v54 = vpop.eup %4222  ;;  %v208_v57 = vmul.f32 %v4221_v51, %v136_v38  ;;  %vm214_vm6 = vweird.f32 %v4221_v51 }
  0xa2   :  { %v172_v34 = vmul.f32 %v4215_v59, %v171_v23  ;;  %v191_v53 = vsub.f32 1.5, %v190_v47  ;;  %vm204_vm8 = vweird.f32 %v4223_v54  ;;  %vm215_vm9 = vmor %vm213_vm5, %vm214_vm6 }
  0xa3   :  { %v156_v24 = vsel %vm155_vm7, %v4213_v58, %v152_v15  ;;  %v182_v55 = vmul.f32 %v4217_v21, %v181_v52  ;;  %v198_v58 = vmul.f32 %v4223_v54, %v135_v39  ;;  %v209_v60 = vmul.f32 %v4221_v51, %v208_v57 }
  0xa4   :  { %v218_v27 = vmul.f32 %v156_v24, %v4921_v5  ;;  %v176_v43 = vsel %vm175_vm13, %v4215_v59, %v172_v34  ;;  %v192_v56 = vmul.f32 %v4219_v26, %v191_v53  ;;  %v3790_v59 = vld [vmem:[%s7256_s8 + $0x18] sm:$0xff]  ;;  %vm203_vm7 = vweird.f32 %v135_v39 }
  0xa5   :  { %v220_v45 = vmul.f32 %v176_v43, %v4926_v6  ;;  %v199_v61 = vmul.f32 %v4223_v54, %v198_v58  ;;  %v186_v62 = vsel %vm185_vm3, %v4217_v21, %v182_v55  ;;  %883 = vmatpush.bf16.msrb.mxu0 %v3790_v59  ;;  %v210_v7 = vmul.f32 0.5, %v209_v60  ;;  %vm205_vm10 = vmor %vm203_vm7, %vm204_vm8  ;;  %v3787_v43 = vld [vmem:[%s7256_s8] sm:$0xff] }
  0xa6   :  { %v229_v30 = vmul.f32 %v5001_v17, %v218_v27  ;;  %v196_v63 = vsel %vm195_vm4, %v4219_v26, %v192_v56  ;;  %v221_v2 = vmul.f32 %v186_v62, %v4916_v4  ;;  %v4786_v27 = vmov 0.0  }
  0xa7   :  { %v231_v49 = vmul.f32 %v5001_v17, %v220_v45  ;;  %v222_v3 = vmul.f32 %v196_v63, %v4935_v10  ;;  %v200_v8 = vmul.f32 0.5, %v199_v61  ;;  %v211_v12 = vsub.f32 1.5, %v210_v7  ;;  %343 = vst.msk [vmem:[#allocation2] sm:$0xff] %vm342_vm11, %v4786_v27  ;;  %v3780_v61 = vld [vmem:[%s7254_s6 + $0x8] sm:$0xff]  ;;  %v3779_v7 = vld [vmem:[%s7254_s6] sm:$0xff] }
  0xa8   :  { %v236_v37 = vpack.c.bf16 %v229_v30, %v228_v29  ;;  %v232_v9 = vmul.f32 %v5001_v17, %v221_v2  ;;  %344 = vst.msk [vmem:[#allocation2 + $0x8] sm:$0xff] %vm342_vm11, %v4786_v27  ;;  %v354_v29 = vld [vmem:[#allocation7] sm:$0xf]  ;;  %v7363_v5 = vmov 1  }
  0xa9   :  { %v237_v50 = vpack.c.bf16 %v231_v49, %v230_v48  ;;  %v233_v11 = vmul.f32 %v5001_v17, %v222_v3  ;;  %v201_v13 = vsub.f32 1.5, %v200_v8  ;;  %v212_v15 = vmul.f32 %v4221_v51, %v211_v12  ;;  %345 = vst.msk [vmem:[#allocation2 + $0x10] sm:$0xff] %vm342_vm11, %v4786_v27  ;;  %884 = vmatpush.bf16.msrb.mxu0 %v3789_v28  ;;  %v3782_v48 = vld [vmem:[%s7254_s6 + $0x18] sm:$0xff] }
  0xaa   :  { %3661 = vmatmul.msk.bf16.vlgmr.msra.gmra.mxu0 %vm89_vm0, %v236_v37  ;;  %3673 = vmatmul.msk.bf16.vlgmr.msra.gmra.mxu1 %vm89_vm0, %v236_v37  ;;  %v5048_v30 = vperm.slane %v354_v29, 0  ;;  %v5056_v35 = vperm.slane %v354_v29, 1  ;;  %v5060_v39 = vperm.slane %v354_v29, 2  ;;  %v5070_v47 = vperm.slane %v354_v29, 3 }
  0xab   :  { %v238_v14 = vpack.c.bf16 %v233_v11, %v232_v9  ;;  %v202_v16 = vmul.f32 %v4223_v54, %v201_v13  ;;  %v216_v21 = vsel %vm215_vm9, %v4221_v51, %v212_v15  ;;  %650 = vmatpush.bf16.msra.mxu2 %v3782_v48 }
  0xac   :  { %v224_v23 = vmul.f32 %v216_v21, %v4950_v18 }
  0xad   :  { %v206_v20 = vsel %vm205_vm10, %v4223_v54, %v202_v16  ;;  %v3781_v54 = vld [vmem:[%s7254_s6 + $0x10] sm:$0xff] }
  0xae   :  { %v223_v22 = vmul.f32 %v206_v20, %v4955_v19  ;;  %v235_v25 = vmul.f32 %v5001_v17, %v224_v23  ;;  %v359_v31 = vld [vmem:[#allocation2] sm:$0xff] }
  0xaf   :  { %v368_v34 = vmul.f32 %v5048_v30, %v359_v31  ;;  %v360_v36 = vld [vmem:[#allocation2 + $0x8] sm:$0xff]  ;;  %651 = vmatpush.bf16.msra.mxu2 %v3781_v54 }
  0xb0   :  { %v234_v24 = vmul.f32 %v5001_v17, %v223_v22  ;;  %v3788_v17 = vld [vmem:[%s7256_s8 + $0x8] sm:$0xff]  ;;  %v386_v38 = vmul.f32 %v5056_v35, %v360_v36  ;;  %v361_v42 = vld [vmem:[#allocation2 + $0x10] sm:$0xff]  ;;  %v369_v46 = vmul.f32 %v5048_v30, %v360_v36 }
  0xb1   :  { %885 = vmatpush.bf16.msrb.mxu0 %v3788_v17  ;;  %v376_v37 = vadd.f32 %v5053_v33, %v368_v34  ;;  %v404_v45 = vmul.f32 %v5060_v39, %v361_v42  ;;  %v387_v55 = vmul.f32 %v5056_v35, %v361_v42  ;;  %v370_v63 = vmul.f32 %v5048_v30, %v361_v42 }
  0xb2   :  { %v239_v26 = vpack.c.bf16 %v235_v25, %v234_v24 }
  0xb3   :  { %v394_v44 = vadd.f32 %v386_v38, %v376_v37  ;;  %652 = vmatpush.bf16.msra.mxu2 %v3780_v61  ;;  %v378_v12 = vadd.f32 %v5053_v33, %v370_v63 }
  0xb5   :  { %886 = vmatpush.bf16.msrb.mxu0 %v3787_v43  ;;  %v412_v49 = vadd.f32 %v404_v45, %v394_v44 }
  0xb7   :  { %653 = vmatpush.bf16.msra.mxu2 %v3779_v7 }
  0xba   :  { %3662 = vmatmul.msk.bf16.gmra.mxu0 %vm89_vm0, %v237_v50  ;;  %3674 = vmatmul.msk.bf16.gmra.mxu1 %vm89_vm0, %v237_v50  ;;  %v377_v50 = vadd.f32 %v5053_v33, %v369_v46 }
  0xbc   :  { %v395_v58 = vadd.f32 %v387_v55, %v377_v50 }
  0xca   :  { %3663 = vmatmul.msk.bf16.gmra.mxu0 %vm89_vm0, %v238_v14  ;;  %3675 = vmatmul.msk.bf16.gmra.mxu1 %vm89_vm0, %v238_v14 }
  0xda   :  { %3664 = vmatmul.msk.bf16.gmra.mxu0 %vm89_vm0, %v239_v26  ;;  %3676 = vmatmul.msk.bf16.gmra.mxu1 %vm89_vm0, %v239_v26 }
 0x127   :  { %v277_v40 = vpop.f32.mrf.mxu0  ;;  %v5062_v41 = vpop.f32.mrf.mxu1 }
 0x128   :  { %7338 = vst [vmem:[#allocation22_spill] sm:$0xff] %v5062_v41 }
 0x129   :  { %346 = vst.msk [vmem:[#allocation2 + $0x18] sm:$0xff] %vm342_vm11, %v277_v40 }
 0x12f   :  { %v279_v51 = vpop.f32.mrf.mxu0  ;;  %v5075_v52 = vpop.f32.mrf.mxu1 }
 0x130   :  { %7339 = vst [vmem:[#allocation23_spill] sm:$0xff] %v5075_v52  ;;  %v362_v53 = vld [vmem:[#allocation2 + $0x18] sm:$0xff]  ;;  %v7372_v52 = vmov 9  }
 0x131   :  { %347 = vst.msk [vmem:[#allocation2 + $0x20] sm:$0xff] %vm342_vm11, %v279_v51  ;;  %v422_v56 = vmul.f32 %v5070_v47, %v362_v53  ;;  %v405_v59 = vmul.f32 %v5060_v39, %v362_v53  ;;  %v388_v13 = vmul.f32 %v5056_v35, %v362_v53  ;;  %v371_v26 = vmul.f32 %v5048_v30, %v362_v53 }
 0x133   :  { %v5084_v57 = vadd.f32 %v422_v56, %v412_v49  ;;  %v413_v8 = vadd.f32 %v405_v59, %v395_v58  ;;  %v396_v21 = vadd.f32 %v388_v13, %v378_v12  ;;  %v379_v31 = vadd.f32 %v5053_v33, %v371_v26 }
 0x135   :  { %v438_v60 = vsub.f32 0.0, %v5084_v57 }
 0x137   :  { %v446_v62 = vmul.f32 1.442695, %v438_v60  ;;  %v282_v2 = vpop.f32.mrf.mxu0  ;;  %v5106_v25 = vpop.f32.mrf.mxu1 }
 0x138   :  { %v363_v3 = vld [vmem:[#allocation2 + $0x20] sm:$0xff]  ;;  %348 = vst.msk [vmem:[#allocation2 + $0x28] sm:$0xff] %vm342_vm11, %v282_v2 }
 0x139   :  { %v423_v9 = vmul.f32 %v5070_v47, %v363_v3  ;;  %4224 = vpow2.f32 %v446_v62  ;;  %v406_v15 = vmul.f32 %v5060_v39, %v363_v3  ;;  %7340 = vst [vmem:[#allocation24_spill] sm:$0xff] %v5106_v25  ;;  %v389_v17 = vmul.f32 %v5056_v35, %v363_v3 }
 0x13a   :  { %v372_v50 = vmul.f32 %v5048_v30, %v363_v3 }
 0x13b   :  { %v5097_v11 = vadd.f32 %v423_v9, %v413_v8  ;;  %v414_v27 = vadd.f32 %v406_v15, %v396_v21  ;;  %v397_v38 = vadd.f32 %v389_v17, %v379_v31 }
 0x13c   :  { %v380_v62 = vadd.f32 %v5053_v33, %v372_v50 }
 0x13d   :  { %v439_v14 = vsub.f32 0.0, %v5097_v11 }
 0x13f   :  { %v4225_v16 = vpop.eup %4224  ;;  %v448_v20 = vmul.f32 1.442695, %v439_v14  ;;  %v284_v22 = vpop.f32.mrf.mxu0  ;;  %v364_v24 = vld [vmem:[#allocation2 + $0x28] sm:$0xff] }
 0x140   :  { %v5103_v23 = vadd.f32 1.0, %v4225_v16  ;;  %349 = vst.msk [vmem:[#allocation2 + $0x30] sm:$0xff] %vm342_vm11, %v284_v22  ;;  %v424_v28 = vmul.f32 %v5070_v47, %v364_v24  ;;  %v407_v34 = vmul.f32 %v5060_v39, %v364_v24  ;;  %v5121_v48 = vpop.f32.mrf.mxu1  ;;  %v373_v55 = vmul.f32 %v5048_v30, %v364_v24 }
 0x141   :  { %4226 = vpow2.f32 %v448_v20  ;;  %7341 = vst [vmem:[#allocation25_spill] sm:$0xff] %v5121_v48  ;;  %v390_v59 = vmul.f32 %v5056_v35, %v364_v24 }
 0x142   :  { %4228 = vrcp.f32 %v5103_v23  ;;  %v5112_v29 = vadd.f32 %v424_v28, %v414_v27  ;;  %v415_v49 = vadd.f32 %v407_v34, %v397_v38  ;;  %v381_v63 = vadd.f32 %v5053_v33, %v373_v55 }
 0x143   :  { %v481_v13 = vand.u32 2147483648, %v5103_v23  ;;  %vm475_vm13 = vweird.f32 %v5103_v23  ;;  %v479_v16 = vand.u32 2147483647, %v5103_v23  ;;  %v398_v20 = vadd.f32 %v390_v59, %v380_v62 }
 0x144   :  { %v440_v36 = vsub.f32 0.0, %v5112_v29 }
 0x145   :  { %v482_v34 = vor.u32 1.1754944e-38, %v481_v13  ;;  %vm480_vm1 = vcmp.eq.f32.partialorder %v479_v16, 8.507059e+37 }
 0x146   :  { %v450_v40 = vmul.f32 1.442695, %v440_v36 }
 0x147   :  { %v4227_v37 = vpop.eup %4226  ;;  %v287_v43 = vpop.f32.mrf.mxu0  ;;  %v365_v45 = vld [vmem:[#allocation2 + $0x30] sm:$0xff] }
 0x148   :  { %v4229_v42 = vpop.eup %4228  ;;  %v5117_v44 = vadd.f32 1.0, %v4227_v37  ;;  %350 = vst.msk [vmem:[#allocation2 + $0x38] sm:$0xff] %vm342_vm11, %v287_v43  ;;  %v425_v51 = vmul.f32 %v5070_v47, %v365_v45  ;;  %4230 = vpow2.f32 %v450_v40  ;;  %v391_v2 = vmul.f32 %v5056_v35, %v365_v45 }
 0x149   :  { %v471_v46 = vmul.f32 %v4229_v42, %v5103_v23  ;;  %vm476_vm12 = vweird.f32 %v4229_v42  ;;  %v408_v12 = vmul.f32 %v5060_v39, %v365_v45  ;;  %v374_v23 = vmul.f32 %v5048_v30, %v365_v45 }
 0x14a   :  { %4232 = vrcp.f32 %v5117_v44  ;;  %v5125_v54 = vadd.f32 %v425_v51, %v415_v49  ;;  %vm5143_vm14 = vmor %vm475_vm13, %vm476_vm12  ;;  %v496_v24 = vand.u32 2147483648, %v5117_v44  ;;  %v399_v26 = vadd.f32 %v391_v2, %v381_v63 }
 0x14b   :  { %v472_v53 = vsub.f32 1.0, %v471_v46  ;;  %v416_v17 = vadd.f32 %v408_v12, %v398_v20  ;;  %v494_v37 = vand.u32 2147483647, %v5117_v44  ;;  %vm490_vm2 = vweird.f32 %v5117_v44 }
 0x14c   :  { %v441_v58 = vsub.f32 0.0, %v5125_v54  ;;  %v497_v49 = vor.u32 1.1754944e-38, %v496_v24 }
 0x14d   :  { %v473_v56 = vmul.f32 %v4229_v42, %v472_v53  ;;  %vm495_vm4 = vcmp.eq.f32.partialorder %v494_v37, 8.507059e+37 }
 0x14e   :  { %v4231_v60 = vpop.eup %4230  ;;  %v452_v61 = vmul.f32 1.442695, %v441_v58 }
 0x14f   :  { %v289_v8 = vpop.f32.mrf.mxu0  ;;  %v474_v9 = vadd.f32 %v4229_v42, %v473_v56  ;;  %v5134_v3 = vadd.f32 1.0, %v4231_v60  ;;  %v366_v15 = vld [vmem:[#allocation2 + $0x38] sm:$0xff]  ;;  %v382_v56 = vadd.f32 %v5053_v33, %v374_v23 }
 0x150   :  { %v4233_v7 = vpop.eup %4232  ;;  %351 = vst.msk [vmem:[#allocation2 + $0x40] sm:$0xff] %vm342_vm11, %v289_v8  ;;  %4234 = vpow2.f32 %v452_v61  ;;  %v409_v27 = vmul.f32 %v5060_v39, %v366_v15  ;;  %v426_v31 = vmul.f32 %v5070_v47, %v366_v15 }
 0x151   :  { %v486_v14 = vmul.f32 %v4233_v7, %v5117_v44  ;;  %4236 = vrcp.f32 %v5134_v3  ;;  %v478_v28 = vsel %vm5143_vm14, %v4229_v42, %v474_v9  ;;  %vm491_vm15 = vweird.f32 %v4233_v7 }
 0x152   :  { %v5155_v38 = vadd.f32 %v426_v31, %v416_v17  ;;  %v483_v43 = vsel %vm480_vm1, %v482_v34, %v478_v28  ;;  %v417_v42 = vadd.f32 %v409_v27, %v399_v26  ;;  %vm492_vm3 = vmor %vm490_vm2, %vm491_vm15  ;;  %v392_v44 = vmul.f32 %v5056_v35, %v366_v15 }
 0x153   :  { %v487_v22 = vsub.f32 1.0, %v486_v14  ;;  %v5169_v62 = vmul.f32 %v483_v43, %v5084_v57  ;;  %v509_v28 = vand.u32 2147483647, %v5134_v3  ;;  %v511_v17 = vand.u32 2147483648, %v5134_v3 }
 0x154   :  { %v442_v55 = vsub.f32 0.0, %v5155_v38  ;;  %v400_v12 = vadd.f32 %v392_v44, %v382_v56  ;;  %vm505_vm6 = vweird.f32 %v5134_v3 }
 0x155   :  { %v488_v36 = vmul.f32 %v4233_v7, %v487_v22  ;;  %vm510_vm9 = vcmp.eq.f32.partialorder %v509_v28, 8.507059e+37 }
 0x156   :  { %v4235_v40 = vpop.eup %4234  ;;  %v454_v9 = vmul.f32 1.442695, %v442_v55 }
 0x157   :  { %v489_v46 = vadd.f32 %v4233_v7, %v488_v36  ;;  %v5157_v51 = vpop.eup %4236  ;;  %v292_v53 = vpop.f32.mrf.mxu0  ;;  %v5159_v45 = vadd.f32 1.0, %v4235_v40  ;;  %v384_v50 = vld [vmem:[#allocation2 + $0x40] sm:$0xff] }
 0x158   :  { %352 = vst.msk [vmem:[#allocation2 + $0x48] sm:$0xff] %vm342_vm11, %v292_v53  ;;  %v501_v59 = vmul.f32 %v5157_v51, %v5134_v3  ;;  %v427_v60 = vmul.f32 %v5070_v47, %v384_v50  ;;  %v410_v13 = vmul.f32 %v5060_v39, %v384_v50  ;;  %vm506_vm5 = vweird.f32 %v5157_v51 }
 0x159   :  { %v493_v58 = vsel %vm492_vm3, %v4233_v7, %v489_v46  ;;  %4238 = vrcp.f32 %v5159_v45  ;;  %v375_v7 = vmul.f32 %v5048_v30, %v366_v15  ;;  %v393_v15 = vmul.f32 %v5056_v35, %v384_v50  ;;  %vm5200_vm7 = vmor %vm505_vm6, %vm506_vm5 }
 0x15a   :  { %v498_v61 = vsel %vm495_vm4, %v497_v49, %v493_v58  ;;  %v502_v2 = vsub.f32 1.0, %v501_v59  ;;  %v5175_v8 = vadd.f32 %v427_v60, %v417_v42  ;;  %4240 = vpow2.f32 %v454_v9 }
 0x15b   :  { %v5173_v63 = vmul.f32 %v498_v61, %v5097_v11  ;;  %v383_v11 = vadd.f32 %v5053_v33, %v375_v7  ;;  %v418_v24 = vadd.f32 %v410_v13, %v400_v12  ;;  %v524_v37 = vand.u32 2147483647, %v5159_v45 }
 0x15c   :  { %v503_v57 = vmul.f32 %v5157_v51, %v502_v2  ;;  %v443_v16 = vsub.f32 0.0, %v5175_v8  ;;  %v526_v40 = vand.u32 2147483648, %v5159_v45  ;;  %vm520_vm10 = vweird.f32 %v5159_v45 }
 0x15d   :  { %v5181_v14 = vpack.c.bf16 %v5173_v63, %v5169_v62  ;;  %v401_v31 = vadd.f32 %v393_v15, %v383_v11  ;;  %vm525_vm13 = vcmp.eq.f32.partialorder %v524_v37, 8.507059e+37  ;;  %v7287_v11 = vmov 2  }
 0x15e   :  { %v456_v30 = vmul.f32 1.442695, %v443_v16  ;;  %v504_v26 = vadd.f32 %v5157_v51, %v503_v57  ;;  %v527_v44 = vor.u32 1.1754944e-38, %v526_v40  ;;  %3957 = vset.pattern.permute.xlu2 %v7287_v11  ;;  %v7285_v15 = vmov 1  }
 0x15f   :  { %3693 = vmatmul.msk.bf16.vlgmr.msra.gmra.mxu2 %vm342_vm11, %v5181_v14  ;;  %3737 = vmatmul.msk.bf16.vlgmr.msrb.gmra.mxu0 %vm342_vm11, %v5181_v14  ;;  %v4239_v20 = vpop.eup %4238  ;;  %v294_v21 = vpop.f32.mrf.mxu0  ;;  %v402_v22 = vld [vmem:[#allocation2 + $0x48] sm:$0xff] }
 0x160   :  { %353 = vst.msk [vmem:[#allocation2 + $0x50] sm:$0xff] %vm342_vm11, %v294_v21  ;;  %v516_v27 = vmul.f32 %v4239_v20, %v5159_v45  ;;  %4242 = vpow2.f32 %v456_v30  ;;  %v428_v33 = vmul.f32 %v5070_v47, %v402_v22  ;;  %v411_v23 = vmul.f32 %v5060_v39, %v402_v22  ;;  %v4241_v34 = vpop.eup %4240  ;;  %3956 = vset.pattern.permute.xlu1 %v7285_v15 }
 0x161   :  { %v508_v46 = vsel %vm5200_vm7, %v5157_v51, %v504_v26  ;;  %vm521_vm8 = vweird.f32 %v4239_v20  ;;  %v5211_v49 = vadd.f32 1.0, %v4241_v34  ;;  %v512_v39 = vor.u32 1.1754944e-38, %v511_v17 }
 0x162   :  { %v517_v35 = vsub.f32 1.0, %v516_v27  ;;  %v5206_v43 = vadd.f32 %v428_v33, %v418_v24  ;;  %v419_v55 = vadd.f32 %v411_v23, %v401_v31  ;;  %vm522_vm12 = vmor %vm520_vm10, %vm521_vm8  ;;  %v7289_v24 = vmov 0  }
 0x163   :  { %4244 = vrcp.f32 %v5211_v49  ;;  %v513_v56 = vsel %vm510_vm9, %v512_v39, %v508_v46  ;;  %v541_v21 = vand.u32 2147483648, %v5211_v49  ;;  %3955 = vset.pattern.permute.xlu0 %v7289_v24  ;;  %vm535_vm2 = vweird.f32 %v5211_v49 }
 0x164   :  { %v518_v3 = vmul.f32 %v4239_v20, %v517_v35  ;;  %v444_v42 = vsub.f32 0.0, %v5206_v43  ;;  %v5218_v7 = vmul.f32 %v513_v56, %v5112_v29 }
 0x165   :  { %v542_v36 = vor.u32 1.1754944e-38, %v541_v21 }
 0x166   :  { %v4243_v53 = vpop.eup %4242  ;;  %v519_v50 = vadd.f32 %v4239_v20, %v518_v3  ;;  %v458_v59 = vmul.f32 1.442695, %v444_v42 }
 0x167   :  { %v467_v58 = vadd.f32 1.0, %v4243_v53  ;;  %v420_v51 = vld [vmem:[#allocation2 + $0x50] sm:$0xff] }
 0x168   :  { %v523_v60 = vsel %vm522_vm12, %v4239_v20, %v519_v50  ;;  %v429_v61 = vmul.f32 %v5070_v47, %v420_v51  ;;  %v539_v20 = vand.u32 2147483647, %v5211_v49 }
 0x169   :  { %v528_v2 = vsel %vm525_vm13, %v527_v44, %v523_v60  ;;  %4246 = vrcp.f32 %v467_v58  ;;  %v4245_v12 = vpop.eup %4244  ;;  %vm550_vm15 = vweird.f32 %v467_v58  ;;  %v556_v28 = vand.u32 2147483648, %v467_v58 }
 0x16a   :  { %v5221_v45 = vmul.f32 %v528_v2, %v5125_v54  ;;  %v5223_v9 = vadd.f32 %v429_v61, %v419_v55  ;;  %4248 = vpow2.f32 %v458_v59  ;;  %v531_v47 = vmul.f32 %v4245_v12, %v5211_v49  ;;  %v5235_v54 = vpop.f32.mrf.mxu1 }
 0x16b   :  { %7346 = vst [vmem:[#allocation26_spill] sm:$0xff] %v5235_v54  ;;  %vm536_vm14 = vweird.f32 %v4245_v12  ;;  %v554_v33 = vand.u32 2147483647, %v467_v58  ;;  %v557_v37 = vor.u32 1.1754944e-38, %v556_v28  ;;  %vm540_vm5 = vcmp.eq.f32.partialorder %v539_v20, 8.507059e+37 }
 0x16c   :  { %v5227_v13 = vpack.c.bf16 %v5221_v45, %v5218_v7  ;;  %v445_v57 = vsub.f32 0.0, %v5223_v9  ;;  %v532_v30 = vsub.f32 1.0, %v531_v47  ;;  %vm537_vm3 = vmor %vm535_vm2, %vm536_vm14  ;;  %vm684_vm2 = vcmask 15360  }
 0x16d   :  { %vm555_vm6 = vcmp.eq.f32.partialorder %v554_v33, 8.507059e+37  ;;  %v7370_v54 = vmov 11  }
 0x16e   :  { %v460_v29 = vmul.f32 1.442695, %v445_v57  ;;  %v533_v27 = vmul.f32 %v4245_v12, %v532_v30  ;;  %v7293_v57 = vmov 13  }
 0x16f   :  { %3694 = vmatmul.msk.bf16.gmra.mxu2 %vm342_vm11, %v5227_v13  ;;  %3738 = vmatmul.msk.bf16.gmra.mxu0 %vm342_vm11, %v5227_v13  ;;  %v4247_v16 = vpop.eup %4246 }
 0x170   :  { %v546_v22 = vmul.f32 %v4247_v16, %v467_v58  ;;  %4250 = vpow2.f32 %v460_v29  ;;  %v4249_v26 = vpop.eup %4248  ;;  %vm551_vm1 = vweird.f32 %v4247_v16  ;;  %v534_v31 = vadd.f32 %v4245_v12, %v533_v27 }
 0x171   :  { %v468_v35 = vadd.f32 1.0, %v4249_v26  ;;  %vm552_vm4 = vmor %vm550_vm15, %vm551_vm1  ;;  %vm697_vm1 = vcmask 1040384  }
 0x172   :  { %v547_v17 = vsub.f32 1.0, %v546_v22  ;;  %v538_v34 = vsel %vm537_vm3, %v4245_v12, %v534_v31  ;;  %v5243_v3 = vpop.f32.mrf.mxu1 }
 0x173   :  { %4252 = vrcp.f32 %v468_v35  ;;  %7347 = vst [vmem:[#allocation27_spill] sm:$0xff] %v5243_v3  ;;  %v543_v39 = vsel %vm540_vm5, %v542_v36, %v538_v34  ;;  %vm565_vm7 = vweird.f32 %v468_v35  ;;  %v569_v61 = vand.u32 2147483647, %v468_v35  ;;  %v679_v34 = vld [vmem:[%s7257_s9] sm:$0x1] }
 0x174   :  { %v548_v23 = vmul.f32 %v4247_v16, %v547_v17  ;;  %v5246_v49 = vmul.f32 %v543_v39, %v5155_v38 }
 0x175   :  { %vm570_vm13 = vcmp.eq.f32.partialorder %v569_v61, 8.507059e+37 }
 0x176   :  { %v4251_v40 = vpop.eup %4250  ;;  %v549_v46 = vadd.f32 %v4247_v16, %v548_v23  ;;  %7348 = vst [vmem:[#allocation28_spill] sm:$0xff] %v5246_v49 }
 0x177   :  { %v469_v42 = vadd.f32 1.0, %v4251_v40  ;;  %v7279_v40 = vmov 4  }
 0x178   :  { %v553_v53 = vsel %vm552_vm4, %v4247_v16, %v549_v46  ;;  %v7277_v46 = vmov 3  }
 0x179   :  { %v558_v50 = vsel %vm555_vm6, %v557_v37, %v553_v53  ;;  %4254 = vrcp.f32 %v469_v42  ;;  %v4253_v55 = vpop.eup %4252  ;;  %v586_v47 = vand.u32 2147483648, %v469_v42  ;;  %vm580_vm10 = vweird.f32 %v469_v42 }
 0x17a   :  { %v5249_v56 = vmul.f32 %v558_v50, %v5175_v8  ;;  %v561_v44 = vmul.f32 %v4253_v55, %v468_v35  ;;  %vm566_vm8 = vweird.f32 %v4253_v55  ;;  %v5259_v59 = vpop.f32.mrf.mxu1  ;;  %v571_v8 = vand.u32 2147483648, %v468_v35 }
 0x17b   :  { %7349 = vst [vmem:[#allocation29_spill] sm:$0xff] %v5259_v59  ;;  %vm5261_vm9 = vmor %vm565_vm7, %vm566_vm8  ;;  %v584_v16 = vand.u32 2147483647, %v469_v42  ;;  %v587_v22 = vor.u32 1.1754944e-38, %v586_v47  ;;  %v7283_v37 = vmov 5   ;;  %v7275_v53 = vmov 8  }
 0x17c   :  { %v5253_v58 = vpack.c.bf16 %v5249_v56, %v5246_v49  ;;  %v562_v51 = vsub.f32 1.0, %v561_v44  ;;  %v572_v30 = vor.u32 1.1754944e-38, %v571_v8  ;;  %v7269_v50 = vmov 7  }
 0x17d   :  { %vm585_vm15 = vcmp.eq.f32.partialorder %v584_v16, 8.507059e+37  ;;  %v7291_v47 = vmov 12   ;;  %v3785_v16 = vld [vmem:[%s7255_s7 + $0x10] sm:$0xff]  ;;  %v7364_v59 = vmov 5  }
 0x17e   :  { %v563_v60 = vmul.f32 %v4253_v55, %v562_v51  ;;  %v7273_v51 = vmov 11  }
 0x17f   :  { %3695 = vmatmul.msk.bf16.gmra.mxu2 %vm342_vm11, %v5253_v58  ;;  %3739 = vmatmul.msk.bf16.gmra.mxu0 %vm342_vm11, %v5253_v58  ;;  %v4255_v38 = vpop.eup %4254 }
 0x180   :  { %v576_v2 = vmul.f32 %v4255_v38, %v469_v42  ;;  %v564_v12 = vadd.f32 %v4253_v55, %v563_v60  ;;  %vm581_vm12 = vweird.f32 %v4255_v38  ;;  %v7281_v60 = vmov 9  }
 0x181   :  { %vm582_vm14 = vmor %vm580_vm10, %vm581_vm12 }
 0x182   :  { %v577_v29 = vsub.f32 1.0, %v576_v2  ;;  %v568_v20 = vsel %vm5261_vm9, %v4253_v55, %v564_v12  ;;  %v5267_v27 = vpop.f32.mrf.mxu1  ;;  %v7267_v55 = vmov 6   ;;  %v7295_v2 = vmov 14   ;;  %v3786_v12 = vld [vmem:[%s7255_s7 + $0x18] sm:$0xff] }
 0x183   :  { %7352 = vst [vmem:[#allocation30_spill] sm:$0xff] %v5267_v27  ;;  %v573_v28 = vsel %vm570_vm13, %v572_v30, %v568_v20 }
 0x184   :  { %v578_v21 = vmul.f32 %v4255_v38, %v577_v29  ;;  %v5270_v35 = vmul.f32 %v573_v28, %v5206_v43  ;;  %v699_v43 = vsel %vm697_vm1, %v679_v34, 0 }
 0x185   :  { %708 = vmatpush.bf16.msra.mxu3 %v699_v43 }
 0x186   :  { %v579_v26 = vadd.f32 %v4255_v38, %v578_v21  ;;  %7353 = vst [vmem:[#allocation31_spill] sm:$0xff] %v5270_v35 }
 0x188   :  { %v583_v17 = vsel %vm582_vm14, %v4255_v38, %v579_v26  ;;  %v7271_v38 = vmov 10   ;;  %v3783_v26 = vld [vmem:[%s7255_s7] sm:$0xff] }
 0x189   :  { %v588_v33 = vsel %vm585_vm15, %v587_v22, %v583_v17  ;;  %822 = vmatpush.bf16.msrb.mxu3 %v3786_v12  ;;  %v3784_v22 = vld [vmem:[%s7255_s7 + $0x8] sm:$0xff] }
 0x18a   :  { %v5273_v31 = vmul.f32 %v588_v33, %v5223_v9 }
 0x18c   :  { %7354 = vst [vmem:[#allocation32_spill] sm:$0xff] %v5273_v31  ;;  %v5277_v23 = vpack.c.bf16 %v5273_v31, %v5270_v35 }
 0x18d   :  { %823 = vmatpush.bf16.msrb.mxu3 %v3785_v16 }
 0x18f   :  { %3696 = vmatmul.msk.bf16.gmra.mxu2 %vm342_vm11, %v5277_v23  ;;  %3740 = vmatmul.msk.bf16.gmra.mxu0 %vm342_vm11, %v5277_v23 }
 0x191   :  { %824 = vmatpush.bf16.msrb.mxu3 %v3784_v22 }
 0x195   :  { %825 = vmatpush.bf16.msrb.mxu3 %v3783_v26 }
 0x1dc   :  { %v5286_v36 = vpop.f32.mrf.mxu0 }
 0x1dd   :  { %1263 = vperm.xlu2 %3957, %v5286_v36   ;;  %1139 = vperm.xlu1 %3956, %v5286_v36  }
 0x1de   :  { %1009 = vperm.xlu0 %3955, %v5286_v36  }
 0x1e2   :  { %v655_v9 = vpop.f32.mrf.mxu2 }
 0x1e4   :  { %v5323_v20 = vpop.f32.mrf.mxu0 }
 0x1e5   :  { %3960 = vset.pattern.permute.xlu2 %v7283_v37  ;;  %3959 = vset.pattern.permute.xlu1 %v7279_v40  ;;  %7355 = vst [vmem:[#allocation33_spill] sm:$0xff] %v5323_v20 }
 0x1e6   :  { %3958 = vset.pattern.permute.xlu0 %v7277_v46  ;;  %1635 = vperm.xlu2 %3960, %v5286_v36  }
 0x1e7   :  { %1511 = vperm.xlu1 %3959, %v5286_v36   ;;  %1387 = vperm.xlu0 %3958, %v5286_v36  }
 0x1ea   :  { %v657_v39 = vpop.f32.mrf.mxu2 }
 0x1eb   :  { %v675_v42 = vpack.c.bf16 %v657_v39, %v655_v9 }
 0x1ec   :  { %v5366_v43 = vpop.f32.mrf.mxu0 }
 0x1ed   :  { %3697 = vmatmul.msk.bf16.vlgmr.msra.gmra.mxu3 %vm684_vm2, %v675_v42  ;;  %7356 = vst [vmem:[#allocation34_spill] sm:$0xff] %v5366_v43 }
 0x1ee   :  { %3963 = vset.pattern.permute.xlu2 %v7275_v53 }
 0x1ef   :  { %3962 = vset.pattern.permute.xlu1 %v7269_v50  ;;  %3961 = vset.pattern.permute.xlu0 %v7267_v55 }
 0x1f0   :  { %2007 = vperm.xlu2 %3963, %v5286_v36   ;;  %1883 = vperm.xlu1 %3962, %v5286_v36  }
 0x1f1   :  { %1759 = vperm.xlu0 %3961, %v5286_v36  }
 0x1f2   :  { %v660_v44 = vpop.f32.mrf.mxu2 }
 0x1f4   :  { %v5416_v16 = vpop.f32.mrf.mxu0 }
 0x1f8   :  { %3966 = vset.pattern.permute.xlu2 %v7273_v51  ;;  %3965 = vset.pattern.permute.xlu1 %v7271_v38 }
 0x1f9   :  { %3964 = vset.pattern.permute.xlu0 %v7281_v60  ;;  %2379 = vperm.xlu2 %3966, %v5286_v36  }
 0x1fa   :  { %2255 = vperm.xlu1 %3965, %v5286_v36   ;;  %2131 = vperm.xlu0 %3964, %v5286_v36   ;;  %v662_v8 = vpop.f32.mrf.mxu2 }
 0x1fb   :  { %v676_v61 = vpack.c.bf16 %v662_v8, %v660_v44 }
 0x1fd   :  { %3698 = vmatmul.msk.bf16.gmra.mxu3 %vm684_vm2, %v676_v61 }
 0x201   :  { %3969 = vset.pattern.permute.xlu2 %v7295_v2 }
 0x202   :  { %3968 = vset.pattern.permute.xlu1 %v7293_v57  ;;  %3967 = vset.pattern.permute.xlu0 %v7291_v47  ;;  %v665_v29 = vpop.f32.mrf.mxu2 }
 0x203   :  { %2751 = vperm.xlu2 %3969, %v5286_v36   ;;  %2627 = vperm.xlu1 %3968, %v5286_v36  }
 0x204   :  { %2503 = vperm.xlu0 %3967, %v5286_v36  }
 0x20a   :  { %v667_v30 = vpop.f32.mrf.mxu2 }
 0x20b   :  { %3970 = vset.pattern.permute.xlu2 %v7289_v24  ;;  %3972 = vset.pattern.permute.xlu1 %v7287_v11  ;;  %v677_v21 = vpack.c.bf16 %v667_v30, %v665_v29 }
 0x20c   :  { %3971 = vset.pattern.permute.xlu0 %v7285_v15  ;;  %1267 = vperm.xlu1 %3972, %v5323_v20  }
 0x20d   :  { %1143 = vperm.xlu0 %3971, %v5323_v20   ;;  %1014 = vperm.xlu2 %3970, %v5323_v20  }
 0x20e   :  { %3699 = vmatmul.msk.bf16.gmra.mxu3 %vm684_vm2, %v677_v21 }
 0x212   :  { %v670_v28 = vpop.f32.mrf.mxu2 }
 0x214   :  { %3975 = vset.pattern.permute.xlu1 %v7283_v37 }
 0x215   :  { %3974 = vset.pattern.permute.xlu0 %v7279_v40  ;;  %3973 = vset.pattern.permute.xlu2 %v7277_v46 }
 0x216   :  { %1639 = vperm.xlu1 %3975, %v5323_v20   ;;  %1515 = vperm.xlu0 %3974, %v5323_v20  }
 0x217   :  { %1391 = vperm.xlu2 %3973, %v5323_v20  }
 0x21a   :  { %v672_v17 = vpop.f32.mrf.mxu2 }
 0x21b   :  { %v678_v33 = vpack.c.bf16 %v672_v17, %v670_v28 }
 0x21e   :  { %3978 = vset.pattern.permute.xlu1 %v7275_v53  ;;  %3977 = vset.pattern.permute.xlu0 %v7269_v50 }
 0x21f   :  { %3976 = vset.pattern.permute.xlu2 %v7267_v55  ;;  %2011 = vperm.xlu1 %3978, %v5323_v20  }
 0x220   :  { %1887 = vperm.xlu0 %3977, %v5323_v20   ;;  %1763 = vperm.xlu2 %3976, %v5323_v20  }
 0x221   :  { %3700 = vmatmul.msk.bf16.gmra.mxu3 %vm684_vm2, %v678_v33 }
 0x227   :  { %3981 = vset.pattern.permute.xlu1 %v7273_v51 }
 0x228   :  { %3980 = vset.pattern.permute.xlu0 %v7271_v38  ;;  %3979 = vset.pattern.permute.xlu2 %v7281_v60 }
 0x229   :  { %2383 = vperm.xlu1 %3981, %v5323_v20   ;;  %2259 = vperm.xlu0 %3980, %v5323_v20  }
 0x22a   :  { %2135 = vperm.xlu2 %3979, %v5323_v20  }
 0x231   :  { %3984 = vset.pattern.permute.xlu1 %v7295_v2  ;;  %3983 = vset.pattern.permute.xlu0 %v7293_v57 }
 0x232   :  { %3982 = vset.pattern.permute.xlu2 %v7291_v47  ;;  %3717 = vmatmul.msk.bf16.vlgmr.msrb.gmra.mxu3 %vm342_vm11, %v5181_v14 }
 0x233   :  { %2755 = vperm.xlu1 %3984, %v5323_v20   ;;  %2631 = vperm.xlu0 %3983, %v5323_v20  }
 0x234   :  { %2507 = vperm.xlu2 %3982, %v5323_v20  }
 0x237   :  { %v1264_v34 = vpop.permute.xlu2 %1263 }
 0x238   :  { %1295 = vst.msk [vmem:[#allocation5 + $0x10] sm:$0xff] %vm342_vm11, %v1264_v34 }
 0x23b   :  { %3985 = vset.pattern.permute.xlu1 %v7289_v24  ;;  %3987 = vset.pattern.permute.xlu0 %v7287_v11 }
 0x23c   :  { %3986 = vset.pattern.permute.xlu2 %v7285_v15  ;;  %1271 = vperm.xlu0 %3987, %v5366_v43  }
 0x23d   :  { %1147 = vperm.xlu2 %3986, %v5366_v43   ;;  %1019 = vperm.xlu1 %3985, %v5366_v43  }
 0x240   :  { %v1636_v14 = vpop.permute.xlu2 %1635 }
 0x241   :  { %1667 = vst.msk [vmem:[#allocation5 + $0x28] sm:$0xff] %vm342_vm11, %v1636_v14 }
 0x242   :  { %3718 = vmatmul.msk.bf16.gmra.mxu3 %vm342_vm11, %v5227_v13 }
 0x244   :  { %3990 = vset.pattern.permute.xlu0 %v7283_v37 }
 0x245   :  { %3989 = vset.pattern.permute.xlu2 %v7279_v40  ;;  %3988 = vset.pattern.permute.xlu1 %v7277_v46 }
 0x246   :  { %1643 = vperm.xlu0 %3990, %v5366_v43   ;;  %1519 = vperm.xlu2 %3989, %v5366_v43  }
 0x247   :  { %1395 = vperm.xlu1 %3988, %v5366_v43  }
 0x24a   :  { %v2008_v9 = vpop.permute.xlu2 %2007 }
 0x24b   :  { %2039 = vst.msk [vmem:[#allocation5 + $0x40] sm:$0xff] %vm342_vm11, %v2008_v9 }
 0x24e   :  { %3993 = vset.pattern.permute.xlu0 %v7275_v53  ;;  %3992 = vset.pattern.permute.xlu2 %v7269_v50 }
 0x24f   :  { %3991 = vset.pattern.permute.xlu1 %v7267_v55  ;;  %2015 = vperm.xlu0 %3993, %v5366_v43   ;;  %v1140_v13 = vpop.permute.xlu1 %1139 }
 0x250   :  { %1891 = vperm.xlu2 %3992, %v5366_v43   ;;  %1767 = vperm.xlu1 %3991, %v5366_v43   ;;  %1171 = vst.msk [vmem:[#allocation5 + $0x8] sm:$0xff] %vm342_vm11, %v1140_v13  ;;  %v1010_v39 = vpop.permute.xlu0 %1009 }
 0x251   :  { %1047 = vst.msk [vmem:[#allocation5] sm:$0xff] %vm342_vm11, %v1010_v39 }
 0x252   :  { %3719 = vmatmul.msk.bf16.gmra.mxu3 %vm342_vm11, %v5253_v58 }
 0x253   :  { %v2380_v42 = vpop.permute.xlu2 %2379 }
 0x254   :  { %2411 = vst.msk [vmem:[#allocation5 + $0x58] sm:$0xff] %vm342_vm11, %v2380_v42 }
 0x257   :  { %3996 = vset.pattern.permute.xlu0 %v7273_v51 }
 0x258   :  { %3995 = vset.pattern.permute.xlu2 %v7271_v38  ;;  %3994 = vset.pattern.permute.xlu1 %v7281_v60 }
 0x259   :  { %2387 = vperm.xlu0 %3996, %v5366_v43   ;;  %2263 = vperm.xlu2 %3995, %v5366_v43   ;;  %v1512_v44 = vpop.permute.xlu1 %1511  ;;  %v1388_v8 = vpop.permute.xlu0 %1387 }
 0x25a   :  { %2139 = vperm.xlu1 %3994, %v5366_v43   ;;  %1543 = vst.msk [vmem:[#allocation5 + $0x20] sm:$0xff] %vm342_vm11, %v1512_v44 }
 0x25b   :  { %1419 = vst.msk [vmem:[#allocation5 + $0x18] sm:$0xff] %vm342_vm11, %v1388_v8 }
 0x25d   :  { %v2752_v58 = vpop.permute.xlu2 %2751 }
 0x25e   :  { %2783 = vst.msk [vmem:[#allocation5 + $0x70] sm:$0xff] %vm342_vm11, %v2752_v58 }
 0x261   :  { %3999 = vset.pattern.permute.xlu0 %v7295_v2  ;;  %3998 = vset.pattern.permute.xlu2 %v7293_v57 }
 0x262   :  { %3997 = vset.pattern.permute.xlu1 %v7291_v47  ;;  %2759 = vperm.xlu0 %3999, %v5366_v43   ;;  %v1884_v61 = vpop.permute.xlu1 %1883 }
 0x263   :  { %2635 = vperm.xlu2 %3998, %v5366_v43   ;;  %2511 = vperm.xlu1 %3997, %v5366_v43   ;;  %1915 = vst.msk [vmem:[#allocation5 + $0x38] sm:$0xff] %vm342_vm11, %v1884_v61  ;;  %v1760_v12 = vpop.permute.xlu0 %1759 }
 0x264   :  { %3720 = vmatmul.msk.bf16.gmra.mxu3 %vm342_vm11, %v5277_v23  ;;  %1791 = vst.msk [vmem:[#allocation5 + $0x30] sm:$0xff] %vm342_vm11, %v1760_v12  ;;  %v5427_v23 = vld [vmem:[%s7258_s10] ss:$0 sm:$0xff] }
 0x265   :  { %v916_v12 = vld [vmem:[%s7259_s11] sm:$0xff] }
 0x267   :  { %v1015_v29 = vpop.permute.xlu2 %1014 }
 0x268   :  { %1048 = vst.msk [vmem:[#allocation5 + $0x80] sm:$0xff] %vm342_vm11, %v1015_v29 }
 0x26a   :  { %4000 = vset.pattern.permute.xlu0 %v7289_v24 }
 0x26b   :  { %4002 = vset.pattern.permute.xlu2 %v7287_v11  ;;  %4001 = vset.pattern.permute.xlu1 %v7285_v15 }
 0x26c   :  { %1275 = vperm.xlu2 %4002, %v5416_v16   ;;  %1151 = vperm.xlu1 %4001, %v5416_v16   ;;  %v2256_v30 = vpop.permute.xlu1 %2255  ;;  %v2132_v21 = vpop.permute.xlu0 %2131 }
 0x26d   :  { %1024 = vperm.xlu0 %4000, %v5416_v16   ;;  %2287 = vst.msk [vmem:[#allocation5 + $0x50] sm:$0xff] %vm342_vm11, %v2256_v30 }
 0x26e   :  { %2163 = vst.msk [vmem:[#allocation5 + $0x48] sm:$0xff] %vm342_vm11, %v2132_v21 }
 0x270   :  { %v710_v22 = vpop.f32.mrf.mxu3 }
 0x271   :  { %v1392_v26 = vpop.permute.xlu2 %1391  ;;  %v711_v28 = vadd.f32 %v5427_v23, %v710_v22  ;;  %v917_v22 = vld [vmem:[%s7259_s11 + $0x8] sm:$0xff] }
 0x272   :  { %1420 = vst.msk [vmem:[#allocation5 + $0x98] sm:$0xff] %vm342_vm11, %v1392_v26  ;;  %v5462_v26 = vperm.slane %v916_v12, 0  ;;  %v5510_v15 = vperm.slane %v917_v22, 3  ;;  %v5518_v47 = vperm.slane %v917_v22, 5 }
 0x273   :  { %v738_v17 = vmul.f32 1.442695, %v711_v28  ;;  %vm730_vm3 = vcmp.gt.f32.partialorder %v711_v28, 20.0 }
 0x274   :  { %4005 = vset.pattern.permute.xlu2 %v7283_v37  ;;  %4004 = vset.pattern.permute.xlu1 %v7279_v40 }
 0x275   :  { %4003 = vset.pattern.permute.xlu0 %v7277_v46  ;;  %1647 = vperm.xlu2 %4005, %v5416_v16   ;;  %4256 = vpow2.f32 %v738_v17  ;;  %v2628_v33 = vpop.permute.xlu1 %2627  ;;  %v5464_v17 = vperm.slane %v916_v12, 1 }
 0x276   :  { %1523 = vperm.xlu1 %4004, %v5416_v16   ;;  %1399 = vperm.xlu0 %4003, %v5416_v16   ;;  %2659 = vst.msk [vmem:[#allocation5 + $0x68] sm:$0xff] %vm342_vm11, %v2628_v33  ;;  %v2504_v34 = vpop.permute.xlu0 %2503  ;;  %v5466_v33 = vperm.slane %v916_v12, 2 }
 0x277   :  { %2535 = vst.msk [vmem:[#allocation5 + $0x60] sm:$0xff] %vm342_vm11, %v2504_v34 }
 0x278   :  { %v712_v14 = vpop.f32.mrf.mxu3 }
 0x279   :  { %v5441_v9 = vadd.f32 %v5427_v23, %v712_v14 }
 0x27a   :  { %v1764_v13 = vpop.permute.xlu2 %1763 }
 0x27b   :  { %v4257_v39 = vpop.eup %4256  ;;  %1792 = vst.msk [vmem:[#allocation5 + $0xb0] sm:$0xff] %vm342_vm11, %v1764_v13  ;;  %v740_v42 = vmul.f32 1.442695, %v5441_v9  ;;  %vm731_vm4 = vcmp.gt.f32.partialorder %v5441_v9, 20.0 }
 0x27c   :  { %v754_v44 = vadd.f32 1.0, %v4257_v39  ;;  %v5468_v39 = vperm.slane %v916_v12, 3 }
 0x27d   :  { %4008 = vset.pattern.permute.xlu2 %v7275_v53  ;;  %4258 = vpow2.f32 %v740_v42  ;;  %v5470_v42 = vperm.slane %v916_v12, 4 }
 0x27e   :  { %4260 = vlog2.f32 %v754_v44  ;;  %4007 = vset.pattern.permute.xlu1 %v7269_v50  ;;  %4006 = vset.pattern.permute.xlu0 %v7267_v55  ;;  %v1268_v8 = vpop.permute.xlu1 %1267  ;;  %v5472_v44 = vperm.slane %v916_v12, 5  ;;  %v5481_v55 = vperm.slane %v917_v22, 0 }
 0x27f   :  { %2019 = vperm.xlu2 %4008, %v5416_v16   ;;  %1895 = vperm.xlu1 %4007, %v5416_v16   ;;  %1296 = vst.msk [vmem:[#allocation5 + $0x90] sm:$0xff] %vm342_vm11, %v1268_v8  ;;  %v1144_v58 = vpop.permute.xlu0 %1143  ;;  %v5475_v8 = vperm.slane %v916_v12, 6 }
 0x280   :  { %1771 = vperm.xlu0 %4006, %v5416_v16   ;;  %1172 = vst.msk [vmem:[#allocation5 + $0x88] sm:$0xff] %vm342_vm11, %v1144_v58  ;;  %v715_v61 = vpop.f32.mrf.mxu3  ;;  %v5477_v58 = vperm.slane %v916_v12, 7 }
 0x281   :  { %v5457_v30 = vadd.f32 %v5427_v23, %v715_v61 }
 0x283   :  { %v4259_v29 = vpop.eup %4258  ;;  %vm732_vm5 = vcmp.gt.f32.partialorder %v5457_v30, 20.0 }
 0x284   :  { %v4261_v21 = vpop.eup %4260  ;;  %v755_v34 = vadd.f32 1.0, %v4259_v29  ;;  %v2136_v14 = vpop.permute.xlu2 %2135  ;;  %v5483_v29 = vperm.slane %v917_v22, 1 }
 0x285   :  { %v763_v13 = vmul.f32 0.6931472, %v4261_v21  ;;  %2164 = vst.msk [vmem:[#allocation5 + $0xc8] sm:$0xff] %vm342_vm11, %v2136_v14  ;;  %v742_v21 = vmul.f32 1.442695, %v5457_v30 }
 0x286   :  { %4262 = vlog2.f32 %v755_v34 }
 0x287   :  { %v5479_v61 = vsel %vm730_vm3, %v711_v28, %v763_v13  ;;  %4011 = vset.pattern.permute.xlu2 %v7273_v51  ;;  %4010 = vset.pattern.permute.xlu1 %v7271_v38  ;;  %v5501_v51 = vperm.slane %v917_v22, 2  ;;  %4264 = vpow2.f32 %v742_v21 }
 0x288   :  { %v919_v14 = vmul.f32 %v5462_v26, %v5479_v61  ;;  %v1056_v50 = vmul.f32 %v5464_v17, %v5479_v61  ;;  %v1180_v28 = vmul.f32 %v5466_v33, %v5479_v61  ;;  %4009 = vset.pattern.permute.xlu0 %v7281_v60  ;;  %v1304_v12 = vmul.f32 %v5468_v39, %v5479_v61 }
 0x289   :  { %v1428_v13 = vmul.f32 %v5470_v42, %v5479_v61  ;;  %v1552_v38 = vmul.f32 %v5472_v44, %v5479_v61  ;;  %2391 = vperm.xlu2 %4011, %v5416_v16   ;;  %v1676_v34 = vmul.f32 %v5475_v8, %v5479_v61  ;;  %2267 = vperm.xlu1 %4010, %v5416_v16  }
 0x28a   :  { %v927_v53 = vmul.f32 1.442695, %v919_v14  ;;  %v1064_v46 = vmul.f32 1.442695, %v1056_v50  ;;  %v1188_v40 = vmul.f32 1.442695, %v1180_v28  ;;  %2143 = vperm.xlu0 %4009, %v5416_v16   ;;  %v1800_v37 = vmul.f32 %v5477_v58, %v5479_v61 }
 0x28b   :  { %v1312_v60 = vmul.f32 1.442695, %v1304_v12  ;;  %v1436_v11 = vmul.f32 1.442695, %v1428_v13  ;;  %v1924_v50 = vmul.f32 %v5481_v55, %v5479_v61  ;;  %v5514_v14 = vperm.slane %v917_v22, 4 }
 0x28c   :  { %4266 = vpow2.f32 %v927_v53  ;;  %v1560_v28 = vmul.f32 1.442695, %v1552_v38  ;;  %v2048_v24 = vmul.f32 %v5483_v29, %v5479_v61  ;;  %v4263_v12 = vpop.eup %4262  ;;  %v1684_v57 = vmul.f32 1.442695, %v1676_v34 }
 0x28d   :  { %4268 = vpow2.f32 %v1064_v46  ;;  %v2172_v21 = vmul.f32 %v5501_v51, %v5479_v61  ;;  %v5522_v53 = vperm.slane %v917_v22, 6  ;;  %v1808_v13 = vmul.f32 1.442695, %v1800_v37  ;;  %v5530_v18 = vpop.eup %4264 }
 0x28e   :  { %4270 = vpow2.f32 %v1188_v40  ;;  %v2296_v2 = vmul.f32 %v5510_v15, %v5479_v61  ;;  %v5526_v46 = vperm.slane %v917_v22, 7  ;;  %v1932_v38 = vmul.f32 1.442695, %v1924_v50 }
 0x28f   :  { %4272 = vpow2.f32 %v1312_v60  ;;  %v2420_v32 = vmul.f32 %v5514_v14, %v5479_v61  ;;  %v2056_v40 = vmul.f32 1.442695, %v2048_v24  ;;  %v2544_v34 = vmul.f32 %v5518_v47, %v5479_v61 }
 0x290   :  { %4274 = vpow2.f32 %v1436_v11  ;;  %v765_v19 = vmul.f32 0.6931472, %v4263_v12  ;;  %v7357_v60 = vmov 14   ;;  %v2180_v10 = vmul.f32 1.442695, %v2172_v21 }
 0x291   :  { %4276 = vpow2.f32 %v1560_v28  ;;  %4014 = vset.pattern.permute.xlu2 %v7357_v60  ;;  %v2668_v11 = vmul.f32 %v5522_v53, %v5479_v61  ;;  %v7358_v22 = vmov 13   ;;  %v7359_v50 = vmov 12  }
 0x292   :  { %v4267_v37 = vpop.eup %4266  ;;  %4278 = vpow2.f32 %v1684_v57  ;;  %4013 = vset.pattern.permute.xlu1 %v7358_v22  ;;  %4012 = vset.pattern.permute.xlu0 %v7359_v50  ;;  %v2304_v24 = vmul.f32 1.442695, %v2296_v2  ;;  %v2792_v12 = vmul.f32 %v5526_v46, %v5479_v61  ;;  %v5544_v57 = vsel %vm731_vm4, %v5441_v9, %v765_v19 }
 0x293   :  { %v4269_v28 = vpop.eup %4268  ;;  %943 = vst.msk [vmem:[#allocation3] sm:$0xff] %vm342_vm11, %v4267_v37  ;;  %4280 = vpow2.f32 %v1808_v13  ;;  %2763 = vperm.xlu2 %4014, %v5416_v16   ;;  %2639 = vperm.xlu1 %4013, %v5416_v16   ;;  %v2428_v4 = vmul.f32 1.442695, %v2420_v32  ;;  %v920_v37 = vmul.f32 %v5462_v26, %v5544_v57  ;;  %v2552_v19 = vmul.f32 1.442695, %v2544_v34 }
 0x294   :  { %v4271_v21 = vpop.eup %4270  ;;  %1081 = vst.msk [vmem:[#allocation3 + $0x8] sm:$0xff] %vm342_vm11, %v4269_v28  ;;  %4282 = vpow2.f32 %v1932_v38  ;;  %2515 = vperm.xlu0 %4012, %v5416_v16   ;;  %v1057_v9 = vmul.f32 %v5464_v17, %v5544_v57  ;;  %v2676_v28 = vmul.f32 1.442695, %v2668_v11  ;;  %v1181_v32 = vmul.f32 %v5466_v33, %v5544_v57 }
 0x295   :  { %v4273_v2 = vpop.eup %4272  ;;  %1205 = vst.msk [vmem:[#allocation3 + $0x10] sm:$0xff] %vm342_vm11, %v4271_v21  ;;  %4284 = vpow2.f32 %v2056_v40  ;;  %v2800_v6 = vmul.f32 1.442695, %v2792_v12  ;;  %v1305_v40 = vmul.f32 %v5468_v39, %v5544_v57  ;;  %v929_v21 = vmul.f32 1.442695, %v920_v37 }
 0x296   :  { %v4275_v13 = vpop.eup %4274  ;;  %1329 = vst.msk [vmem:[#allocation3 + $0x18] sm:$0xff] %vm342_vm11, %v4273_v2  ;;  %4286 = vpow2.f32 %v2180_v10  ;;  %v1429_v10 = vmul.f32 %v5470_v42, %v5544_v57  ;;  %v1066_v2 = vmul.f32 1.442695, %v1057_v9  ;;  %v7361_v9 = vmov 0  }
 0x297   :  { %v4277_v38 = vpop.eup %4276  ;;  %1453 = vst.msk [vmem:[#allocation3 + $0x20] sm:$0xff] %vm342_vm11, %v4275_v13  ;;  %4288 = vpow2.f32 %v2304_v24  ;;  %v1553_v24 = vmul.f32 %v5472_v44, %v5544_v57  ;;  %v1190_v13 = vmul.f32 1.442695, %v1181_v32  ;;  %v1925_v32 = vmul.f32 %v5481_v55, %v5544_v57 }
 0x298   :  { %v4279_v34 = vpop.eup %4278  ;;  %1577 = vst.msk [vmem:[#allocation3 + $0x28] sm:$0xff] %vm342_vm11, %v4277_v38  ;;  %4290 = vpow2.f32 %v2428_v4  ;;  %v1677_v4 = vmul.f32 %v5475_v8, %v5544_v57  ;;  %v5570_v38 = vpop.f32.mrf.mxu0 }
 0x299   :  { %v4281_v11 = vpop.eup %4280  ;;  %1701 = vst.msk [vmem:[#allocation3 + $0x30] sm:$0xff] %vm342_vm11, %v4279_v34  ;;  %4292 = vpow2.f32 %v2552_v19  ;;  %v1314_v34 = vmul.f32 1.442695, %v1305_v40  ;;  %v1801_v19 = vmul.f32 %v5477_v58, %v5544_v57  ;;  %v1562_v40 = vmul.f32 1.442695, %v1553_v24 }
 0x29a   :  { %v4283_v12 = vpop.eup %4282  ;;  %1825 = vst.msk [vmem:[#allocation3 + $0x38] sm:$0xff] %vm342_vm11, %v4281_v11  ;;  %4294 = vpow2.f32 %v2676_v28  ;;  %v1438_v28 = vmul.f32 1.442695, %v1429_v10  ;;  %v1686_v10 = vmul.f32 1.442695, %v1677_v4  ;;  %v2297_v24 = vmul.f32 %v5510_v15, %v5544_v57 }
 0x29b   :  { %v4285_v37 = vpop.eup %4284  ;;  %7360 = vst [vmem:[#allocation35_spill] sm:$0xff] %v5570_v38  ;;  %4296 = vpow2.f32 %v2800_v6  ;;  %4015 = vset.pattern.permute.xlu2 %v7361_v9  ;;  %4017 = vset.pattern.permute.xlu1 %v7362_v1  ;;  %v1934_v27 = vmul.f32 1.442695, %v1925_v32 }
 0x29c   :  { %1949 = vst.msk [vmem:[#allocation3 + $0x40] sm:$0xff] %vm342_vm11, %v4283_v12  ;;  %v4287_v11 = vpop.eup %4286  ;;  %4298 = vpow2.f32 %v929_v21  ;;  %4016 = vset.pattern.permute.xlu0 %v7363_v5  ;;  %1279 = vperm.xlu1 %4017, %v5570_v38   ;;  %v2049_v12 = vmul.f32 %v5483_v29, %v5544_v57  ;;  %v2306_v32 = vmul.f32 1.442695, %v2297_v24 }
 0x29d   :  { %2073 = vst.msk [vmem:[#allocation3 + $0x48] sm:$0xff] %vm342_vm11, %v4285_v37  ;;  %v4289_v6 = vpop.eup %4288  ;;  %4300 = vpow2.f32 %v1066_v2  ;;  %1155 = vperm.xlu0 %4016, %v5570_v38   ;;  %1029 = vperm.xlu2 %4015, %v5570_v38   ;;  %v2173_v37 = vmul.f32 %v5501_v51, %v5544_v57  ;;  %v1810_v2 = vmul.f32 1.442695, %v1801_v19 }
 0x29e   :  { %2197 = vst.msk [vmem:[#allocation3 + $0x50] sm:$0xff] %vm342_vm11, %v4287_v11  ;;  %v4291_v21 = vpop.eup %4290  ;;  %4302 = vpow2.f32 %v1190_v13  ;;  %v2421_v13 = vmul.f32 %v5514_v14, %v5544_v57 }
 0x29f   :  { %2321 = vst.msk [vmem:[#allocation3 + $0x58] sm:$0xff] %vm342_vm11, %v4289_v6  ;;  %v4293_v0 = vpop.eup %4292  ;;  %4304 = vpow2.f32 %v1314_v34  ;;  %v2058_v6 = vmul.f32 1.442695, %v2049_v12  ;;  %v2545_v34 = vmul.f32 %v5518_v47, %v5544_v57 }
 0x2a0   :  { %2445 = vst.msk [vmem:[#allocation3 + $0x60] sm:$0xff] %vm342_vm11, %v4291_v21  ;;  %v4295_v11 = vpop.eup %4294  ;;  %4306 = vpow2.f32 %v1438_v28  ;;  %v2182_v21 = vmul.f32 1.442695, %v2173_v37 }
 0x2a1   :  { %2569 = vst.msk [vmem:[#allocation3 + $0x68] sm:$0xff] %vm342_vm11, %v4293_v0  ;;  %v4297_v4 = vpop.eup %4296  ;;  %4308 = vpow2.f32 %v1562_v40  ;;  %v2669_v0 = vmul.f32 %v5522_v53, %v5544_v57  ;;  %v2793_v40 = vmul.f32 %v5526_v46, %v5544_v57  ;;  %v2554_v37 = vmul.f32 1.442695, %v2545_v34 }
 0x2a2   :  { %2693 = vst.msk [vmem:[#allocation3 + $0x70] sm:$0xff] %vm342_vm11, %v4295_v11  ;;  %v4299_v19 = vpop.eup %4298  ;;  %4310 = vpow2.f32 %v1686_v10  ;;  %v2430_v11 = vmul.f32 1.442695, %v2421_v13  ;;  %v756_v34 = vadd.f32 1.0, %v5530_v18 }
 0x2a3   :  { %2817 = vst.msk [vmem:[#allocation3 + $0x78] sm:$0xff] %vm342_vm11, %v4297_v4  ;;  %v4301_v28 = vpop.eup %4300  ;;  %4312 = vpow2.f32 %v1810_v2  ;;  %v7365_v4 = vmov 4   ;;  %v2678_v24 = vmul.f32 1.442695, %v2669_v0  ;;  %v2802_v13 = vmul.f32 1.442695, %v2793_v40 }
 0x2a4   :  { %944 = vst.msk [vmem:[#allocation3 + $0x80] sm:$0xff] %vm342_vm11, %v4299_v19  ;;  %v4303_v12 = vpop.eup %4302  ;;  %4314 = vpow2.f32 %v1934_v27  ;;  %4020 = vset.pattern.permute.xlu1 %v7364_v59  ;;  %v7366_v19 = vmov 3  }
 0x2a5   :  { %1082 = vst.msk [vmem:[#allocation3 + $0x88] sm:$0xff] %vm342_vm11, %v4301_v28  ;;  %v4305_v10 = vpop.eup %4304  ;;  %4316 = vpow2.f32 %v2058_v6  ;;  %4019 = vset.pattern.permute.xlu0 %v7365_v4  ;;  %4018 = vset.pattern.permute.xlu2 %v7366_v19 }
 0x2a6   :  { %1206 = vst.msk [vmem:[#allocation3 + $0x90] sm:$0xff] %vm342_vm11, %v4303_v12  ;;  %v4307_v2 = vpop.eup %4306  ;;  %4318 = vpow2.f32 %v2182_v21  ;;  %1651 = vperm.xlu1 %4020, %v5570_v38   ;;  %1527 = vperm.xlu0 %4019, %v5570_v38   ;;  %v1640_v21 = vpop.permute.xlu1 %1639 }
 0x2a7   :  { %1330 = vst.msk [vmem:[#allocation3 + $0x98] sm:$0xff] %vm342_vm11, %v4305_v10  ;;  %v4309_v27 = vpop.eup %4308  ;;  %4320 = vpow2.f32 %v2306_v32  ;;  %1403 = vperm.xlu2 %4018, %v5570_v38   ;;  %v1516_v12 = vpop.permute.xlu0 %1515 }
 0x2a8   :  { %1454 = vst.msk [vmem:[#allocation3 + $0xa0] sm:$0xff] %vm342_vm11, %v4307_v2  ;;  %v4311_v6 = vpop.eup %4310  ;;  %4322 = vpow2.f32 %v2430_v11  ;;  %v717_v10 = vpop.f32.mrf.mxu3  ;;  %v7368_v2 = vmov 7  }
 0x2a9   :  { %1578 = vst.msk [vmem:[#allocation3 + $0xa8] sm:$0xff] %vm342_vm11, %v4309_v27  ;;  %v4313_v28 = vpop.eup %4312  ;;  %4324 = vpow2.f32 %v2554_v37  ;;  %v7367_v37 = vmov 8   ;;  %v7369_v27 = vmov 6  }
 0x2aa   :  { %1702 = vst.msk [vmem:[#allocation3 + $0xb0] sm:$0xff] %vm342_vm11, %v4311_v6  ;;  %v4315_v0 = vpop.eup %4314  ;;  %4326 = vpow2.f32 %v2678_v24 }
 0x2ab   :  { %1826 = vst.msk [vmem:[#allocation3 + $0xb8] sm:$0xff] %vm342_vm11, %v4313_v28  ;;  %v4317_v32 = vpop.eup %4316  ;;  %4328 = vpow2.f32 %v2802_v13 }
 0x2ac   :  { %1950 = vst.msk [vmem:[#allocation3 + $0xc0] sm:$0xff] %vm342_vm11, %v4315_v0  ;;  %v4319_v40 = vpop.eup %4318  ;;  %4330 = vlog2.f32 %v756_v34  ;;  %v5633_v34 = vadd.f32 %v5427_v23, %v717_v10  ;;  %v2508_v0 = vpop.permute.xlu2 %2507 }
 0x2ad   :  { %2074 = vst.msk [vmem:[#allocation3 + $0xc8] sm:$0xff] %vm342_vm11, %v4317_v32  ;;  %v4321_v11 = vpop.eup %4320 }
 0x2ae   :  { %2198 = vst.msk [vmem:[#allocation3 + $0xd0] sm:$0xff] %vm342_vm11, %v4319_v40  ;;  %v4323_v18 = vpop.eup %4322  ;;  %4023 = vset.pattern.permute.xlu1 %v7367_v37  ;;  %4022 = vset.pattern.permute.xlu0 %v7368_v2  ;;  %v2012_v40 = vpop.permute.xlu1 %2011  ;;  %vm733_vm6 = vcmp.gt.f32.partialorder %v5633_v34, 20.0 }
 0x2af   :  { %2322 = vst.msk [vmem:[#allocation3 + $0xd8] sm:$0xff] %vm342_vm11, %v4321_v11  ;;  %v4325_v24 = vpop.eup %4324  ;;  %4021 = vset.pattern.permute.xlu2 %v7369_v27  ;;  %2023 = vperm.xlu1 %4023, %v5570_v38   ;;  %v1888_v11 = vpop.permute.xlu0 %1887 }
 0x2b0   :  { %2446 = vst.msk [vmem:[#allocation3 + $0xe0] sm:$0xff] %vm342_vm11, %v4323_v18  ;;  %v4327_v13 = vpop.eup %4326  ;;  %1899 = vperm.xlu0 %4022, %v5570_v38   ;;  %1775 = vperm.xlu2 %4021, %v5570_v38  }
 0x2b1   :  { %2570 = vst.msk [vmem:[#allocation3 + $0xe8] sm:$0xff] %vm342_vm11, %v4325_v24  ;;  %v4329_v6 = vpop.eup %4328  ;;  %v744_v24 = vmul.f32 1.442695, %v5633_v34 }
 0x2b2   :  { %2694 = vst.msk [vmem:[#allocation3 + $0xf0] sm:$0xff] %vm342_vm11, %v4327_v13  ;;  %v4331_v28 = vpop.eup %4330 }
 0x2b3   :  { %2818 = vst.msk [vmem:[#allocation3 + $0xf8] sm:$0xff] %vm342_vm11, %v4329_v6  ;;  %v767_v32 = vmul.f32 0.6931472, %v4331_v28  ;;  %4332 = vpow2.f32 %v744_v24 }
 0x2b4   :  { %1668 = vst.msk [vmem:[#allocation5 + $0xa8] sm:$0xff] %vm342_vm11, %v1640_v21 }
 0x2b5   :  { %1544 = vst.msk [vmem:[#allocation5 + $0xa0] sm:$0xff] %vm342_vm11, %v1516_v12  ;;  %v5640_v18 = vsel %vm732_vm5, %v5457_v30, %v767_v32 }
 0x2b6   :  { %2536 = vst.msk [vmem:[#allocation5 + $0xe0] sm:$0xff] %vm342_vm11, %v2508_v0  ;;  %v921_v10 = vmul.f32 %v5462_v26, %v5640_v18  ;;  %v1058_v13 = vmul.f32 %v5464_v17, %v5640_v18  ;;  %v1182_v21 = vmul.f32 %v5466_v33, %v5640_v18  ;;  %v1306_v12 = vmul.f32 %v5468_v39, %v5640_v18 }
 0x2b7   :  { %2040 = vst.msk [vmem:[#allocation5 + $0xc0] sm:$0xff] %vm342_vm11, %v2012_v40  ;;  %v1430_v30 = vmul.f32 %v5470_v42, %v5640_v18  ;;  %v1554_v6 = vmul.f32 %v5472_v44, %v5640_v18  ;;  %v1678_v3 = vmul.f32 %v5475_v8, %v5640_v18  ;;  %4026 = vset.pattern.permute.xlu1 %v7370_v54  ;;  %v7371_v40 = vmov 10  }
 0x2b8   :  { %1916 = vst.msk [vmem:[#allocation5 + $0xb8] sm:$0xff] %vm342_vm11, %v1888_v11  ;;  %v931_v28 = vmul.f32 1.442695, %v921_v10  ;;  %v1068_v0 = vmul.f32 1.442695, %v1058_v13  ;;  %4025 = vset.pattern.permute.xlu0 %v7371_v40  ;;  %v1802_v25 = vmul.f32 %v5477_v58, %v5640_v18  ;;  %4024 = vset.pattern.permute.xlu2 %v7372_v52  ;;  %v1926_v10 = vmul.f32 %v5481_v55, %v5640_v18 }
 0x2b9   :  { %v1192_v32 = vmul.f32 1.442695, %v1182_v21  ;;  %v1316_v48 = vmul.f32 1.442695, %v1306_v12  ;;  %2395 = vperm.xlu1 %4026, %v5570_v38   ;;  %v1440_v11 = vmul.f32 1.442695, %v1430_v30  ;;  %2271 = vperm.xlu0 %4025, %v5570_v38   ;;  %v2050_v21 = vmul.f32 %v5483_v29, %v5640_v18 }
 0x2ba   :  { %4334 = vpow2.f32 %v931_v28  ;;  %2147 = vperm.xlu2 %4024, %v5570_v38   ;;  %v1564_v13 = vmul.f32 1.442695, %v1554_v6  ;;  %v1688_v24 = vmul.f32 1.442695, %v1678_v3  ;;  %v2174_v12 = vmul.f32 %v5501_v51, %v5640_v18 }
 0x2bb   :  { %4336 = vpow2.f32 %v1068_v0  ;;  %v1812_v28 = vmul.f32 1.442695, %v1802_v25  ;;  %v2298_v30 = vmul.f32 %v5510_v15, %v5640_v18  ;;  %v1936_v41 = vmul.f32 1.442695, %v1926_v10  ;;  %v4333_v0 = vpop.eup %4332 }
 0x2bc   :  { %4338 = vpow2.f32 %v1192_v32  ;;  %v2422_v20 = vmul.f32 %v5514_v14, %v5640_v18  ;;  %v2060_v6 = vmul.f32 1.442695, %v2050_v21  ;;  %v2546_v32 = vmul.f32 %v5518_v47, %v5640_v18 }
 0x2bd   :  { %4340 = vpow2.f32 %v1316_v48  ;;  %v2184_v43 = vmul.f32 1.442695, %v2174_v12  ;;  %v2670_v25 = vmul.f32 %v5522_v53, %v5640_v18  ;;  %v2794_v10 = vmul.f32 %v5526_v46, %v5640_v18 }
 0x2be   :  { %4342 = vpow2.f32 %v1440_v11  ;;  %v2308_v11 = vmul.f32 1.442695, %v2298_v30  ;;  %v2432_v21 = vmul.f32 1.442695, %v2422_v20  ;;  %v2556_v12 = vmul.f32 1.442695, %v2546_v32 }
 0x2bf   :  { %4344 = vpow2.f32 %v1564_v13  ;;  %v2680_v30 = vmul.f32 1.442695, %v2670_v25  ;;  %v2804_v20 = vmul.f32 1.442695, %v2794_v10  ;;  %v5700_v10 = vpop.f32.mrf.mxu0 }
 0x2c0   :  { %v4335_v3 = vpop.eup %4334  ;;  %4346 = vpow2.f32 %v1688_v24  ;;  %7373 = vst [vmem:[#allocation36_spill] sm:$0xff] %v5700_v10 }
 0x2c1   :  { %v4337_v48 = vpop.eup %4336  ;;  %945 = vst.msk [vmem:[#allocation3 + $0x100] sm:$0xff] %vm342_vm11, %v4335_v3  ;;  %4348 = vpow2.f32 %v1812_v28  ;;  %4029 = vset.pattern.permute.xlu1 %v7357_v60  ;;  %4028 = vset.pattern.permute.xlu0 %v7358_v22 }
 0x2c2   :  { %v4339_v13 = vpop.eup %4338  ;;  %1083 = vst.msk [vmem:[#allocation3 + $0x108] sm:$0xff] %vm342_vm11, %v4337_v48  ;;  %4350 = vpow2.f32 %v1936_v41  ;;  %4027 = vset.pattern.permute.xlu2 %v7359_v50  ;;  %2767 = vperm.xlu1 %4029, %v5570_v38  }
 0x2c3   :  { %v4341_v24 = vpop.eup %4340  ;;  %1207 = vst.msk [vmem:[#allocation3 + $0x110] sm:$0xff] %vm342_vm11, %v4339_v13  ;;  %4352 = vpow2.f32 %v2060_v6  ;;  %2643 = vperm.xlu0 %4028, %v5570_v38   ;;  %2519 = vperm.xlu2 %4027, %v5570_v38   ;;  %v757_v6 = vadd.f32 1.0, %v4333_v0  ;;  %v720_v13 = vpop.f32.mrf.mxu3 }
 0x2c4   :  { %v4343_v28 = vpop.eup %4342  ;;  %1331 = vst.msk [vmem:[#allocation3 + $0x118] sm:$0xff] %vm342_vm11, %v4341_v24  ;;  %4354 = vpow2.f32 %v2184_v43 }
 0x2c5   :  { %v4345_v41 = vpop.eup %4344  ;;  %1455 = vst.msk [vmem:[#allocation3 + $0x120] sm:$0xff] %vm342_vm11, %v4343_v28  ;;  %4356 = vpow2.f32 %v2308_v11 }
 0x2c6   :  { %v4347_v3 = vpop.eup %4346  ;;  %1579 = vst.msk [vmem:[#allocation3 + $0x128] sm:$0xff] %vm342_vm11, %v4345_v41  ;;  %4358 = vpow2.f32 %v2432_v21 }
 0x2c7   :  { %v4349_v32 = vpop.eup %4348  ;;  %1703 = vst.msk [vmem:[#allocation3 + $0x130] sm:$0xff] %vm342_vm11, %v4347_v3  ;;  %4360 = vpow2.f32 %v2556_v12  ;;  %v1148_v12 = vpop.permute.xlu2 %1147 }
 0x2c8   :  { %v4351_v48 = vpop.eup %4350  ;;  %1827 = vst.msk [vmem:[#allocation3 + $0x138] sm:$0xff] %vm342_vm11, %v4349_v32  ;;  %4362 = vpow2.f32 %v2680_v30  ;;  %v5714_v30 = vadd.f32 %v5427_v23, %v720_v13  ;;  %v2260_v3 = vpop.permute.xlu0 %2259 }
 0x2c9   :  { %v4353_v43 = vpop.eup %4352  ;;  %1951 = vst.msk [vmem:[#allocation3 + $0x140] sm:$0xff] %vm342_vm11, %v4351_v48  ;;  %4364 = vpow2.f32 %v2804_v20  ;;  %v2384_v20 = vpop.permute.xlu1 %2383 }
 0x2ca   :  { %v4355_v25 = vpop.eup %4354  ;;  %2075 = vst.msk [vmem:[#allocation3 + $0x148] sm:$0xff] %vm342_vm11, %v4353_v43  ;;  %4366 = vlog2.f32 %v757_v6  ;;  %4030 = vset.pattern.permute.xlu1 %v7361_v9  ;;  %v746_v48 = vmul.f32 1.442695, %v5714_v30  ;;  %vm734_vm7 = vcmp.gt.f32.partialorder %v5714_v30, 20.0 }
 0x2cb   :  { %v4357_v11 = vpop.eup %4356  ;;  %2199 = vst.msk [vmem:[#allocation3 + $0x150] sm:$0xff] %vm342_vm11, %v4355_v25  ;;  %4032 = vset.pattern.permute.xlu0 %v7362_v1  ;;  %4031 = vset.pattern.permute.xlu2 %v7363_v5 }
 0x2cc   :  { %v4359_v0 = vpop.eup %4358  ;;  %2323 = vst.msk [vmem:[#allocation3 + $0x158] sm:$0xff] %vm342_vm11, %v4357_v11  ;;  %1283 = vperm.xlu0 %4032, %v5700_v10   ;;  %1159 = vperm.xlu2 %4031, %v5700_v10   ;;  %4368 = vpow2.f32 %v746_v48 }
 0x2cd   :  { %v4361_v21 = vpop.eup %4360  ;;  %2447 = vst.msk [vmem:[#allocation3 + $0x160] sm:$0xff] %vm342_vm11, %v4359_v0  ;;  %1034 = vperm.xlu1 %4030, %v5700_v10  }
 0x2ce   :  { %v4363_v24 = vpop.eup %4362  ;;  %2571 = vst.msk [vmem:[#allocation3 + $0x168] sm:$0xff] %vm342_vm11, %v4361_v21 }
 0x2cf   :  { %v4365_v28 = vpop.eup %4364  ;;  %2695 = vst.msk [vmem:[#allocation3 + $0x170] sm:$0xff] %vm342_vm11, %v4363_v24 }
 0x2d0   :  { %v4367_v41 = vpop.eup %4366  ;;  %2819 = vst.msk [vmem:[#allocation3 + $0x178] sm:$0xff] %vm342_vm11, %v4365_v28 }
 0x2d1   :  { %v769_v6 = vmul.f32 0.6931472, %v4367_v41  ;;  %1173 = vst.msk [vmem:[#allocation5 + $0x108] sm:$0xff] %vm342_vm11, %v1148_v12 }
 0x2d2   :  { %2412 = vst.msk [vmem:[#allocation5 + $0xd8] sm:$0xff] %vm342_vm11, %v2384_v20 }
 0x2d3   :  { %v5721_v32 = vsel %vm733_vm6, %v5633_v34, %v769_v6  ;;  %2288 = vst.msk [vmem:[#allocation5 + $0xd0] sm:$0xff] %vm342_vm11, %v2260_v3 }
 0x2d4   :  { %v922_v43 = vmul.f32 %v5462_v26, %v5721_v32  ;;  %v1059_v25 = vmul.f32 %v5464_v17, %v5721_v32  ;;  %v1183_v11 = vmul.f32 %v5466_v33, %v5721_v32  ;;  %4035 = vset.pattern.permute.xlu0 %v7364_v59  ;;  %v1307_v0 = vmul.f32 %v5468_v39, %v5721_v32 }
 0x2d5   :  { %v1431_v34 = vmul.f32 %v5470_v42, %v5721_v32  ;;  %v1555_v13 = vmul.f32 %v5472_v44, %v5721_v32  ;;  %4034 = vset.pattern.permute.xlu2 %v7365_v4  ;;  %v1679_v28 = vmul.f32 %v5475_v8, %v5721_v32  ;;  %4033 = vset.pattern.permute.xlu1 %v7366_v19 }
 0x2d6   :  { %v933_v21 = vmul.f32 1.442695, %v922_v43  ;;  %v1070_v24 = vmul.f32 1.442695, %v1059_v25  ;;  %v1194_v12 = vmul.f32 1.442695, %v1183_v11  ;;  %1655 = vperm.xlu0 %4035, %v5700_v10   ;;  %v1803_v20 = vmul.f32 %v5477_v58, %v5721_v32  ;;  %1531 = vperm.xlu2 %4034, %v5700_v10  }
 0x2d7   :  { %v1318_v41 = vmul.f32 1.442695, %v1307_v0  ;;  %1407 = vperm.xlu1 %4033, %v5700_v10   ;;  %v1442_v3 = vmul.f32 1.442695, %v1431_v34  ;;  %v1927_v6 = vmul.f32 %v5481_v55, %v5721_v32  ;;  %v1566_v43 = vmul.f32 1.442695, %v1555_v13 }
 0x2d8   :  { %4370 = vpow2.f32 %v933_v21  ;;  %v2051_v25 = vmul.f32 %v5483_v29, %v5721_v32  ;;  %v1690_v11 = vmul.f32 1.442695, %v1679_v28  ;;  %v2175_v0 = vmul.f32 %v5501_v51, %v5721_v32 }
 0x2d9   :  { %4372 = vpow2.f32 %v1070_v24  ;;  %v1814_v48 = vmul.f32 1.442695, %v1803_v20  ;;  %v2299_v38 = vmul.f32 %v5510_v15, %v5721_v32  ;;  %v1938_v34 = vmul.f32 1.442695, %v1927_v6  ;;  %v4369_v24 = vpop.eup %4368 }
 0x2da   :  { %4374 = vpow2.f32 %v1194_v12  ;;  %v2423_v21 = vmul.f32 %v5514_v14, %v5721_v32  ;;  %v2062_v13 = vmul.f32 1.442695, %v2051_v25  ;;  %v2547_v12 = vmul.f32 %v5518_v47, %v5721_v32 }
 0x2db   :  { %4376 = vpow2.f32 %v1318_v41  ;;  %v2186_v31 = vmul.f32 1.442695, %v2175_v0  ;;  %v2671_v41 = vmul.f32 %v5522_v53, %v5721_v32  ;;  %v2795_v6 = vmul.f32 %v5526_v46, %v5721_v32 }
 0x2dc   :  { %4378 = vpow2.f32 %v1442_v3  ;;  %v2310_v3 = vmul.f32 1.442695, %v2299_v38  ;;  %v2434_v25 = vmul.f32 1.442695, %v2423_v21  ;;  %v2558_v38 = vmul.f32 1.442695, %v2547_v12 }
 0x2dd   :  { %4380 = vpow2.f32 %v1566_v43 }
 0x2de   :  { %v4371_v28 = vpop.eup %4370  ;;  %4382 = vpow2.f32 %v1690_v11  ;;  %4038 = vset.pattern.permute.xlu0 %v7367_v37  ;;  %4037 = vset.pattern.permute.xlu2 %v7368_v2 }
 0x2df   :  { %v4373_v20 = vpop.eup %4372  ;;  %946 = vst.msk [vmem:[#allocation3 + $0x180] sm:$0xff] %vm342_vm11, %v4371_v28  ;;  %4384 = vpow2.f32 %v1814_v48  ;;  %4036 = vset.pattern.permute.xlu1 %v7369_v27  ;;  %2027 = vperm.xlu0 %4038, %v5700_v10   ;;  %v2682_v48 = vmul.f32 1.442695, %v2671_v41 }
 0x2e0   :  { %v4375_v43 = vpop.eup %4374  ;;  %1084 = vst.msk [vmem:[#allocation3 + $0x188] sm:$0xff] %vm342_vm11, %v4373_v20  ;;  %4386 = vpow2.f32 %v1938_v34  ;;  %1903 = vperm.xlu2 %4037, %v5700_v10   ;;  %1779 = vperm.xlu1 %4036, %v5700_v10   ;;  %v2806_v34 = vmul.f32 1.442695, %v2795_v6  ;;  %v758_v20 = vadd.f32 1.0, %v4369_v24 }
 0x2e1   :  { %v4377_v11 = vpop.eup %4376  ;;  %1208 = vst.msk [vmem:[#allocation3 + $0x190] sm:$0xff] %vm342_vm11, %v4375_v43  ;;  %4388 = vpow2.f32 %v2062_v13 }
 0x2e2   :  { %v4379_v0 = vpop.eup %4378  ;;  %1332 = vst.msk [vmem:[#allocation3 + $0x198] sm:$0xff] %vm342_vm11, %v4377_v11  ;;  %4390 = vpow2.f32 %v2186_v31  ;;  %v1520_v11 = vpop.permute.xlu2 %1519 }
 0x2e3   :  { %v4381_v28 = vpop.eup %4380  ;;  %1456 = vst.msk [vmem:[#allocation3 + $0x1a0] sm:$0xff] %vm342_vm11, %v4379_v0  ;;  %4392 = vpow2.f32 %v2310_v3  ;;  %v722_v3 = vpop.f32.mrf.mxu3 }
 0x2e4   :  { %v4383_v21 = vpop.eup %4382  ;;  %1580 = vst.msk [vmem:[#allocation3 + $0x1a8] sm:$0xff] %vm342_vm11, %v4381_v28  ;;  %4394 = vpow2.f32 %v2434_v25  ;;  %v5791_v0 = vadd.f32 %v5427_v23, %v722_v3 }
 0x2e5   :  { %v4385_v43 = vpop.eup %4384  ;;  %1704 = vst.msk [vmem:[#allocation3 + $0x1b0] sm:$0xff] %vm342_vm11, %v4383_v21  ;;  %4396 = vpow2.f32 %v2558_v38  ;;  %v2632_v21 = vpop.permute.xlu0 %2631 }
 0x2e6   :  { %v4387_v13 = vpop.eup %4386  ;;  %1828 = vst.msk [vmem:[#allocation3 + $0x1b8] sm:$0xff] %vm342_vm11, %v4385_v43  ;;  %4398 = vpow2.f32 %v2682_v48  ;;  %v748_v43 = vmul.f32 1.442695, %v5791_v0  ;;  %vm735_vm8 = vcmp.gt.f32.partialorder %v5791_v0, 20.0 }
 0x2e7   :  { %v4389_v31 = vpop.eup %4388  ;;  %1952 = vst.msk [vmem:[#allocation3 + $0x1c0] sm:$0xff] %vm342_vm11, %v4387_v13  ;;  %4400 = vpow2.f32 %v2806_v34  ;;  %4041 = vset.pattern.permute.xlu0 %v7370_v54  ;;  %v2756_v34 = vpop.permute.xlu1 %2755 }
 0x2e8   :  { %v4391_v12 = vpop.eup %4390  ;;  %2076 = vst.msk [vmem:[#allocation3 + $0x1c8] sm:$0xff] %vm342_vm11, %v4389_v31  ;;  %4402 = vlog2.f32 %v758_v20  ;;  %4040 = vset.pattern.permute.xlu2 %v7371_v40  ;;  %4039 = vset.pattern.permute.xlu1 %v7372_v52 }
 0x2e9   :  { %v4393_v24 = vpop.eup %4392  ;;  %2200 = vst.msk [vmem:[#allocation3 + $0x1d0] sm:$0xff] %vm342_vm11, %v4391_v12  ;;  %2399 = vperm.xlu0 %4041, %v5700_v10   ;;  %2275 = vperm.xlu2 %4040, %v5700_v10   ;;  %4404 = vpow2.f32 %v748_v43 }
 0x2ea   :  { %v4395_v41 = vpop.eup %4394  ;;  %2324 = vst.msk [vmem:[#allocation3 + $0x1d8] sm:$0xff] %vm342_vm11, %v4393_v24  ;;  %2151 = vperm.xlu1 %4039, %v5700_v10  }
 0x2eb   :  { %v4397_v6 = vpop.eup %4396  ;;  %2448 = vst.msk [vmem:[#allocation3 + $0x1e0] sm:$0xff] %vm342_vm11, %v4395_v41 }
 0x2ec   :  { %v4399_v25 = vpop.eup %4398  ;;  %2572 = vst.msk [vmem:[#allocation3 + $0x1e8] sm:$0xff] %vm342_vm11, %v4397_v6 }
 0x2ed   :  { %v4401_v38 = vpop.eup %4400  ;;  %2696 = vst.msk [vmem:[#allocation3 + $0x1f0] sm:$0xff] %vm342_vm11, %v4399_v25 }
 0x2ee   :  { %v4403_v48 = vpop.eup %4402  ;;  %2820 = vst.msk [vmem:[#allocation3 + $0x1f8] sm:$0xff] %vm342_vm11, %v4401_v38 }
 0x2ef   :  { %v771_v28 = vmul.f32 0.6931472, %v4403_v48  ;;  %1545 = vst.msk [vmem:[#allocation5 + $0x120] sm:$0xff] %vm342_vm11, %v1520_v11 }
 0x2f0   :  { %2784 = vst.msk [vmem:[#allocation5 + $0xf0] sm:$0xff] %vm342_vm11, %v2756_v34 }
 0x2f1   :  { %v5798_v20 = vsel %vm734_vm7, %v5714_v30, %v771_v28  ;;  %2660 = vst.msk [vmem:[#allocation5 + $0xe8] sm:$0xff] %vm342_vm11, %v2632_v21  ;;  %4044 = vset.pattern.permute.xlu0 %v7357_v60  ;;  %4043 = vset.pattern.permute.xlu2 %v7358_v22 }
 0x2f2   :  { %7374 = vst [vmem:[#allocation37_spill] sm:$0xff] %v5798_v20  ;;  %v923_v23 = vmul.f32 %v5462_v26, %v5798_v20  ;;  %v1060_v13 = vmul.f32 %v5464_v17, %v5798_v20  ;;  %v1184_v31 = vmul.f32 %v5466_v33, %v5798_v20  ;;  %v1308_v30 = vmul.f32 %v5468_v39, %v5798_v20 }
 0x2f3   :  { %v1432_v12 = vmul.f32 %v5470_v42, %v5798_v20  ;;  %v1556_v24 = vmul.f32 %v5472_v44, %v5798_v20  ;;  %4042 = vset.pattern.permute.xlu1 %v7359_v50  ;;  %v1680_v25 = vmul.f32 %v5475_v8, %v5798_v20  ;;  %2771 = vperm.xlu0 %4044, %v5700_v10  }
 0x2f4   :  { %v935_v41 = vmul.f32 1.442695, %v923_v23  ;;  %v1072_v3 = vmul.f32 1.442695, %v1060_v13  ;;  %v1196_v6 = vmul.f32 1.442695, %v1184_v31  ;;  %2647 = vperm.xlu2 %4043, %v5700_v10   ;;  %v1804_v38 = vmul.f32 %v5477_v58, %v5798_v20  ;;  %2523 = vperm.xlu1 %4042, %v5700_v10  }
 0x2f5   :  { %v1320_v11 = vmul.f32 1.442695, %v1308_v30  ;;  %v1444_v48 = vmul.f32 1.442695, %v1432_v12  ;;  %v1928_v28 = vmul.f32 %v5481_v55, %v5798_v20  ;;  %v1568_v34 = vmul.f32 1.442695, %v1556_v24 }
 0x2f6   :  { %4406 = vpow2.f32 %v935_v41  ;;  %v2052_v21 = vmul.f32 %v5483_v29, %v5798_v20  ;;  %v1692_v23 = vmul.f32 1.442695, %v1680_v25  ;;  %v2176_v13 = vmul.f32 %v5501_v51, %v5798_v20  ;;  %v4405_v41 = vpop.eup %4404  ;;  %v5836_v25 = vpop.f32.mrf.mxu0 }
 0x2f7   :  { %4408 = vpow2.f32 %v1072_v3  ;;  %v1816_v31 = vmul.f32 1.442695, %v1804_v38  ;;  %v2300_v43 = vmul.f32 %v5510_v15, %v5798_v20  ;;  %v1940_v30 = vmul.f32 1.442695, %v1928_v28  ;;  %7375 = vst [vmem:[#allocation38_spill] sm:$0xff] %v5836_v25 }
 0x2f8   :  { %4410 = vpow2.f32 %v1196_v6  ;;  %v2424_v12 = vmul.f32 %v5514_v14, %v5798_v20  ;;  %v2064_v24 = vmul.f32 1.442695, %v2052_v21  ;;  %v2548_v3 = vmul.f32 %v5518_v47, %v5798_v20 }
 0x2f9   :  { %4412 = vpow2.f32 %v1320_v11  ;;  %v2188_v11 = vmul.f32 1.442695, %v2176_v13  ;;  %v2672_v38 = vmul.f32 %v5522_v53, %v5798_v20  ;;  %v2312_v28 = vmul.f32 1.442695, %v2300_v43 }
 0x2fa   :  { %4414 = vpow2.f32 %v1444_v48 }
 0x2fb   :  { %4416 = vpow2.f32 %v1568_v34  ;;  %4045 = vset.pattern.permute.xlu0 %v7361_v9  ;;  %v2796_v34 = vmul.f32 %v5526_v46, %v5798_v20 }
 0x2fc   :  { %v4407_v6 = vpop.eup %4406  ;;  %4418 = vpow2.f32 %v1692_v23  ;;  %4047 = vset.pattern.permute.xlu2 %v7362_v1  ;;  %4046 = vset.pattern.permute.xlu1 %v7363_v5  ;;  %v2436_v23 = vmul.f32 1.442695, %v2424_v12 }
 0x2fd   :  { %v4409_v48 = vpop.eup %4408  ;;  %947 = vst.msk [vmem:[#allocation3 + $0x200] sm:$0xff] %vm342_vm11, %v4407_v6  ;;  %4420 = vpow2.f32 %v1816_v31  ;;  %1287 = vperm.xlu2 %4047, %v5836_v25   ;;  %1163 = vperm.xlu1 %4046, %v5836_v25   ;;  %v2560_v31 = vmul.f32 1.442695, %v2548_v3  ;;  %v2684_v6 = vmul.f32 1.442695, %v2672_v38 }
 0x2fe   :  { %v4411_v21 = vpop.eup %4410  ;;  %1085 = vst.msk [vmem:[#allocation3 + $0x208] sm:$0xff] %vm342_vm11, %v4409_v48  ;;  %4422 = vpow2.f32 %v1940_v30  ;;  %1039 = vperm.xlu0 %4045, %v5836_v25   ;;  %v2808_v30 = vmul.f32 1.442695, %v2796_v34  ;;  %v759_v48 = vadd.f32 1.0, %v4405_v41  ;;  %v725_v41 = vpop.f32.mrf.mxu3 }
 0x2ff   :  { %v4413_v13 = vpop.eup %4412  ;;  %1209 = vst.msk [vmem:[#allocation3 + $0x210] sm:$0xff] %vm342_vm11, %v4411_v21  ;;  %4424 = vpow2.f32 %v2064_v24  ;;  %v1892_v34 = vpop.permute.xlu2 %1891 }
 0x300   :  { %v4415_v43 = vpop.eup %4414  ;;  %1333 = vst.msk [vmem:[#allocation3 + $0x218] sm:$0xff] %vm342_vm11, %v4413_v13  ;;  %4426 = vpow2.f32 %v2188_v11 }
 0x301   :  { %v4417_v10 = vpop.eup %4416  ;;  %1457 = vst.msk [vmem:[#allocation3 + $0x220] sm:$0xff] %vm342_vm11, %v4415_v43  ;;  %4428 = vpow2.f32 %v2312_v28 }
 0x302   :  { %v4419_v12 = vpop.eup %4418  ;;  %1581 = vst.msk [vmem:[#allocation3 + $0x228] sm:$0xff] %vm342_vm11, %v4417_v10  ;;  %4430 = vpow2.f32 %v2436_v23  ;;  %v5872_v23 = vld [vmem:[%s7258_s10] ss:$0 sm:$0xff]  ;;  %s6785_s10 = smov 0  }
 0x303   :  { %v4421_v20 = vpop.eup %4420  ;;  %1705 = vst.msk [vmem:[#allocation3 + $0x230] sm:$0xff] %vm342_vm11, %v4419_v12  ;;  %4432 = vpow2.f32 %v2560_v31  ;;  %v5875_v13 = vadd.f32 %v5872_v23, %v725_v41 }
 0x304   :  { %v4423_v24 = vpop.eup %4422  ;;  %1829 = vst.msk [vmem:[#allocation3 + $0x238] sm:$0xff] %vm342_vm11, %v4421_v20  ;;  %4434 = vpow2.f32 %v2684_v6 }
 0x305   :  { %v4425_v3 = vpop.eup %4424  ;;  %1953 = vst.msk [vmem:[#allocation3 + $0x240] sm:$0xff] %vm342_vm11, %v4423_v24  ;;  %4436 = vpow2.f32 %v2808_v30  ;;  %4050 = vset.pattern.permute.xlu2 %v7364_v59  ;;  %4049 = vset.pattern.permute.xlu1 %v7365_v4  ;;  %v750_v30 = vmul.f32 1.442695, %v5875_v13  ;;  %vm736_vm9 = vcmp.gt.f32.partialorder %v5875_v13, 20.0 }
 0x306   :  { %v4427_v11 = vpop.eup %4426  ;;  %2077 = vst.msk [vmem:[#allocation3 + $0x248] sm:$0xff] %vm342_vm11, %v4425_v3  ;;  %4438 = vlog2.f32 %v759_v48  ;;  %4048 = vset.pattern.permute.xlu0 %v7366_v19  ;;  %1659 = vperm.xlu2 %4050, %v5836_v25  }
 0x307   :  { %v4429_v10 = vpop.eup %4428  ;;  %2201 = vst.msk [vmem:[#allocation3 + $0x250] sm:$0xff] %vm342_vm11, %v4427_v11  ;;  %1535 = vperm.xlu1 %4049, %v5836_v25   ;;  %1411 = vperm.xlu0 %4048, %v5836_v25   ;;  %4440 = vpow2.f32 %v750_v30 }
 0x308   :  { %v4431_v20 = vpop.eup %4430  ;;  %2325 = vst.msk [vmem:[#allocation3 + $0x258] sm:$0xff] %vm342_vm11, %v4429_v10 }
 0x309   :  { %v4433_v38 = vpop.eup %4432  ;;  %2449 = vst.msk [vmem:[#allocation3 + $0x260] sm:$0xff] %vm342_vm11, %v4431_v20 }
 0x30a   :  { %v4435_v28 = vpop.eup %4434  ;;  %2573 = vst.msk [vmem:[#allocation3 + $0x268] sm:$0xff] %vm342_vm11, %v4433_v38 }
 0x30b   :  { %v4437_v21 = vpop.eup %4436  ;;  %2697 = vst.msk [vmem:[#allocation3 + $0x270] sm:$0xff] %vm342_vm11, %v4435_v28 }
 0x30c   :  { %v4439_v31 = vpop.eup %4438  ;;  %2821 = vst.msk [vmem:[#allocation3 + $0x278] sm:$0xff] %vm342_vm11, %v4437_v21 }
 0x30d   :  { %v773_v43 = vmul.f32 0.6931472, %v4439_v31  ;;  %1917 = vst.msk [vmem:[#allocation5 + $0x138] sm:$0xff] %vm342_vm11, %v1892_v34 }
 0x30e   :  { %4053 = vset.pattern.permute.xlu2 %v7367_v37 }
 0x30f   :  { %v5881_v6 = vsel %vm735_vm8, %v5791_v0, %v773_v43  ;;  %4052 = vset.pattern.permute.xlu1 %v7368_v2  ;;  %4051 = vset.pattern.permute.xlu0 %v7369_v27 }
 0x310   :  { %v924_v12 = vmul.f32 %v5462_v26, %v5881_v6  ;;  %v1061_v48 = vmul.f32 %v5464_v17, %v5881_v6  ;;  %v1185_v24 = vmul.f32 %v5466_v33, %v5881_v6  ;;  %v1309_v0 = vmul.f32 %v5468_v39, %v5881_v6  ;;  %2031 = vperm.xlu2 %4053, %v5836_v25  }
 0x311   :  { %v1433_v3 = vmul.f32 %v5470_v42, %v5881_v6  ;;  %v1557_v11 = vmul.f32 %v5472_v44, %v5881_v6  ;;  %v1681_v38 = vmul.f32 %v5475_v8, %v5881_v6  ;;  %1907 = vperm.xlu1 %4052, %v5836_v25   ;;  %1783 = vperm.xlu0 %4051, %v5836_v25  }
 0x312   :  { %v937_v10 = vmul.f32 1.442695, %v924_v12  ;;  %v1074_v20 = vmul.f32 1.442695, %v1061_v48  ;;  %v1198_v41 = vmul.f32 1.442695, %v1185_v24  ;;  %v1805_v34 = vmul.f32 %v5477_v58, %v5881_v6 }
 0x313   :  { %v1322_v28 = vmul.f32 1.442695, %v1309_v0  ;;  %v1446_v21 = vmul.f32 1.442695, %v1433_v3  ;;  %v1929_v31 = vmul.f32 %v5481_v55, %v5881_v6  ;;  %v1570_v43 = vmul.f32 1.442695, %v1557_v11 }
 0x314   :  { %4442 = vpow2.f32 %v937_v10  ;;  %v2053_v12 = vmul.f32 %v5483_v29, %v5881_v6  ;;  %v1694_v48 = vmul.f32 1.442695, %v1681_v38  ;;  %v2177_v24 = vmul.f32 %v5501_v51, %v5881_v6 }
 0x315   :  { %4444 = vpow2.f32 %v1074_v20  ;;  %v1818_v0 = vmul.f32 1.442695, %v1805_v34  ;;  %v2301_v30 = vmul.f32 %v5510_v15, %v5881_v6  ;;  %v1942_v3 = vmul.f32 1.442695, %v1929_v31  ;;  %v4441_v20 = vpop.eup %4440 }
 0x316   :  { %4446 = vpow2.f32 %v1198_v41  ;;  %v2425_v10 = vmul.f32 %v5514_v14, %v5881_v6  ;;  %v2066_v11 = vmul.f32 1.442695, %v2053_v12  ;;  %v2549_v41 = vmul.f32 %v5518_v47, %v5881_v6 }
 0x317   :  { %4448 = vpow2.f32 %v1322_v28  ;;  %v2190_v28 = vmul.f32 1.442695, %v2177_v24  ;;  %v2673_v34 = vmul.f32 %v5522_v53, %v5881_v6  ;;  %v2314_v31 = vmul.f32 1.442695, %v2301_v30 }
 0x318   :  { %4450 = vpow2.f32 %v1446_v21  ;;  %4056 = vset.pattern.permute.xlu2 %v7370_v54 }
 0x319   :  { %4452 = vpow2.f32 %v1570_v43  ;;  %4055 = vset.pattern.permute.xlu1 %v7371_v40  ;;  %4054 = vset.pattern.permute.xlu0 %v7372_v52  ;;  %v2797_v43 = vmul.f32 %v5526_v46, %v5881_v6 }
 0x31a   :  { %v4443_v38 = vpop.eup %4442  ;;  %4454 = vpow2.f32 %v1694_v48  ;;  %2403 = vperm.xlu2 %4056, %v5836_v25   ;;  %2279 = vperm.xlu1 %4055, %v5836_v25   ;;  %v2438_v48 = vmul.f32 1.442695, %v2425_v10 }
 0x31b   :  { %v4445_v21 = vpop.eup %4444  ;;  %948 = vst.msk [vmem:[#allocation3 + $0x280] sm:$0xff] %vm342_vm11, %v4443_v38  ;;  %4456 = vpow2.f32 %v1818_v0  ;;  %2155 = vperm.xlu0 %4054, %v5836_v25   ;;  %v2562_v0 = vmul.f32 1.442695, %v2549_v41  ;;  %v2686_v38 = vmul.f32 1.442695, %v2673_v34 }
 0x31c   :  { %v4447_v12 = vpop.eup %4446  ;;  %1086 = vst.msk [vmem:[#allocation3 + $0x288] sm:$0xff] %vm342_vm11, %v4445_v21  ;;  %4458 = vpow2.f32 %v1942_v3  ;;  %v2810_v35 = vmul.f32 1.442695, %v2797_v43  ;;  %v760_v3 = vadd.f32 1.0, %v4441_v20  ;;  %v1020_v20 = vpop.permute.xlu1 %1019 }
 0x31d   :  { %v4449_v24 = vpop.eup %4448  ;;  %1210 = vst.msk [vmem:[#allocation3 + $0x290] sm:$0xff] %vm342_vm11, %v4447_v12  ;;  %4460 = vpow2.f32 %v2066_v11  ;;  %v2264_v12 = vpop.permute.xlu2 %2263 }
 0x31e   :  { %v4451_v30 = vpop.eup %4450  ;;  %1334 = vst.msk [vmem:[#allocation3 + $0x298] sm:$0xff] %vm342_vm11, %v4449_v24  ;;  %4462 = vpow2.f32 %v2190_v28 }
 0x31f   :  { %v4453_v49 = vpop.eup %4452  ;;  %1458 = vst.msk [vmem:[#allocation3 + $0x2a0] sm:$0xff] %vm342_vm11, %v4451_v30  ;;  %4464 = vpow2.f32 %v2314_v31  ;;  %v727_v31 = vpop.f32.mrf.mxu3 }
 0x320   :  { %v4455_v21 = vpop.eup %4454  ;;  %1582 = vst.msk [vmem:[#allocation3 + $0x2a8] sm:$0xff] %vm342_vm11, %v4453_v49  ;;  %4466 = vpow2.f32 %v2438_v48  ;;  %v1272_v49 = vpop.permute.xlu0 %1271 }
 0x321   :  { %v4457_v10 = vpop.eup %4456  ;;  %1706 = vst.msk [vmem:[#allocation3 + $0x2b0] sm:$0xff] %vm342_vm11, %v4455_v21  ;;  %4468 = vpow2.f32 %v2562_v0  ;;  %v5950_v0 = vadd.f32 %v5872_v23, %v727_v31 }
 0x322   :  { %v4459_v11 = vpop.eup %4458  ;;  %1830 = vst.msk [vmem:[#allocation3 + $0x2b8] sm:$0xff] %vm342_vm11, %v4457_v10  ;;  %4470 = vpow2.f32 %v2686_v38  ;;  %4059 = vset.pattern.permute.xlu2 %v7357_v60  ;;  %4058 = vset.pattern.permute.xlu1 %v7358_v22 }
 0x323   :  { %v4461_v41 = vpop.eup %4460  ;;  %1954 = vst.msk [vmem:[#allocation3 + $0x2c0] sm:$0xff] %vm342_vm11, %v4459_v11  ;;  %4472 = vpow2.f32 %v2810_v35  ;;  %4057 = vset.pattern.permute.xlu0 %v7359_v50  ;;  %2775 = vperm.xlu2 %4059, %v5836_v25   ;;  %vm737_vm10 = vcmp.gt.f32.partialorder %v5950_v0, 20.0 }
 0x324   :  { %v4463_v28 = vpop.eup %4462  ;;  %2078 = vst.msk [vmem:[#allocation3 + $0x2c8] sm:$0xff] %vm342_vm11, %v4461_v41  ;;  %4474 = vlog2.f32 %v760_v3  ;;  %2651 = vperm.xlu1 %4058, %v5836_v25   ;;  %2527 = vperm.xlu0 %4057, %v5836_v25   ;;  %v752_v3 = vmul.f32 1.442695, %v5950_v0  ;;  %v1396_v10 = vpop.permute.xlu1 %1395 }
 0x325   :  { %v4465_v34 = vpop.eup %4464  ;;  %2202 = vst.msk [vmem:[#allocation3 + $0x2d0] sm:$0xff] %vm342_vm11, %v4463_v28  ;;  %v5971_v28 = vpop.f32.mrf.mxu0 }
 0x326   :  { %v4467_v35 = vpop.eup %4466  ;;  %2326 = vst.msk [vmem:[#allocation3 + $0x2d8] sm:$0xff] %vm342_vm11, %v4465_v34  ;;  %4476 = vpow2.f32 %v752_v3 }
 0x327   :  { %v4469_v43 = vpop.eup %4468  ;;  %2450 = vst.msk [vmem:[#allocation3 + $0x2e0] sm:$0xff] %vm342_vm11, %v4467_v35 }
 0x328   :  { %v4471_v48 = vpop.eup %4470  ;;  %2574 = vst.msk [vmem:[#allocation3 + $0x2e8] sm:$0xff] %vm342_vm11, %v4469_v43  ;;  %v1644_v23 = vpop.permute.xlu0 %1643 }
 0x329   :  { %v4473_v24 = vpop.eup %4472  ;;  %2698 = vst.msk [vmem:[#allocation3 + $0x2f0] sm:$0xff] %vm342_vm11, %v4471_v48  ;;  %v2636_v48 = vpop.permute.xlu2 %2635 }
 0x32a   :  { %v4475_v30 = vpop.eup %4474  ;;  %2822 = vst.msk [vmem:[#allocation3 + $0x2f8] sm:$0xff] %vm342_vm11, %v4473_v24 }
 0x32b   :  { %v775_v38 = vmul.f32 0.6931472, %v4475_v30  ;;  %1297 = vst.msk [vmem:[#allocation5 + $0x110] sm:$0xff] %vm342_vm11, %v1272_v49  ;;  %4060 = vset.pattern.permute.xlu2 %v7361_v9 }
 0x32c   :  { %1049 = vst.msk [vmem:[#allocation5 + $0x100] sm:$0xff] %vm342_vm11, %v1020_v20  ;;  %4062 = vset.pattern.permute.xlu1 %v7362_v1  ;;  %4061 = vset.pattern.permute.xlu0 %v7363_v5 }
 0x32d   :  { %v5958_v21 = vsel %vm736_vm9, %v5875_v13, %v775_v38  ;;  %2289 = vst.msk [vmem:[#allocation5 + $0x150] sm:$0xff] %vm342_vm11, %v2264_v12  ;;  %1291 = vperm.xlu1 %4062, %v5971_v28   ;;  %1167 = vperm.xlu0 %4061, %v5971_v28  }
 0x32e   :  { %7376 = vst [vmem:[#allocation39_spill] sm:$0xff] %v5958_v21  ;;  %v925_v11 = vmul.f32 %v5462_v26, %v5958_v21  ;;  %v1062_v41 = vmul.f32 %v5464_v17, %v5958_v21  ;;  %v1186_v13 = vmul.f32 %v5466_v33, %v5958_v21  ;;  %v1310_v49 = vmul.f32 %v5468_v39, %v5958_v21 }
 0x32f   :  { %1669 = vst.msk [vmem:[#allocation5 + $0x128] sm:$0xff] %vm342_vm11, %v1644_v23  ;;  %v1434_v20 = vmul.f32 %v5470_v42, %v5958_v21  ;;  %v1558_v34 = vmul.f32 %v5472_v44, %v5958_v21  ;;  %v1682_v12 = vmul.f32 %v5475_v8, %v5958_v21  ;;  %v1806_v30 = vmul.f32 %v5477_v58, %v5958_v21 }
 0x330   :  { %1421 = vst.msk [vmem:[#allocation5 + $0x118] sm:$0xff] %vm342_vm11, %v1396_v10  ;;  %v939_v35 = vmul.f32 1.442695, %v925_v11  ;;  %v1076_v31 = vmul.f32 1.442695, %v1062_v41  ;;  %1044 = vperm.xlu2 %4060, %v5971_v28   ;;  %v1930_v23 = vmul.f32 %v5481_v55, %v5958_v21  ;;  %v2054_v11 = vmul.f32 %v5483_v29, %v5958_v21 }
 0x331   :  { %v1200_v43 = vmul.f32 1.442695, %v1186_v13  ;;  %v1324_v24 = vmul.f32 1.442695, %v1310_v49  ;;  %v1448_v38 = vmul.f32 1.442695, %v1434_v20  ;;  %v2178_v13 = vmul.f32 %v5501_v51, %v5958_v21 }
 0x332   :  { %4478 = vpow2.f32 %v939_v35  ;;  %2661 = vst.msk [vmem:[#allocation5 + $0x168] sm:$0xff] %vm342_vm11, %v2636_v48  ;;  %v1572_v10 = vmul.f32 1.442695, %v1558_v34  ;;  %v1696_v41 = vmul.f32 1.442695, %v1682_v12  ;;  %v2302_v49 = vmul.f32 %v5510_v15, %v5958_v21  ;;  %v1768_v34 = vpop.permute.xlu1 %1767  ;;  %v4477_v48 = vpop.eup %4476 }
 0x333   :  { %4480 = vpow2.f32 %v1076_v31  ;;  %v1820_v3 = vmul.f32 1.442695, %v1806_v30  ;;  %v1944_v20 = vmul.f32 1.442695, %v1930_v23  ;;  %v2426_v35 = vmul.f32 %v5514_v14, %v5958_v21  ;;  %v2016_v31 = vpop.permute.xlu0 %2015  ;;  %1793 = vst.msk [vmem:[#allocation5 + $0x130] sm:$0xff] %vm342_vm11, %v1768_v34 }
 0x334   :  { %4482 = vpow2.f32 %v1200_v43  ;;  %v2068_v25 = vmul.f32 1.442695, %v2054_v11  ;;  %v2550_v43 = vmul.f32 %v5518_v47, %v5958_v21  ;;  %2041 = vst.msk [vmem:[#allocation5 + $0x140] sm:$0xff] %vm342_vm11, %v2016_v31  ;;  %v2674_v30 = vmul.f32 %v5522_v53, %v5958_v21  ;;  %v1276_v11 = vpop.permute.xlu2 %1275 }
 0x335   :  { %4484 = vpow2.f32 %v1324_v24  ;;  %v2192_v24 = vmul.f32 1.442695, %v2178_v13  ;;  %4065 = vset.pattern.permute.xlu1 %v7364_v59  ;;  %4064 = vset.pattern.permute.xlu0 %v7365_v4  ;;  %v2316_v23 = vmul.f32 1.442695, %v2302_v49  ;;  %v2440_v13 = vmul.f32 1.442695, %v2426_v35 }
 0x336   :  { %4486 = vpow2.f32 %v1448_v38  ;;  %1663 = vperm.xlu1 %4065, %v5971_v28   ;;  %1539 = vperm.xlu0 %4064, %v5971_v28   ;;  %v2688_v34 = vmul.f32 1.442695, %v2674_v30  ;;  %1298 = vst.msk [vmem:[#allocation5 + $0x190] sm:$0xff] %vm342_vm11, %v1276_v11 }
 0x337   :  { %4488 = vpow2.f32 %v1572_v10  ;;  %v2798_v10 = vmul.f32 %v5526_v46, %v5958_v21 }
 0x338   :  { %v4479_v12 = vpop.eup %4478  ;;  %4490 = vpow2.f32 %v1696_v41  ;;  %4063 = vset.pattern.permute.xlu2 %v7366_v19 }
 0x339   :  { %v4481_v38 = vpop.eup %4480  ;;  %949 = vst.msk [vmem:[#allocation3 + $0x300] sm:$0xff] %vm342_vm11, %v4479_v12  ;;  %4492 = vpow2.f32 %v1820_v3  ;;  %1415 = vperm.xlu2 %4063, %v5971_v28   ;;  %v2564_v3 = vmul.f32 1.442695, %v2550_v43 }
 0x33a   :  { %v4483_v41 = vpop.eup %4482  ;;  %1087 = vst.msk [vmem:[#allocation3 + $0x308] sm:$0xff] %vm342_vm11, %v4481_v38  ;;  %4494 = vpow2.f32 %v1944_v20  ;;  %v2812_v20 = vmul.f32 1.442695, %v2798_v10  ;;  %v761_v38 = vadd.f32 1.0, %v4477_v48  ;;  %v2140_v43 = vpop.permute.xlu1 %2139 }
 0x33b   :  { %v4485_v31 = vpop.eup %4484  ;;  %1211 = vst.msk [vmem:[#allocation3 + $0x310] sm:$0xff] %vm342_vm11, %v4483_v41  ;;  %4496 = vpow2.f32 %v2068_v25  ;;  %v2388_v25 = vpop.permute.xlu0 %2387 }
 0x33c   :  { %v4487_v49 = vpop.eup %4486  ;;  %1335 = vst.msk [vmem:[#allocation3 + $0x318] sm:$0xff] %vm342_vm11, %v4485_v31  ;;  %4498 = vpow2.f32 %v2192_v24  ;;  %v1648_v48 = vpop.permute.xlu2 %1647 }
 0x33d   :  { %v4489_v12 = vpop.eup %4488  ;;  %1459 = vst.msk [vmem:[#allocation3 + $0x320] sm:$0xff] %vm342_vm11, %v4487_v49  ;;  %4500 = vpow2.f32 %v2316_v23 }
 0x33e   :  { %v4491_v35 = vpop.eup %4490  ;;  %1583 = vst.msk [vmem:[#allocation3 + $0x328] sm:$0xff] %vm342_vm11, %v4489_v12  ;;  %4502 = vpow2.f32 %v2440_v13  ;;  %4068 = vset.pattern.permute.xlu1 %v7367_v37  ;;  %4067 = vset.pattern.permute.xlu0 %v7368_v2 }
 0x33f   :  { %v4493_v21 = vpop.eup %4492  ;;  %1707 = vst.msk [vmem:[#allocation3 + $0x330] sm:$0xff] %vm342_vm11, %v4491_v35  ;;  %4504 = vpow2.f32 %v2564_v3  ;;  %2035 = vperm.xlu1 %4068, %v5971_v28   ;;  %1911 = vperm.xlu0 %4067, %v5971_v28  }
 0x340   :  { %v4495_v41 = vpop.eup %4494  ;;  %1831 = vst.msk [vmem:[#allocation3 + $0x338] sm:$0xff] %vm342_vm11, %v4493_v21  ;;  %4506 = vpow2.f32 %v2688_v34 }
 0x341   :  { %v4497_v24 = vpop.eup %4496  ;;  %1955 = vst.msk [vmem:[#allocation3 + $0x340] sm:$0xff] %vm342_vm11, %v4495_v41  ;;  %4508 = vpow2.f32 %v2812_v20  ;;  %4066 = vset.pattern.permute.xlu2 %v7369_v27 }
 0x342   :  { %v4499_v30 = vpop.eup %4498  ;;  %2079 = vst.msk [vmem:[#allocation3 + $0x348] sm:$0xff] %vm342_vm11, %v4497_v24  ;;  %4510 = vlog2.f32 %v761_v38  ;;  %1787 = vperm.xlu2 %4066, %v5971_v28   ;;  %v2512_v49 = vpop.permute.xlu1 %2511 }
 0x343   :  { %v4501_v23 = vpop.eup %4500  ;;  %2203 = vst.msk [vmem:[#allocation3 + $0x350] sm:$0xff] %vm342_vm11, %v4499_v30  ;;  %v2760_v3 = vpop.permute.xlu0 %2759 }
 0x344   :  { %v4503_v21 = vpop.eup %4502  ;;  %2327 = vst.msk [vmem:[#allocation3 + $0x358] sm:$0xff] %vm342_vm11, %v4501_v23  ;;  %v2020_v20 = vpop.permute.xlu2 %2019 }
 0x345   :  { %v4505_v10 = vpop.eup %4504  ;;  %2451 = vst.msk [vmem:[#allocation3 + $0x360] sm:$0xff] %vm342_vm11, %v4503_v21 }
 0x346   :  { %v4507_v13 = vpop.eup %4506  ;;  %2575 = vst.msk [vmem:[#allocation3 + $0x368] sm:$0xff] %vm342_vm11, %v4505_v10 }
 0x347   :  { %v4509_v31 = vpop.eup %4508  ;;  %2699 = vst.msk [vmem:[#allocation3 + $0x370] sm:$0xff] %vm342_vm11, %v4507_v13  ;;  %4071 = vset.pattern.permute.xlu1 %v7370_v54  ;;  %4070 = vset.pattern.permute.xlu0 %v7371_v40 }
 0x348   :  { %v4511_v34 = vpop.eup %4510  ;;  %2823 = vst.msk [vmem:[#allocation3 + $0x378] sm:$0xff] %vm342_vm11, %v4509_v31  ;;  %2407 = vperm.xlu1 %4071, %v5971_v28   ;;  %2283 = vperm.xlu0 %4070, %v5971_v28  }
 0x349   :  { %v777_v12 = vmul.f32 0.6931472, %v4511_v34  ;;  %2413 = vst.msk [vmem:[#allocation5 + $0x158] sm:$0xff] %vm342_vm11, %v2388_v25 }
 0x34a   :  { %2165 = vst.msk [vmem:[#allocation5 + $0x148] sm:$0xff] %vm342_vm11, %v2140_v43  ;;  %4069 = vset.pattern.permute.xlu2 %v7372_v52 }
 0x34b   :  { %v6038_v35 = vsel %vm737_vm10, %v5950_v0, %v777_v12  ;;  %1670 = vst.msk [vmem:[#allocation5 + $0x1a8] sm:$0xff] %vm342_vm11, %v1648_v48  ;;  %v1025_v48 = vpop.permute.xlu0 %1024  ;;  %2159 = vperm.xlu2 %4069, %v5971_v28  }
 0x34c   :  { %v926_v38 = vmul.f32 %v5462_v26, %v6038_v35  ;;  %v1063_v11 = vmul.f32 %v5464_v17, %v6038_v35  ;;  %v1187_v41 = vmul.f32 %v5466_v33, %v6038_v35  ;;  %v1311_v0 = vmul.f32 %v5468_v39, %v6038_v35  ;;  %2785 = vst.msk [vmem:[#allocation5 + $0x170] sm:$0xff] %vm342_vm11, %v2760_v3  ;;  %v2392_v13 = vpop.permute.xlu2 %2391 }
 0x34d   :  { %v1435_v25 = vmul.f32 %v5470_v42, %v6038_v35  ;;  %v1559_v43 = vmul.f32 %v5472_v44, %v6038_v35  ;;  %v1683_v17 = vmul.f32 %v5475_v8, %v6038_v35  ;;  %v1807_v39 = vmul.f32 %v5477_v58, %v6038_v35  ;;  %v1152_v42 = vpop.permute.xlu1 %1151  ;;  %2537 = vst.msk [vmem:[#allocation5 + $0x160] sm:$0xff] %vm342_vm11, %v2512_v49 }
 0x34e   :  { %v941_v26 = vmul.f32 1.442695, %v926_v38  ;;  %v1078_v24 = vmul.f32 1.442695, %v1063_v11  ;;  %v1202_v30 = vmul.f32 1.442695, %v1187_v41  ;;  %v1931_v23 = vmul.f32 %v5481_v55, %v6038_v35 }
 0x34f   :  { %v1326_v33 = vmul.f32 1.442695, %v1311_v0  ;;  %v1450_v44 = vmul.f32 1.442695, %v1435_v25  ;;  %v1574_v8 = vmul.f32 1.442695, %v1559_v43  ;;  %v2055_v21 = vmul.f32 %v5483_v29, %v6038_v35 }
 0x350   :  { %4512 = vpow2.f32 %v941_v26  ;;  %2042 = vst.msk [vmem:[#allocation5 + $0x1c0] sm:$0xff] %vm342_vm11, %v2020_v20  ;;  %v1698_v58 = vmul.f32 1.442695, %v1683_v17  ;;  %v2179_v10 = vmul.f32 %v5501_v51, %v6038_v35  ;;  %v1822_v31 = vmul.f32 1.442695, %v1807_v39  ;;  %4074 = vset.pattern.permute.xlu1 %v7357_v60  ;;  %4073 = vset.pattern.permute.xlu0 %v7358_v22 }
 0x351   :  { %4514 = vpow2.f32 %v1078_v24  ;;  %1174 = vst.msk [vmem:[#allocation5 + $0x188] sm:$0xff] %vm342_vm11, %v1152_v42  ;;  %v2303_v55 = vmul.f32 %v5510_v15, %v6038_v35  ;;  %v1946_v3 = vmul.f32 1.442695, %v1931_v23  ;;  %v2427_v29 = vmul.f32 %v5514_v14, %v6038_v35  ;;  %2779 = vperm.xlu1 %4074, %v5971_v28   ;;  %2655 = vperm.xlu0 %4073, %v5971_v28  }
 0x352   :  { %4516 = vpow2.f32 %v1202_v30  ;;  %1050 = vst.msk [vmem:[#allocation5 + $0x180] sm:$0xff] %vm342_vm11, %v1025_v48  ;;  %v2070_v49 = vmul.f32 1.442695, %v2055_v21  ;;  %v2551_v51 = vmul.f32 %v5518_v47, %v6038_v35  ;;  %v2194_v12 = vmul.f32 1.442695, %v2179_v10 }
 0x353   :  { %4518 = vpow2.f32 %v1326_v33  ;;  %2414 = vst.msk [vmem:[#allocation5 + $0x1d8] sm:$0xff] %vm342_vm11, %v2392_v13  ;;  %v2675_v15 = vmul.f32 %v5522_v53, %v6038_v35  ;;  %v2318_v14 = vmul.f32 1.442695, %v2303_v55  ;;  %v2799_v38 = vmul.f32 %v5526_v46, %v6038_v35  ;;  %v1400_v41 = vpop.permute.xlu0 %1399  ;;  %4072 = vset.pattern.permute.xlu2 %v7359_v50 }
 0x354   :  { %4520 = vpow2.f32 %v1450_v44  ;;  %v2442_v53 = vmul.f32 1.442695, %v2427_v29  ;;  %v2566_v46 = vmul.f32 1.442695, %v2551_v51  ;;  %2531 = vperm.xlu2 %4072, %v5971_v28   ;;  %v2764_v26 = vpop.permute.xlu2 %2763  ;;  %1422 = vst.msk [vmem:[#allocation5 + $0x198] sm:$0xff] %vm342_vm11, %v1400_v41 }
 0x355   :  { %4522 = vpow2.f32 %v1574_v8  ;;  %v1524_v11 = vpop.permute.xlu1 %1523  ;;  %v2690_v43 = vmul.f32 1.442695, %v2675_v15  ;;  %v2814_v30 = vmul.f32 1.442695, %v2799_v38  ;;  %v6102_v8 = vpop.f32.mrf.mxu3  ;;  %2786 = vst.msk [vmem:[#allocation5 + $0x1f0] sm:$0xff] %vm342_vm11, %v2764_v26 }
 0x356   :  { %v4513_v34 = vpop.eup %4512  ;;  %4524 = vpow2.f32 %v1698_v58  ;;  %1546 = vst.msk [vmem:[#allocation5 + $0x1a0] sm:$0xff] %vm342_vm11, %v1524_v11 }
 0x357   :  { %v4515_v20 = vpop.eup %4514  ;;  %950 = vst.msk [vmem:[#allocation3 + $0x380] sm:$0xff] %vm342_vm11, %v4513_v34  ;;  %4526 = vpow2.f32 %v1822_v31 }
 0x358   :  { %v4517_v47 = vpop.eup %4516  ;;  %1088 = vst.msk [vmem:[#allocation3 + $0x388] sm:$0xff] %vm342_vm11, %v4515_v20  ;;  %4528 = vpow2.f32 %v1946_v3 }
 0x359   :  { %v4519_v0 = vpop.eup %4518  ;;  %1212 = vst.msk [vmem:[#allocation3 + $0x390] sm:$0xff] %vm342_vm11, %v4517_v47  ;;  %4530 = vpow2.f32 %v2070_v49  ;;  %4076 = vset.pattern.permute.xlu1 %v7363_v5  ;;  %4078 = vset.pattern.permute.xlu0 %v7366_v19 }
 0x35a   :  { %v4521_v25 = vpop.eup %4520  ;;  %1336 = vst.msk [vmem:[#allocation3 + $0x398] sm:$0xff] %vm342_vm11, %v4519_v0  ;;  %4532 = vpow2.f32 %v2194_v12  ;;  %1338 = vperm.xlu0 %4078, %v6102_v8   ;;  %1090 = vperm.xlu1 %4076, %v6102_v8  }
 0x35b   :  { %v4523_v24 = vpop.eup %4522  ;;  %1460 = vst.msk [vmem:[#allocation3 + $0x3a0] sm:$0xff] %vm342_vm11, %v4521_v25  ;;  %4534 = vpow2.f32 %v2318_v14  ;;  %v1772_v44 = vpop.permute.xlu0 %1771 }
 0x35c   :  { %v4525_v17 = vpop.eup %4524  ;;  %1584 = vst.msk [vmem:[#allocation3 + $0x3a8] sm:$0xff] %vm342_vm11, %v4523_v24  ;;  %4536 = vpow2.f32 %v2442_v53  ;;  %4075 = vset.pattern.permute.xlu2 %v7361_v9  ;;  %v1030_v10 = vpop.permute.xlu2 %1029 }
 0x35d   :  { %v4527_v33 = vpop.eup %4526  ;;  %1708 = vst.msk [vmem:[#allocation3 + $0x3b0] sm:$0xff] %vm342_vm11, %v4525_v17  ;;  %4538 = vpow2.f32 %v2566_v46  ;;  %v1896_v48 = vpop.permute.xlu1 %1895  ;;  %953 = vperm.xlu2 %4075, %v6102_v8  }
 0x35e   :  { %v4529_v39 = vpop.eup %4528  ;;  %1832 = vst.msk [vmem:[#allocation3 + $0x3b8] sm:$0xff] %vm342_vm11, %v4527_v33  ;;  %4540 = vpow2.f32 %v2690_v43  ;;  %v6159_v46 = vpop.f32.mrf.mxu3 }
 0x35f   :  { %v4531_v42 = vpop.eup %4530  ;;  %1956 = vst.msk [vmem:[#allocation3 + $0x3c0] sm:$0xff] %vm342_vm11, %v4529_v39  ;;  %4542 = vpow2.f32 %v2814_v30 }
 0x360   :  { %v4533_v23 = vpop.eup %4532  ;;  %2080 = vst.msk [vmem:[#allocation3 + $0x3c8] sm:$0xff] %vm342_vm11, %v4531_v42 }
 0x361   :  { %v4535_v21 = vpop.eup %4534  ;;  %2204 = vst.msk [vmem:[#allocation3 + $0x3d0] sm:$0xff] %vm342_vm11, %v4533_v23 }
 0x362   :  { %v4537_v58 = vpop.eup %4536  ;;  %2328 = vst.msk [vmem:[#allocation3 + $0x3d8] sm:$0xff] %vm342_vm11, %v4535_v21  ;;  %4081 = vset.pattern.permute.xlu0 %v7369_v27  ;;  %4079 = vset.pattern.permute.xlu1 %v7365_v4 }
 0x363   :  { %v4539_v13 = vpop.eup %4538  ;;  %2452 = vst.msk [vmem:[#allocation3 + $0x3e0] sm:$0xff] %vm342_vm11, %v4537_v58  ;;  %v2144_v29 = vpop.permute.xlu0 %2143  ;;  %1710 = vperm.xlu0 %4081, %v6102_v8   ;;  %1462 = vperm.xlu1 %4079, %v6102_v8  }
 0x364   :  { %v4541_v31 = vpop.eup %4540  ;;  %2576 = vst.msk [vmem:[#allocation3 + $0x3e8] sm:$0xff] %vm342_vm11, %v4539_v13  ;;  %v1404_v49 = vpop.permute.xlu2 %1403  ;;  %v4802_v13 = vmov 15  }
 0x365   :  { %v4543_v55 = vpop.eup %4542  ;;  %2700 = vst.msk [vmem:[#allocation3 + $0x3f0] sm:$0xff] %vm342_vm11, %v4541_v31  ;;  %v2268_v3 = vpop.permute.xlu1 %2267  ;;  %4077 = vset.pattern.permute.xlu2 %v7362_v1 }
 0x366   :  { %2824 = vst.msk [vmem:[#allocation3 + $0x3f8] sm:$0xff] %vm342_vm11, %v4543_v55  ;;  %1214 = vperm.xlu2 %4077, %v6102_v8  }
 0x367   :  { %1918 = vst.msk [vmem:[#allocation5 + $0x1b8] sm:$0xff] %vm342_vm11, %v1896_v48 }
 0x368   :  { %1794 = vst.msk [vmem:[#allocation5 + $0x1b0] sm:$0xff] %vm342_vm11, %v1772_v44 }
 0x369   :  { %1051 = vst.msk [vmem:[#allocation5 + $0x200] sm:$0xff] %vm342_vm11, %v1030_v10 }
 0x36a   :  { %2290 = vst.msk [vmem:[#allocation5 + $0x1d0] sm:$0xff] %vm342_vm11, %v2268_v3 }
 0x36b   :  { %2166 = vst.msk [vmem:[#allocation5 + $0x1c8] sm:$0xff] %vm342_vm11, %v2144_v29  ;;  %v2516_v34 = vpop.permute.xlu0 %2515  ;;  %4084 = vset.pattern.permute.xlu0 %v7372_v52  ;;  %4082 = vset.pattern.permute.xlu1 %v7368_v2 }
 0x36c   :  { %1423 = vst.msk [vmem:[#allocation5 + $0x218] sm:$0xff] %vm342_vm11, %v1404_v49  ;;  %v1776_v12 = vpop.permute.xlu2 %1775  ;;  %2082 = vperm.xlu0 %4084, %v6102_v8   ;;  %1834 = vperm.xlu1 %4082, %v6102_v8  }
 0x36d   :  { %v2640_v51 = vpop.permute.xlu1 %2639  ;;  %2538 = vst.msk [vmem:[#allocation5 + $0x1e0] sm:$0xff] %vm342_vm11, %v2516_v34 }
 0x36e   :  { %2662 = vst.msk [vmem:[#allocation5 + $0x1e8] sm:$0xff] %vm342_vm11, %v2640_v51  ;;  %4080 = vset.pattern.permute.xlu2 %v7364_v59 }
 0x36f   :  { %1795 = vst.msk [vmem:[#allocation5 + $0x230] sm:$0xff] %vm342_vm11, %v1776_v12  ;;  %1586 = vperm.xlu2 %4080, %v6102_v8  }
 0x373   :  { %v1156_v20 = vpop.permute.xlu0 %1155 }
 0x374   :  { %1175 = vst.msk [vmem:[#allocation5 + $0x208] sm:$0xff] %vm342_vm11, %v1156_v20  ;;  %v2148_v14 = vpop.permute.xlu2 %2147  ;;  %4087 = vset.pattern.permute.xlu0 %v7359_v50  ;;  %4085 = vset.pattern.permute.xlu1 %v7371_v40 }
 0x375   :  { %v1280_v15 = vpop.permute.xlu1 %1279  ;;  %2167 = vst.msk [vmem:[#allocation5 + $0x248] sm:$0xff] %vm342_vm11, %v2148_v14  ;;  %2454 = vperm.xlu0 %4087, %v6102_v8   ;;  %2206 = vperm.xlu1 %4085, %v6102_v8  }
 0x376   :  { %1299 = vst.msk [vmem:[#allocation5 + $0x210] sm:$0xff] %vm342_vm11, %v1280_v15 }
 0x377   :  { %4083 = vset.pattern.permute.xlu2 %v7367_v37 }
 0x378   :  { %1958 = vperm.xlu2 %4083, %v6102_v8  }
 0x37b   :  { %v1528_v11 = vpop.permute.xlu0 %1527 }
 0x37c   :  { %1547 = vst.msk [vmem:[#allocation5 + $0x220] sm:$0xff] %vm342_vm11, %v1528_v11  ;;  %v2520_v41 = vpop.permute.xlu2 %2519 }
 0x37d   :  { %v1652_v38 = vpop.permute.xlu1 %1651  ;;  %2539 = vst.msk [vmem:[#allocation5 + $0x260] sm:$0xff] %vm342_vm11, %v2520_v41  ;;  %4088 = vset.pattern.permute.xlu1 %v7358_v22  ;;  %4090 = vset.pattern.permute.xlu0 %v4802_v13 }
 0x37e   :  { %1671 = vst.msk [vmem:[#allocation5 + $0x228] sm:$0xff] %vm342_vm11, %v1652_v38  ;;  %2578 = vperm.xlu1 %4088, %v6102_v8   ;;  %2826 = vperm.xlu0 %4090, %v6102_v8  }
 0x380   :  { %4086 = vset.pattern.permute.xlu2 %v7370_v54 }
 0x381   :  { %2330 = vperm.xlu2 %4086, %v6102_v8  }
 0x383   :  { %v1900_v53 = vpop.permute.xlu0 %1899 }
 0x384   :  { %1919 = vst.msk [vmem:[#allocation5 + $0x238] sm:$0xff] %vm342_vm11, %v1900_v53  ;;  %v1160_v0 = vpop.permute.xlu2 %1159 }
 0x385   :  { %v2024_v47 = vpop.permute.xlu1 %2023  ;;  %1176 = vst.msk [vmem:[#allocation5 + $0x288] sm:$0xff] %vm342_vm11, %v1160_v0 }
 0x386   :  { %2043 = vst.msk [vmem:[#allocation5 + $0x240] sm:$0xff] %vm342_vm11, %v2024_v47  ;;  %4093 = vset.pattern.permute.xlu1 %v7362_v1  ;;  %4091 = vset.pattern.permute.xlu0 %v7361_v9 }
 0x387   :  { %1218 = vperm.xlu1 %4093, %v6159_v46   ;;  %958 = vperm.xlu0 %4091, %v6159_v46  }
 0x389   :  { %4089 = vset.pattern.permute.xlu2 %v7357_v60 }
 0x38a   :  { %2702 = vperm.xlu2 %4089, %v6102_v8   ;;  %v6202_v8 = vpop.f32.mrf.mxu3 }
 0x38b   :  { %v2272_v43 = vpop.permute.xlu0 %2271 }
 0x38c   :  { %2291 = vst.msk [vmem:[#allocation5 + $0x250] sm:$0xff] %vm342_vm11, %v2272_v43  ;;  %v1532_v26 = vpop.permute.xlu2 %1531 }
 0x38d   :  { %v2396_v25 = vpop.permute.xlu1 %2395  ;;  %1548 = vst.msk [vmem:[#allocation5 + $0x2a0] sm:$0xff] %vm342_vm11, %v1532_v26 }
 0x38e   :  { %2415 = vst.msk [vmem:[#allocation5 + $0x258] sm:$0xff] %vm342_vm11, %v2396_v25 }
 0x38f   :  { %4096 = vset.pattern.permute.xlu1 %v7364_v59  ;;  %4092 = vset.pattern.permute.xlu0 %v7363_v5 }
 0x390   :  { %1590 = vperm.xlu1 %4096, %v6159_v46   ;;  %1094 = vperm.xlu0 %4092, %v6159_v46  }
 0x392   :  { %4094 = vset.pattern.permute.xlu2 %v7366_v19 }
 0x393   :  { %v2644_v30 = vpop.permute.xlu0 %2643  ;;  %1342 = vperm.xlu2 %4094, %v6159_v46  }
 0x394   :  { %2663 = vst.msk [vmem:[#allocation5 + $0x268] sm:$0xff] %vm342_vm11, %v2644_v30  ;;  %v1904_v17 = vpop.permute.xlu2 %1903 }
 0x395   :  { %v2768_v24 = vpop.permute.xlu1 %2767  ;;  %1920 = vst.msk [vmem:[#allocation5 + $0x2b8] sm:$0xff] %vm342_vm11, %v1904_v17 }
 0x396   :  { %2787 = vst.msk [vmem:[#allocation5 + $0x270] sm:$0xff] %vm342_vm11, %v2768_v24 }
 0x398   :  { %4099 = vset.pattern.permute.xlu1 %v7367_v37  ;;  %4095 = vset.pattern.permute.xlu0 %v7365_v4 }
 0x399   :  { %1962 = vperm.xlu1 %4099, %v6159_v46   ;;  %1466 = vperm.xlu0 %4095, %v6159_v46  }
 0x39b   :  { %v1284_v33 = vpop.permute.xlu0 %1283  ;;  %4097 = vset.pattern.permute.xlu2 %v7369_v27 }
 0x39c   :  { %1300 = vst.msk [vmem:[#allocation5 + $0x290] sm:$0xff] %vm342_vm11, %v1284_v33  ;;  %v2276_v42 = vpop.permute.xlu2 %2275  ;;  %1714 = vperm.xlu2 %4097, %v6159_v46  }
 0x39d   :  { %v1035_v39 = vpop.permute.xlu1 %1034  ;;  %2292 = vst.msk [vmem:[#allocation5 + $0x2d0] sm:$0xff] %vm342_vm11, %v2276_v42 }
 0x39e   :  { %1052 = vst.msk [vmem:[#allocation5 + $0x280] sm:$0xff] %vm342_vm11, %v1035_v39 }
 0x3a1   :  { %4102 = vset.pattern.permute.xlu1 %v7370_v54  ;;  %4098 = vset.pattern.permute.xlu0 %v7368_v2 }
 0x3a2   :  { %2334 = vperm.xlu1 %4102, %v6159_v46   ;;  %1838 = vperm.xlu0 %4098, %v6159_v46  }
 0x3a3   :  { %v1656_v48 = vpop.permute.xlu0 %1655 }
 0x3a4   :  { %1672 = vst.msk [vmem:[#allocation5 + $0x2a8] sm:$0xff] %vm342_vm11, %v1656_v48  ;;  %v2648_v23 = vpop.permute.xlu2 %2647  ;;  %4100 = vset.pattern.permute.xlu2 %v7372_v52 }
 0x3a5   :  { %v1408_v44 = vpop.permute.xlu1 %1407  ;;  %2664 = vst.msk [vmem:[#allocation5 + $0x2e8] sm:$0xff] %vm342_vm11, %v2648_v23  ;;  %2086 = vperm.xlu2 %4100, %v6159_v46  }
 0x3a6   :  { %1424 = vst.msk [vmem:[#allocation5 + $0x298] sm:$0xff] %vm342_vm11, %v1408_v44 }
 0x3aa   :  { %4105 = vset.pattern.permute.xlu1 %v7357_v60  ;;  %4101 = vset.pattern.permute.xlu0 %v7371_v40 }
 0x3ab   :  { %v2028_v21 = vpop.permute.xlu0 %2027  ;;  %2706 = vperm.xlu1 %4105, %v6159_v46   ;;  %2210 = vperm.xlu0 %4101, %v6159_v46  }
 0x3ac   :  { %2044 = vst.msk [vmem:[#allocation5 + $0x2c0] sm:$0xff] %vm342_vm11, %v2028_v21  ;;  %v1288_v10 = vpop.permute.xlu2 %1287  ;;  %v6280_v21 = vmul.f32 %v5479_v61, %v5169_v62 }
 0x3ad   :  { %v1780_v58 = vpop.permute.xlu1 %1779  ;;  %1301 = vst.msk [vmem:[#allocation5 + $0x310] sm:$0xff] %vm342_vm11, %v1288_v10  ;;  %4103 = vset.pattern.permute.xlu2 %v7359_v50 }
 0x3ae   :  { %1796 = vst.msk [vmem:[#allocation5 + $0x2b0] sm:$0xff] %vm342_vm11, %v1780_v58  ;;  %2458 = vperm.xlu2 %4103, %v6159_v46  }
 0x3b3   :  { %v2400_v31 = vpop.permute.xlu0 %2399  ;;  %4107 = vset.pattern.permute.xlu1 %v7361_v9  ;;  %4104 = vset.pattern.permute.xlu0 %v7358_v22 }
 0x3b4   :  { %2416 = vst.msk [vmem:[#allocation5 + $0x2d8] sm:$0xff] %vm342_vm11, %v2400_v31  ;;  %v1660_v3 = vpop.permute.xlu2 %1659  ;;  %963 = vperm.xlu1 %4107, %v6202_v8   ;;  %2582 = vperm.xlu0 %4104, %v6159_v46  }
 0x3b5   :  { %v2152_v55 = vpop.permute.xlu1 %2151  ;;  %1673 = vst.msk [vmem:[#allocation5 + $0x328] sm:$0xff] %vm342_vm11, %v1660_v3 }
 0x3b6   :  { %2168 = vst.msk [vmem:[#allocation5 + $0x2c8] sm:$0xff] %vm342_vm11, %v2152_v55  ;;  %4106 = vset.pattern.permute.xlu2 %v4802_v13 }
 0x3b7   :  { %2830 = vperm.xlu2 %4106, %v6159_v46   ;;  %v6260_v46 = vpop.f32.mrf.mxu3 }
 0x3bb   :  { %v2772_v29 = vpop.permute.xlu0 %2771 }
 0x3bc   :  { %2788 = vst.msk [vmem:[#allocation5 + $0x2f0] sm:$0xff] %vm342_vm11, %v2772_v29  ;;  %v2032_v51 = vpop.permute.xlu2 %2031  ;;  %4110 = vset.pattern.permute.xlu1 %v7366_v19  ;;  %4109 = vset.pattern.permute.xlu0 %v7362_v1 }
 0x3bd   :  { %v2524_v49 = vpop.permute.xlu1 %2523  ;;  %2045 = vst.msk [vmem:[#allocation5 + $0x340] sm:$0xff] %vm342_vm11, %v2032_v51  ;;  %1346 = vperm.xlu1 %4110, %v6202_v8   ;;  %1222 = vperm.xlu0 %4109, %v6202_v8  }
 0x3be   :  { %2540 = vst.msk [vmem:[#allocation5 + $0x2e0] sm:$0xff] %vm342_vm11, %v2524_v49 }
 0x3bf   :  { %4108 = vset.pattern.permute.xlu2 %v7363_v5 }
 0x3c0   :  { %1098 = vperm.xlu2 %4108, %v6202_v8  }
 0x3c3   :  { %v1040_v12 = vpop.permute.xlu0 %1039 }
 0x3c4   :  { %1053 = vst.msk [vmem:[#allocation5 + $0x300] sm:$0xff] %vm342_vm11, %v1040_v12  ;;  %v2404_v15 = vpop.permute.xlu2 %2403  ;;  %v6304_v12 = vpop.f32.mrf.mxu3 }
 0x3c5   :  { %v1164_v34 = vpop.permute.xlu1 %1163  ;;  %2417 = vst.msk [vmem:[#allocation5 + $0x358] sm:$0xff] %vm342_vm11, %v2404_v15  ;;  %4113 = vset.pattern.permute.xlu1 %v7369_v27  ;;  %4112 = vset.pattern.permute.xlu0 %v7364_v59 }
 0x3c6   :  { %1177 = vst.msk [vmem:[#allocation5 + $0x308] sm:$0xff] %vm342_vm11, %v1164_v34  ;;  %1718 = vperm.xlu1 %4113, %v6202_v8   ;;  %1594 = vperm.xlu0 %4112, %v6202_v8  }
 0x3c8   :  { %4111 = vset.pattern.permute.xlu2 %v7365_v4 }
 0x3c9   :  { %1470 = vperm.xlu2 %4111, %v6202_v8  }
 0x3cb   :  { %v1412_v14 = vpop.permute.xlu0 %1411 }
 0x3cc   :  { %1425 = vst.msk [vmem:[#allocation5 + $0x318] sm:$0xff] %vm342_vm11, %v1412_v14  ;;  %v2776_v38 = vpop.permute.xlu2 %2775 }
 0x3cd   :  { %v1536_v20 = vpop.permute.xlu1 %1535  ;;  %2789 = vst.msk [vmem:[#allocation5 + $0x370] sm:$0xff] %vm342_vm11, %v2776_v38 }
 0x3ce   :  { %1549 = vst.msk [vmem:[#allocation5 + $0x320] sm:$0xff] %vm342_vm11, %v1536_v20  ;;  %4116 = vset.pattern.permute.xlu1 %v7372_v52  ;;  %4115 = vset.pattern.permute.xlu0 %v7367_v37 }
 0x3cf   :  { %2090 = vperm.xlu1 %4116, %v6202_v8   ;;  %1966 = vperm.xlu0 %4115, %v6202_v8  }
 0x3d1   :  { %4114 = vset.pattern.permute.xlu2 %v7368_v2 }
 0x3d2   :  { %1842 = vperm.xlu2 %4114, %v6202_v8  }
 0x3d3   :  { %v1784_v41 = vpop.permute.xlu0 %1783 }
 0x3d4   :  { %1797 = vst.msk [vmem:[#allocation5 + $0x330] sm:$0xff] %vm342_vm11, %v1784_v41  ;;  %v1045_v47 = vpop.permute.xlu2 %1044  ;;  %v6319_v41 = vpop.f32.mrf.mxu3 }
 0x3d5   :  { %v1908_v11 = vpop.permute.xlu1 %1907  ;;  %1054 = vst.msk [vmem:[#allocation5 + $0x380] sm:$0xff] %vm342_vm11, %v1045_v47 }
 0x3d6   :  { %1921 = vst.msk [vmem:[#allocation5 + $0x338] sm:$0xff] %vm342_vm11, %v1908_v11 }
 0x3d7   :  { %4119 = vset.pattern.permute.xlu1 %v7359_v50  ;;  %4118 = vset.pattern.permute.xlu0 %v7370_v54 }
 0x3d8   :  { %2462 = vperm.xlu1 %4119, %v6202_v8   ;;  %2338 = vperm.xlu0 %4118, %v6202_v8  }
 0x3da   :  { %4117 = vset.pattern.permute.xlu2 %v7371_v40 }
 0x3db   :  { %v2156_v0 = vpop.permute.xlu0 %2155  ;;  %2214 = vperm.xlu2 %4117, %v6202_v8  }
 0x3dc   :  { %2169 = vst.msk [vmem:[#allocation5 + $0x348] sm:$0xff] %vm342_vm11, %v2156_v0  ;;  %v1416_v25 = vpop.permute.xlu2 %1415 }
 0x3dd   :  { %v2280_v53 = vpop.permute.xlu1 %2279  ;;  %1426 = vst.msk [vmem:[#allocation5 + $0x398] sm:$0xff] %vm342_vm11, %v1416_v25 }
 0x3de   :  { %2293 = vst.msk [vmem:[#allocation5 + $0x350] sm:$0xff] %vm342_vm11, %v2280_v53 }
 0x3e0   :  { %4122 = vset.pattern.permute.xlu1 %v4802_v13  ;;  %4121 = vset.pattern.permute.xlu0 %v7357_v60 }
 0x3e1   :  { %2834 = vperm.xlu1 %4122, %v6202_v8   ;;  %2710 = vperm.xlu0 %4121, %v6202_v8  }
 0x3e3   :  { %v2528_v26 = vpop.permute.xlu0 %2527  ;;  %4120 = vset.pattern.permute.xlu2 %v7358_v22 }
 0x3e4   :  { %2541 = vst.msk [vmem:[#allocation5 + $0x360] sm:$0xff] %vm342_vm11, %v2528_v26  ;;  %v1788_v24 = vpop.permute.xlu2 %1787  ;;  %2586 = vperm.xlu2 %4120, %v6202_v8  }
 0x3e5   :  { %v2652_v43 = vpop.permute.xlu1 %2651  ;;  %1798 = vst.msk [vmem:[#allocation5 + $0x3b0] sm:$0xff] %vm342_vm11, %v1788_v24 }
 0x3e6   :  { %2665 = vst.msk [vmem:[#allocation5 + $0x368] sm:$0xff] %vm342_vm11, %v2652_v43 }
 0x3e9   :  { %4124 = vset.pattern.permute.xlu1 %v7363_v5  ;;  %4158 = vset.pattern.permute.xlu0 %v7366_v19 }
 0x3ea   :  { %1102 = vperm.xlu1 %4124, %v6260_v46   ;;  %1358 = vperm.xlu0 %4158, %v6319_v41  }
 0x3eb   :  { %v1168_v17 = vpop.permute.xlu0 %1167 }
 0x3ec   :  { %1178 = vst.msk [vmem:[#allocation5 + $0x388] sm:$0xff] %vm342_vm11, %v1168_v17  ;;  %v2160_v33 = vpop.permute.xlu2 %2159  ;;  %4123 = vset.pattern.permute.xlu2 %v7361_v9 }
 0x3ed   :  { %v1292_v30 = vpop.permute.xlu1 %1291  ;;  %2170 = vst.msk [vmem:[#allocation5 + $0x3c8] sm:$0xff] %vm342_vm11, %v2160_v33  ;;  %968 = vperm.xlu2 %4123, %v6260_v46  }
 0x3ee   :  { %1302 = vst.msk [vmem:[#allocation5 + $0x390] sm:$0xff] %vm342_vm11, %v1292_v30 }
 0x3f2   :  { %4127 = vset.pattern.permute.xlu1 %v7365_v4  ;;  %4161 = vset.pattern.permute.xlu0 %v7369_v27 }
 0x3f3   :  { %v1540_v42 = vpop.permute.xlu0 %1539  ;;  %1474 = vperm.xlu1 %4127, %v6260_v46   ;;  %1730 = vperm.xlu0 %4161, %v6319_v41  }
 0x3f4   :  { %1550 = vst.msk [vmem:[#allocation5 + $0x3a0] sm:$0xff] %vm342_vm11, %v1540_v42  ;;  %v2532_v48 = vpop.permute.xlu2 %2531 }
 0x3f5   :  { %v1664_v39 = vpop.permute.xlu1 %1663  ;;  %2542 = vst.msk [vmem:[#allocation5 + $0x3e0] sm:$0xff] %vm342_vm11, %v2532_v48  ;;  %4125 = vset.pattern.permute.xlu2 %v7362_v1 }
 0x3f6   :  { %1674 = vst.msk [vmem:[#allocation5 + $0x3a8] sm:$0xff] %vm342_vm11, %v1664_v39  ;;  %1226 = vperm.xlu2 %4125, %v6260_v46  }
 0x3fb   :  { %v1912_v23 = vpop.permute.xlu0 %1911  ;;  %4130 = vset.pattern.permute.xlu1 %v7368_v2  ;;  %4164 = vset.pattern.permute.xlu0 %v7372_v52 }
 0x3fc   :  { %1922 = vst.msk [vmem:[#allocation5 + $0x3b8] sm:$0xff] %vm342_vm11, %v1912_v23  ;;  %v954_v58 = vpop.permute.xlu2 %953  ;;  %1846 = vperm.xlu1 %4130, %v6260_v46   ;;  %2102 = vperm.xlu0 %4164, %v6319_v41  }
 0x3fd   :  { %v2036_v44 = vpop.permute.xlu1 %2035  ;;  %v991_v10 = vmul.f32 %v954_v58, %v6280_v21 }
 0x3fe   :  { %2046 = vst.msk [vmem:[#allocation5 + $0x3c0] sm:$0xff] %vm342_vm11, %v2036_v44  ;;  %4126 = vset.pattern.permute.xlu2 %v7366_v19 }
 0x3ff   :  { %999 = vst.msk [vmem:[#allocation4] sm:$0xff] %vm342_vm11, %v991_v10  ;;  %1350 = vperm.xlu2 %4126, %v6260_v46   ;;  %v6350_v10 = vmul.f32 %v5544_v57, %v5173_v63 }
 0x403   :  { %v2284_v31 = vpop.permute.xlu0 %2283 }
 0x404   :  { %2294 = vst.msk [vmem:[#allocation5 + $0x3d0] sm:$0xff] %vm342_vm11, %v2284_v31  ;;  %v1215_v55 = vpop.permute.xlu2 %1214  ;;  %4133 = vset.pattern.permute.xlu1 %v7371_v40  ;;  %4167 = vset.pattern.permute.xlu0 %v7359_v50 }
 0x405   :  { %v2408_v61 = vpop.permute.xlu1 %2407  ;;  %v1245_v3 = vmul.f32 %v1215_v55, %v6280_v21  ;;  %2218 = vperm.xlu1 %4133, %v6260_v46   ;;  %2474 = vperm.xlu0 %4167, %v6319_v41  }
 0x406   :  { %2418 = vst.msk [vmem:[#allocation5 + $0x3d8] sm:$0xff] %vm342_vm11, %v2408_v61 }
 0x407   :  { %1254 = vst.msk [vmem:[#allocation4 + $0x10] sm:$0xff] %vm342_vm11, %v1245_v3  ;;  %4128 = vset.pattern.permute.xlu2 %v7364_v59 }
 0x408   :  { %1598 = vperm.xlu2 %4128, %v6260_v46  }
 0x40b   :  { %v2656_v49 = vpop.permute.xlu0 %2655 }
 0x40c   :  { %2666 = vst.msk [vmem:[#allocation5 + $0x3e8] sm:$0xff] %vm342_vm11, %v2656_v49  ;;  %v1587_v51 = vpop.permute.xlu2 %1586 }
 0x40d   :  { %v2780_v29 = vpop.permute.xlu1 %2779  ;;  %v1617_v34 = vmul.f32 %v1587_v51, %v6280_v21  ;;  %4136 = vset.pattern.permute.xlu1 %v7358_v22  ;;  %4171 = vset.pattern.permute.xlu0 %v7363_v5 }
 0x40e   :  { %2790 = vst.msk [vmem:[#allocation5 + $0x3f0] sm:$0xff] %vm342_vm11, %v2780_v29  ;;  %2590 = vperm.xlu1 %4136, %v6260_v46  }
 0x40f   :  { %1626 = vst.msk [vmem:[#allocation4 + $0x28] sm:$0xff] %vm342_vm11, %v1617_v34 }
 0x410   :  { %4129 = vset.pattern.permute.xlu2 %v7369_v27 }
 0x411   :  { %1722 = vperm.xlu2 %4129, %v6260_v46  }
 0x413   :  { %v1339_v15 = vpop.permute.xlu0 %1338 }
 0x414   :  { %v1369_v14 = vmul.f32 %v1339_v15, %v6280_v21  ;;  %v1959_v11 = vpop.permute.xlu2 %1958 }
 0x415   :  { %v1091_v20 = vpop.permute.xlu1 %1090  ;;  %v1989_v8 = vmul.f32 %v1959_v11, %v6280_v21 }
 0x416   :  { %v1121_v38 = vmul.f32 %v1091_v20, %v6280_v21  ;;  %1378 = vst.msk [vmem:[#allocation4 + $0x18] sm:$0xff] %vm342_vm11, %v1369_v14  ;;  %4141 = vset.pattern.permute.xlu1 %v7362_v1  ;;  %v6375_v14 = vpop.f32.mrf.mxu3 }
 0x417   :  { %1998 = vst.msk [vmem:[#allocation4 + $0x40] sm:$0xff] %vm342_vm11, %v1989_v8  ;;  %1230 = vperm.xlu1 %4141, %v6304_v12   ;;  %1114 = vperm.xlu0 %4171, %v6375_v14  }
 0x418   :  { %1130 = vst.msk [vmem:[#allocation4 + $0x8] sm:$0xff] %vm342_vm11, %v1121_v38 }
 0x419   :  { %4131 = vset.pattern.permute.xlu2 %v7367_v37 }
 0x41a   :  { %1970 = vperm.xlu2 %4131, %v6260_v46  }
 0x41b   :  { %v1711_v47 = vpop.permute.xlu0 %1710 }
 0x41c   :  { %v1741_v0 = vmul.f32 %v1711_v47, %v6280_v21  ;;  %v2331_v43 = vpop.permute.xlu2 %2330 }
 0x41d   :  { %v1463_v53 = vpop.permute.xlu1 %1462  ;;  %v2361_v26 = vmul.f32 %v2331_v43, %v6280_v21 }
 0x41e   :  { %v1493_v25 = vmul.f32 %v1463_v53, %v6280_v21  ;;  %1750 = vst.msk [vmem:[#allocation4 + $0x30] sm:$0xff] %vm342_vm11, %v1741_v0 }
 0x41f   :  { %2370 = vst.msk [vmem:[#allocation4 + $0x58] sm:$0xff] %vm342_vm11, %v2361_v26  ;;  %4142 = vset.pattern.permute.xlu1 %v7366_v19  ;;  %4174 = vset.pattern.permute.xlu0 %v7365_v4 }
 0x420   :  { %1502 = vst.msk [vmem:[#allocation4 + $0x20] sm:$0xff] %vm342_vm11, %v1493_v25  ;;  %1354 = vperm.xlu1 %4142, %v6304_v12   ;;  %1486 = vperm.xlu0 %4174, %v6375_v14  }
 0x422   :  { %4132 = vset.pattern.permute.xlu2 %v7372_v52 }
 0x423   :  { %v2083_v24 = vpop.permute.xlu0 %2082  ;;  %2094 = vperm.xlu2 %4132, %v6260_v46  }
 0x424   :  { %v2113_v17 = vmul.f32 %v2083_v24, %v6280_v21  ;;  %v2703_v39 = vpop.permute.xlu2 %2702 }
 0x425   :  { %v1835_v30 = vpop.permute.xlu1 %1834  ;;  %v2733_v42 = vmul.f32 %v2703_v39, %v6280_v21 }
 0x426   :  { %v1865_v33 = vmul.f32 %v1835_v30, %v6280_v21  ;;  %2122 = vst.msk [vmem:[#allocation4 + $0x48] sm:$0xff] %vm342_vm11, %v2113_v17 }
 0x427   :  { %2742 = vst.msk [vmem:[#allocation4 + $0x70] sm:$0xff] %vm342_vm11, %v2733_v42 }
 0x428   :  { %1874 = vst.msk [vmem:[#allocation4 + $0x38] sm:$0xff] %vm342_vm11, %v1865_v33  ;;  %4144 = vset.pattern.permute.xlu1 %v7364_v59  ;;  %4177 = vset.pattern.permute.xlu0 %v7368_v2 }
 0x429   :  { %1602 = vperm.xlu1 %4144, %v6304_v12   ;;  %1858 = vperm.xlu0 %4177, %v6375_v14  }
 0x42b   :  { %v2455_v48 = vpop.permute.xlu0 %2454  ;;  %4134 = vset.pattern.permute.xlu2 %v7370_v54 }
 0x42c   :  { %v2485_v23 = vmul.f32 %v2455_v48, %v6280_v21  ;;  %v1343_v61 = vpop.permute.xlu2 %1342  ;;  %2342 = vperm.xlu2 %4134, %v6260_v46  }
 0x42d   :  { %v2207_v44 = vpop.permute.xlu1 %2206  ;;  %v1370_v31 = vmul.f32 %v1343_v61, %v6350_v10 }
 0x42e   :  { %v2237_v58 = vmul.f32 %v2207_v44, %v6280_v21  ;;  %2494 = vst.msk [vmem:[#allocation4 + $0x60] sm:$0xff] %vm342_vm11, %v2485_v23  ;;  %v6415_v23 = vmul.f32 %v5640_v18, %v5218_v7 }
 0x42f   :  { %1379 = vst.msk [vmem:[#allocation4 + $0x98] sm:$0xff] %vm342_vm11, %v1370_v31 }
 0x430   :  { %2246 = vst.msk [vmem:[#allocation4 + $0x50] sm:$0xff] %vm342_vm11, %v2237_v58 }
 0x431   :  { %4145 = vset.pattern.permute.xlu1 %v7369_v27  ;;  %4180 = vset.pattern.permute.xlu0 %v7371_v40 }
 0x432   :  { %1726 = vperm.xlu1 %4145, %v6304_v12   ;;  %2230 = vperm.xlu0 %4180, %v6375_v14  }
 0x433   :  { %v2827_v57 = vpop.permute.xlu0 %2826 }
 0x434   :  { %v2857_v3 = vmul.f32 %v2827_v57, %v6280_v21  ;;  %v1715_v49 = vpop.permute.xlu2 %1714  ;;  %4135 = vset.pattern.permute.xlu2 %v7359_v50 }
 0x435   :  { %v2579_v55 = vpop.permute.xlu1 %2578  ;;  %v1742_v51 = vmul.f32 %v1715_v49, %v6350_v10  ;;  %2466 = vperm.xlu2 %4135, %v6260_v46  }
 0x436   :  { %v2609_v29 = vmul.f32 %v2579_v55, %v6280_v21  ;;  %2866 = vst.msk [vmem:[#allocation4 + $0x78] sm:$0xff] %vm342_vm11, %v2857_v3 }
 0x437   :  { %1751 = vst.msk [vmem:[#allocation4 + $0xb0] sm:$0xff] %vm342_vm11, %v1742_v51 }
 0x438   :  { %2618 = vst.msk [vmem:[#allocation4 + $0x68] sm:$0xff] %vm342_vm11, %v2609_v29 }
 0x43a   :  { %4147 = vset.pattern.permute.xlu1 %v7367_v37  ;;  %4183 = vset.pattern.permute.xlu0 %v7358_v22 }
 0x43b   :  { %v959_v34 = vpop.permute.xlu0 %958  ;;  %1974 = vperm.xlu1 %4147, %v6304_v12   ;;  %2602 = vperm.xlu0 %4183, %v6375_v14  }
 0x43c   :  { %v992_v20 = vmul.f32 %v959_v34, %v6350_v10  ;;  %v2087_v38 = vpop.permute.xlu2 %2086 }
 0x43d   :  { %v1219_v21 = vpop.permute.xlu1 %1218  ;;  %v2114_v11 = vmul.f32 %v2087_v38, %v6350_v10  ;;  %4137 = vset.pattern.permute.xlu2 %v7357_v60  ;;  %v6445_v38 = vpop.f32.mrf.mxu3 }
 0x43e   :  { %v1246_v15 = vmul.f32 %v1219_v21, %v6350_v10  ;;  %1000 = vst.msk [vmem:[#allocation4 + $0x80] sm:$0xff] %vm342_vm11, %v992_v20  ;;  %2714 = vperm.xlu2 %4137, %v6260_v46  }
 0x43f   :  { %2123 = vst.msk [vmem:[#allocation4 + $0xc8] sm:$0xff] %vm342_vm11, %v2114_v11 }
 0x440   :  { %1255 = vst.msk [vmem:[#allocation4 + $0x90] sm:$0xff] %vm342_vm11, %v1246_v15 }
 0x443   :  { %v1095_v47 = vpop.permute.xlu0 %1094  ;;  %4148 = vset.pattern.permute.xlu1 %v7372_v52  ;;  %4187 = vset.pattern.permute.xlu0 %v7362_v1 }
 0x444   :  { %v1122_v0 = vmul.f32 %v1095_v47, %v6350_v10  ;;  %v2459_v25 = vpop.permute.xlu2 %2458  ;;  %2098 = vperm.xlu1 %4148, %v6304_v12   ;;  %1242 = vperm.xlu0 %4187, %v6445_v38  }
 0x445   :  { %v1591_v8 = vpop.permute.xlu1 %1590  ;;  %v2486_v43 = vmul.f32 %v2459_v25, %v6350_v10 }
 0x446   :  { %v1618_v53 = vmul.f32 %v1591_v8, %v6350_v10  ;;  %1131 = vst.msk [vmem:[#allocation4 + $0x88] sm:$0xff] %vm342_vm11, %v1122_v0  ;;  %4138 = vset.pattern.permute.xlu2 %v4802_v13 }
 0x447   :  { %2495 = vst.msk [vmem:[#allocation4 + $0xe0] sm:$0xff] %vm342_vm11, %v2486_v43  ;;  %2838 = vperm.xlu2 %4138, %v6260_v46  }
 0x448   :  { %1627 = vst.msk [vmem:[#allocation4 + $0xa8] sm:$0xff] %vm342_vm11, %v1618_v53 }
 0x44b   :  { %v1467_v24 = vpop.permute.xlu0 %1466 }
 0x44c   :  { %v1494_v17 = vmul.f32 %v1467_v24, %v6350_v10  ;;  %v2831_v33 = vpop.permute.xlu2 %2830  ;;  %4150 = vset.pattern.permute.xlu1 %v7370_v54  ;;  %4190 = vset.pattern.permute.xlu0 %v7364_v59 }
 0x44d   :  { %v1963_v26 = vpop.permute.xlu1 %1962  ;;  %v2858_v39 = vmul.f32 %v2831_v33, %v6350_v10  ;;  %2346 = vperm.xlu1 %4150, %v6304_v12   ;;  %1614 = vperm.xlu0 %4190, %v6445_v38  }
 0x44e   :  { %v1990_v30 = vmul.f32 %v1963_v26, %v6350_v10  ;;  %1503 = vst.msk [vmem:[#allocation4 + $0xa0] sm:$0xff] %vm342_vm11, %v1494_v17 }
 0x44f   :  { %2867 = vst.msk [vmem:[#allocation4 + $0xf8] sm:$0xff] %vm342_vm11, %v2858_v39  ;;  %4139 = vset.pattern.permute.xlu2 %v7361_v9 }
 0x450   :  { %1999 = vst.msk [vmem:[#allocation4 + $0xc0] sm:$0xff] %vm342_vm11, %v1990_v30  ;;  %973 = vperm.xlu2 %4139, %v6304_v12  }
 0x453   :  { %v1839_v42 = vpop.permute.xlu0 %1838 }
 0x454   :  { %v1866_v44 = vmul.f32 %v1839_v42, %v6350_v10  ;;  %v1099_v58 = vpop.permute.xlu2 %1098 }
 0x455   :  { %v2335_v46 = vpop.permute.xlu1 %2334  ;;  %v1123_v61 = vmul.f32 %v1099_v58, %v6415_v23  ;;  %4151 = vset.pattern.permute.xlu1 %v7359_v50  ;;  %4193 = vset.pattern.permute.xlu0 %v7367_v37 }
 0x456   :  { %v2362_v48 = vmul.f32 %v2335_v46, %v6350_v10  ;;  %1875 = vst.msk [vmem:[#allocation4 + $0xb8] sm:$0xff] %vm342_vm11, %v1866_v44  ;;  %2470 = vperm.xlu1 %4151, %v6304_v12   ;;  %1986 = vperm.xlu0 %4193, %v6445_v38  }
 0x457   :  { %1132 = vst.msk [vmem:[#allocation4 + $0x108] sm:$0xff] %vm342_vm11, %v1123_v61 }
 0x458   :  { %2371 = vst.msk [vmem:[#allocation4 + $0xd8] sm:$0xff] %vm342_vm11, %v2362_v48  ;;  %4140 = vset.pattern.permute.xlu2 %v7363_v5  ;;  %v6475_v48 = vmul.f32 %v5721_v32, %v5221_v45 }
 0x459   :  { %1106 = vperm.xlu2 %4140, %v6304_v12  }
 0x45b   :  { %v2211_v57 = vpop.permute.xlu0 %2210 }
 0x45c   :  { %v2238_v55 = vmul.f32 %v2211_v57, %v6350_v10  ;;  %v1471_v3 = vpop.permute.xlu2 %1470 }
 0x45d   :  { %v2707_v31 = vpop.permute.xlu1 %2706  ;;  %v1495_v29 = vmul.f32 %v1471_v3, %v6415_v23 }
 0x45e   :  { %v2734_v18 = vmul.f32 %v2707_v31, %v6350_v10  ;;  %2247 = vst.msk [vmem:[#allocation4 + $0xd0] sm:$0xff] %vm342_vm11, %v2238_v55  ;;  %4153 = vset.pattern.permute.xlu1 %v7357_v60  ;;  %4196 = vset.pattern.permute.xlu0 %v7370_v54 }
 0x45f   :  { %1504 = vst.msk [vmem:[#allocation4 + $0x120] sm:$0xff] %vm342_vm11, %v1495_v29  ;;  %2718 = vperm.xlu1 %4153, %v6304_v12   ;;  %2358 = vperm.xlu0 %4196, %v6445_v38  }
 0x460   :  { %2743 = vst.msk [vmem:[#allocation4 + $0xf0] sm:$0xff] %vm342_vm11, %v2734_v18 }
 0x461   :  { %4143 = vset.pattern.permute.xlu2 %v7365_v4 }
 0x462   :  { %1478 = vperm.xlu2 %4143, %v6304_v12  }
 0x463   :  { %v2583_v49 = vpop.permute.xlu0 %2582 }
 0x464   :  { %v2610_v21 = vmul.f32 %v2583_v49, %v6350_v10  ;;  %v1843_v15 = vpop.permute.xlu2 %1842 }
 0x465   :  { %v964_v51 = vpop.permute.xlu1 %963  ;;  %v1867_v20 = vmul.f32 %v1843_v15, %v6415_v23 }
 0x466   :  { %v993_v34 = vmul.f32 %v964_v51, %v6415_v23  ;;  %2619 = vst.msk [vmem:[#allocation4 + $0xe8] sm:$0xff] %vm342_vm11, %v2610_v21 }
 0x467   :  { %1876 = vst.msk [vmem:[#allocation4 + $0x138] sm:$0xff] %vm342_vm11, %v1867_v20  ;;  %4154 = vset.pattern.permute.xlu1 %v4802_v13  ;;  %4199 = vset.pattern.permute.xlu0 %v7357_v60 }
 0x468   :  { %1001 = vst.msk [vmem:[#allocation4 + $0x100] sm:$0xff] %vm342_vm11, %v993_v34  ;;  %2842 = vperm.xlu1 %4154, %v6304_v12   ;;  %2730 = vperm.xlu0 %4199, %v6445_v38  }
 0x46a   :  { %4146 = vset.pattern.permute.xlu2 %v7368_v2 }
 0x46b   :  { %v1223_v10 = vpop.permute.xlu0 %1222  ;;  %1850 = vperm.xlu2 %4146, %v6304_v12  }
 0x46c   :  { %v1247_v8 = vmul.f32 %v1223_v10, %v6415_v23  ;;  %v2215_v53 = vpop.permute.xlu2 %2214 }
 0x46d   :  { %v1347_v11 = vpop.permute.xlu1 %1346  ;;  %v2239_v0 = vmul.f32 %v2215_v53, %v6415_v23 }
 0x46e   :  { %v1371_v47 = vmul.f32 %v1347_v11, %v6415_v23  ;;  %1256 = vst.msk [vmem:[#allocation4 + $0x110] sm:$0xff] %vm342_vm11, %v1247_v8 }
 0x46f   :  { %2248 = vst.msk [vmem:[#allocation4 + $0x150] sm:$0xff] %vm342_vm11, %v2239_v0 }
 0x470   :  { %1380 = vst.msk [vmem:[#allocation4 + $0x118] sm:$0xff] %vm342_vm11, %v1371_v47  ;;  %4155 = vset.pattern.permute.xlu1 %v7361_v9  ;;  %4200 = vset.pattern.permute.xlu0 %v4802_v13 }
 0x471   :  { %978 = vperm.xlu1 %4155, %v6319_v41   ;;  %2846 = vperm.xlu0 %4200, %v6319_v41  }
 0x473   :  { %v1595_v25 = vpop.permute.xlu0 %1594  ;;  %4149 = vset.pattern.permute.xlu2 %v7371_v40 }
 0x474   :  { %v1619_v26 = vmul.f32 %v1595_v25, %v6415_v23  ;;  %v2587_v30 = vpop.permute.xlu2 %2586  ;;  %2222 = vperm.xlu2 %4149, %v6304_v12  }
 0x475   :  { %v1719_v43 = vpop.permute.xlu1 %1718  ;;  %v2611_v17 = vmul.f32 %v2587_v30, %v6415_v23 }
 0x476   :  { %v1743_v24 = vmul.f32 %v1719_v43, %v6415_v23  ;;  %1628 = vst.msk [vmem:[#allocation4 + $0x128] sm:$0xff] %vm342_vm11, %v1619_v26 }
 0x477   :  { %2620 = vst.msk [vmem:[#allocation4 + $0x168] sm:$0xff] %vm342_vm11, %v2611_v17 }
 0x478   :  { %1752 = vst.msk [vmem:[#allocation4 + $0x130] sm:$0xff] %vm342_vm11, %v1743_v24 }
 0x479   :  { %4156 = vset.pattern.permute.xlu1 %v7363_v5  ;;  %2875 = vperm.xlu0 %4200, %v5286_v36  }
 0x47a   :  { %1110 = vperm.xlu1 %4156, %v6319_v41  }
 0x47b   :  { %v1967_v33 = vpop.permute.xlu0 %1966 }
 0x47c   :  { %v1991_v46 = vmul.f32 %v1967_v33, %v6415_v23  ;;  %v969_v44 = vpop.permute.xlu2 %968  ;;  %4152 = vset.pattern.permute.xlu2 %v7358_v22 }
 0x47d   :  { %v2091_v39 = vpop.permute.xlu1 %2090  ;;  %v994_v58 = vmul.f32 %v969_v44, %v6475_v48  ;;  %2594 = vperm.xlu2 %4152, %v6304_v12  }
 0x47e   :  { %v2115_v42 = vmul.f32 %v2091_v39, %v6415_v23  ;;  %2000 = vst.msk [vmem:[#allocation4 + $0x140] sm:$0xff] %vm342_vm11, %v1991_v46 }
 0x47f   :  { %1002 = vst.msk [vmem:[#allocation4 + $0x180] sm:$0xff] %vm342_vm11, %v994_v58 }
 0x480   :  { %2124 = vst.msk [vmem:[#allocation4 + $0x148] sm:$0xff] %vm342_vm11, %v2115_v42 }
 0x481   :  { %2887 = vperm.xlu0 %4200, %v5416_v16  }
 0x482   :  { %4159 = vset.pattern.permute.xlu1 %v7365_v4 }
 0x483   :  { %v2339_v32 = vpop.permute.xlu0 %2338  ;;  %1482 = vperm.xlu1 %4159, %v6319_v41  }
 0x484   :  { %v2363_v31 = vmul.f32 %v2339_v32, %v6415_v23  ;;  %v1227_v18 = vpop.permute.xlu2 %1226  ;;  %v7378_v32 = vld [vmem:[#allocation31_spill] sm:$0xff] }
 0x485   :  { %v2463_v61 = vpop.permute.xlu1 %2462  ;;  %v1248_v55 = vmul.f32 %v1227_v18, %v6475_v48  ;;  %4157 = vset.pattern.permute.xlu2 %v7362_v1 }
 0x486   :  { %v2487_v57 = vmul.f32 %v2463_v61, %v6415_v23  ;;  %2372 = vst.msk [vmem:[#allocation4 + $0x158] sm:$0xff] %vm342_vm11, %v2363_v31  ;;  %1234 = vperm.xlu2 %4157, %v6319_v41   ;;  %v7379_v61 = vld [vmem:[#allocation39_spill] sm:$0xff] }
 0x487   :  { %1257 = vst.msk [vmem:[#allocation4 + $0x190] sm:$0xff] %vm342_vm11, %v1248_v55  ;;  %v6558_v31 = vmul.f32 %v7379_v61, %v7378_v32 }
 0x488   :  { %2496 = vst.msk [vmem:[#allocation4 + $0x160] sm:$0xff] %vm342_vm11, %v2487_v57 }
 0x48b   :  { %v2711_v12 = vpop.permute.xlu0 %2710  ;;  %4162 = vset.pattern.permute.xlu1 %v7368_v2 }
 0x48c   :  { %v2735_v29 = vmul.f32 %v2711_v12, %v6415_v23  ;;  %v1351_v51 = vpop.permute.xlu2 %1350  ;;  %1854 = vperm.xlu1 %4162, %v6319_v41  }
 0x48d   :  { %v2835_v3 = vpop.permute.xlu1 %2834  ;;  %v1372_v21 = vmul.f32 %v1351_v51, %v6475_v48 }
 0x48e   :  { %v2859_v49 = vmul.f32 %v2835_v3, %v6415_v23  ;;  %2744 = vst.msk [vmem:[#allocation4 + $0x170] sm:$0xff] %vm342_vm11, %v2735_v29  ;;  %4160 = vset.pattern.permute.xlu2 %v7364_v59  ;;  %v6512_v23 = vmul.f32 %v5881_v6, %v5249_v56  ;;  %v7380_v29 = vld [vmem:[#allocation28_spill] sm:$0xff] }
 0x48f   :  { %1381 = vst.msk [vmem:[#allocation4 + $0x198] sm:$0xff] %vm342_vm11, %v1372_v21  ;;  %1606 = vperm.xlu2 %4160, %v6319_v41  }
 0x490   :  { %2868 = vst.msk [vmem:[#allocation4 + $0x178] sm:$0xff] %vm342_vm11, %v2859_v49  ;;  %v7381_v49 = vld [vmem:[#allocation37_spill] sm:$0xff] }
 0x491   :  { %v6572_v51 = vmul.f32 %v7381_v49, %v7380_v29 }
 0x493   :  { %v1359_v15 = vpop.permute.xlu0 %1358 }
 0x494   :  { %v1374_v10 = vmul.f32 %v1359_v15, %v6512_v23  ;;  %v1599_v11 = vpop.permute.xlu2 %1598  ;;  %4165 = vset.pattern.permute.xlu1 %v7371_v40 }
 0x495   :  { %v1103_v34 = vpop.permute.xlu1 %1102  ;;  %v1620_v8 = vmul.f32 %v1599_v11, %v6475_v48  ;;  %2226 = vperm.xlu1 %4165, %v6319_v41  }
 0x496   :  { %v1124_v20 = vmul.f32 %v1103_v34, %v6475_v48  ;;  %1383 = vst.msk [vmem:[#allocation4 + $0x298] sm:$0xff] %vm342_vm11, %v1374_v10 }
 0x497   :  { %1629 = vst.msk [vmem:[#allocation4 + $0x1a8] sm:$0xff] %vm342_vm11, %v1620_v8  ;;  %4163 = vset.pattern.permute.xlu2 %v7367_v37 }
 0x498   :  { %1133 = vst.msk [vmem:[#allocation4 + $0x188] sm:$0xff] %vm342_vm11, %v1124_v20  ;;  %1978 = vperm.xlu2 %4163, %v6319_v41  }
 0x49b   :  { %v1731_v47 = vpop.permute.xlu0 %1730 }
 0x49c   :  { %v1746_v0 = vmul.f32 %v1731_v47, %v6512_v23  ;;  %v1723_v25 = vpop.permute.xlu2 %1722 }
 0x49d   :  { %v1475_v6 = vpop.permute.xlu1 %1474  ;;  %v1744_v43 = vmul.f32 %v1723_v25, %v6475_v48  ;;  %4168 = vset.pattern.permute.xlu1 %v7358_v22 }
 0x49e   :  { %v1496_v53 = vmul.f32 %v1475_v6, %v6475_v48  ;;  %1755 = vst.msk [vmem:[#allocation4 + $0x2b0] sm:$0xff] %vm342_vm11, %v1746_v0  ;;  %2598 = vperm.xlu1 %4168, %v6319_v41  }
 0x49f   :  { %1753 = vst.msk [vmem:[#allocation4 + $0x1b0] sm:$0xff] %vm342_vm11, %v1744_v43 }
 0x4a0   :  { %1505 = vst.msk [vmem:[#allocation4 + $0x1a0] sm:$0xff] %vm342_vm11, %v1496_v53  ;;  %4166 = vset.pattern.permute.xlu2 %v7370_v54 }
 0x4a1   :  { %2350 = vperm.xlu2 %4166, %v6319_v41  }
 0x4a3   :  { %v2103_v24 = vpop.permute.xlu0 %2102 }
 0x4a4   :  { %v2118_v17 = vmul.f32 %v2103_v24, %v6512_v23  ;;  %v1971_v33 = vpop.permute.xlu2 %1970 }
 0x4a5   :  { %v1847_v26 = vpop.permute.xlu1 %1846  ;;  %v1992_v36 = vmul.f32 %v1971_v33, %v6475_v48 }
 0x4a6   :  { %v1868_v30 = vmul.f32 %v1847_v26, %v6475_v48  ;;  %2127 = vst.msk [vmem:[#allocation4 + $0x2c8] sm:$0xff] %vm342_vm11, %v2118_v17  ;;  %4172 = vset.pattern.permute.xlu1 %v7362_v1  ;;  %v7377_v1 = vld [vmem:[#allocation38_spill] sm:$0xff] }
 0x4a7   :  { %2001 = vst.msk [vmem:[#allocation4 + $0x1c0] sm:$0xff] %vm342_vm11, %v1992_v36  ;;  %1238 = vperm.xlu1 %4172, %v6375_v14   ;;  %2899 = vperm.xlu0 %4200, %v7377_v1  }
 0x4a8   :  { %1877 = vst.msk [vmem:[#allocation4 + $0x1b8] sm:$0xff] %vm342_vm11, %v1868_v30 }
 0x4a9   :  { %4169 = vset.pattern.permute.xlu2 %v7357_v60 }
 0x4aa   :  { %2722 = vperm.xlu2 %4169, %v6319_v41  }
 0x4ab   :  { %v2475_v46 = vpop.permute.xlu0 %2474 }
 0x4ac   :  { %v2490_v44 = vmul.f32 %v2475_v46, %v6512_v23  ;;  %v2095_v58 = vpop.permute.xlu2 %2094 }
 0x4ad   :  { %v2219_v39 = vpop.permute.xlu1 %2218  ;;  %v2116_v16 = vmul.f32 %v2095_v58, %v6475_v48 }
 0x4ae   :  { %v2240_v42 = vmul.f32 %v2219_v39, %v6475_v48  ;;  %2499 = vst.msk [vmem:[#allocation4 + $0x2e0] sm:$0xff] %vm342_vm11, %v2490_v44 }
 0x4af   :  { %2125 = vst.msk [vmem:[#allocation4 + $0x1c8] sm:$0xff] %vm342_vm11, %v2116_v16  ;;  %4175 = vset.pattern.permute.xlu1 %v7364_v59 }
 0x4b0   :  { %2249 = vst.msk [vmem:[#allocation4 + $0x1d0] sm:$0xff] %vm342_vm11, %v2240_v42  ;;  %1610 = vperm.xlu1 %4175, %v6375_v14   ;;  %v7382_v42 = vld [vmem:[#allocation32_spill] sm:$0xff] }
 0x4b1   :  { %v6617_v44 = vmul.f32 %v6038_v35, %v7382_v42 }
 0x4b2   :  { %4170 = vset.pattern.permute.xlu2 %v7361_v9 }
 0x4b3   :  { %v1115_v18 = vpop.permute.xlu0 %1114  ;;  %983 = vperm.xlu2 %4170, %v6375_v14  }
 0x4b4   :  { %v1127_v41 = vmul.f32 %v1115_v18, %v6558_v31  ;;  %v2343_v12 = vpop.permute.xlu2 %2342 }
 0x4b5   :  { %v2591_v57 = vpop.permute.xlu1 %2590  ;;  %v2364_v3 = vmul.f32 %v2343_v12, %v6475_v48 }
 0x4b6   :  { %v2612_v55 = vmul.f32 %v2591_v57, %v6475_v48  ;;  %1136 = vst.msk [vmem:[#allocation4 + $0x308] sm:$0xff] %vm342_vm11, %v1127_v41 }
 0x4b7   :  { %2373 = vst.msk [vmem:[#allocation4 + $0x1d8] sm:$0xff] %vm342_vm11, %v2364_v3 }
 0x4b8   :  { %2621 = vst.msk [vmem:[#allocation4 + $0x1e8] sm:$0xff] %vm342_vm11, %v2612_v55  ;;  %4178 = vset.pattern.permute.xlu1 %v7367_v37 }
 0x4b9   :  { %1982 = vperm.xlu1 %4178, %v6375_v14  }
 0x4bb   :  { %v1487_v21 = vpop.permute.xlu0 %1486  ;;  %4173 = vset.pattern.permute.xlu2 %v7366_v19 }
 0x4bc   :  { %v1499_v15 = vmul.f32 %v1487_v21, %v6558_v31  ;;  %v2467_v20 = vpop.permute.xlu2 %2466  ;;  %1362 = vperm.xlu2 %4173, %v6375_v14  }
 0x4bd   :  { %v1231_v59 = vpop.permute.xlu1 %1230  ;;  %v2488_v10 = vmul.f32 %v2467_v20, %v6475_v48 }
 0x4be   :  { %v1249_v34 = vmul.f32 %v1231_v59, %v6572_v51  ;;  %1508 = vst.msk [vmem:[#allocation4 + $0x320] sm:$0xff] %vm342_vm11, %v1499_v15 }
 0x4bf   :  { %2497 = vst.msk [vmem:[#allocation4 + $0x1e0] sm:$0xff] %vm342_vm11, %v2488_v10 }
 0x4c0   :  { %1258 = vst.msk [vmem:[#allocation4 + $0x210] sm:$0xff] %vm342_vm11, %v1249_v34 }
 0x4c1   :  { %4181 = vset.pattern.permute.xlu1 %v7370_v54 }
 0x4c2   :  { %2354 = vperm.xlu1 %4181, %v6375_v14  }
 0x4c3   :  { %v1859_v8 = vpop.permute.xlu0 %1858 }
 0x4c4   :  { %v1871_v37 = vmul.f32 %v1859_v8, %v6558_v31  ;;  %v2715_v47 = vpop.permute.xlu2 %2714  ;;  %4176 = vset.pattern.permute.xlu2 %v7369_v27 }
 0x4c5   :  { %v1355_v11 = vpop.permute.xlu1 %1354  ;;  %v2736_v53 = vmul.f32 %v2715_v47, %v6475_v48  ;;  %1734 = vperm.xlu2 %4176, %v6375_v14  }
 0x4c6   :  { %v1373_v6 = vmul.f32 %v1355_v11, %v6572_v51  ;;  %1880 = vst.msk [vmem:[#allocation4 + $0x338] sm:$0xff] %vm342_vm11, %v1871_v37 }
 0x4c7   :  { %2745 = vst.msk [vmem:[#allocation4 + $0x1f0] sm:$0xff] %vm342_vm11, %v2736_v53 }
 0x4c8   :  { %1382 = vst.msk [vmem:[#allocation4 + $0x218] sm:$0xff] %vm342_vm11, %v1373_v6 }
 0x4ca   :  { %4184 = vset.pattern.permute.xlu1 %v7357_v60 }
 0x4cb   :  { %v2231_v43 = vpop.permute.xlu0 %2230  ;;  %2726 = vperm.xlu1 %4184, %v6375_v14  }
 0x4cc   :  { %v2243_v26 = vmul.f32 %v2231_v43, %v6558_v31  ;;  %v2839_v54 = vpop.permute.xlu2 %2838 }
 0x4cd   :  { %v1603_v0 = vpop.permute.xlu1 %1602  ;;  %v2860_v24 = vmul.f32 %v2839_v54, %v6475_v48  ;;  %4179 = vset.pattern.permute.xlu2 %v7372_v52 }
 0x4ce   :  { %v1621_v25 = vmul.f32 %v1603_v0, %v6572_v51  ;;  %2252 = vst.msk [vmem:[#allocation4 + $0x350] sm:$0xff] %vm342_vm11, %v2243_v26  ;;  %2106 = vperm.xlu2 %4179, %v6375_v14  }
 0x4cf   :  { %2869 = vst.msk [vmem:[#allocation4 + $0x1f8] sm:$0xff] %vm342_vm11, %v2860_v24  ;;  %v7384_v24 = vld [vmem:[#allocation36_spill] sm:$0xff] }
 0x4d0   :  { %1630 = vst.msk [vmem:[#allocation4 + $0x228] sm:$0xff] %vm342_vm11, %v1621_v25  ;;  %v7383_v25 = vld [vmem:[#allocation34_spill] sm:$0xff] }
 0x4d3   :  { %v2603_v33 = vpop.permute.xlu0 %2602  ;;  %4185 = vset.pattern.permute.xlu1 %v7361_v9 }
 0x4d4   :  { %v2615_v36 = vmul.f32 %v2603_v33, %v6558_v31  ;;  %v974_v39 = vpop.permute.xlu2 %973  ;;  %988 = vperm.xlu1 %4185, %v6445_v38  }
 0x4d5   :  { %v1727_v30 = vpop.permute.xlu1 %1726  ;;  %v995_v48 = vmul.f32 %v974_v39, %v6572_v51 }
 0x4d6   :  { %v1745_v17 = vmul.f32 %v1727_v30, %v6572_v51  ;;  %2624 = vst.msk [vmem:[#allocation4 + $0x368] sm:$0xff] %vm342_vm11, %v2615_v36  ;;  %4182 = vset.pattern.permute.xlu2 %v7359_v50 }
 0x4d7   :  { %1003 = vst.msk [vmem:[#allocation4 + $0x200] sm:$0xff] %vm342_vm11, %v995_v48  ;;  %2478 = vperm.xlu2 %4182, %v6375_v14   ;;  %v7386_v48 = vld [vmem:[#allocation35_spill] sm:$0xff] }
 0x4d8   :  { %1754 = vst.msk [vmem:[#allocation4 + $0x230] sm:$0xff] %vm342_vm11, %v1745_v17  ;;  %v7385_v17 = vld [vmem:[#allocation33_spill] sm:$0xff] }
 0x4db   :  { %v1243_v58 = vpop.permute.xlu0 %1242 }
 0x4dc   :  { %v1107_v16 = vpop.permute.xlu2 %1106  ;;  %v1252_v9 = vmul.f32 %v1243_v58, %v6617_v44  ;;  %4188 = vset.pattern.permute.xlu1 %v7366_v19 }
 0x4dd   :  { %v1975_v60 = vpop.permute.xlu1 %1974  ;;  %v1125_v1 = vmul.f32 %v1107_v16, %v6572_v51  ;;  %1366 = vperm.xlu1 %4188, %v6445_v38  }
 0x4de   :  { %v1993_v46 = vmul.f32 %v1975_v60, %v6572_v51  ;;  %1261 = vst.msk [vmem:[#allocation4 + $0x390] sm:$0xff] %vm342_vm11, %v1252_v9 }
 0x4df   :  { %1134 = vst.msk [vmem:[#allocation4 + $0x208] sm:$0xff] %vm342_vm11, %v1125_v1  ;;  %4186 = vset.pattern.permute.xlu2 %v7363_v5 }
 0x4e0   :  { %2002 = vst.msk [vmem:[#allocation4 + $0x240] sm:$0xff] %vm342_vm11, %v1993_v46  ;;  %1118 = vperm.xlu2 %4186, %v6445_v38  }
 0x4e3   :  { %v1615_v57 = vpop.permute.xlu0 %1614 }
 0x4e4   :  { %v1479_v61 = vpop.permute.xlu2 %1478  ;;  %v1624_v55 = vmul.f32 %v1615_v57, %v6617_v44 }
 0x4e5   :  { %v2099_v35 = vpop.permute.xlu1 %2098  ;;  %v1497_v18 = vmul.f32 %v1479_v61, %v6572_v51  ;;  %4191 = vset.pattern.permute.xlu1 %v7369_v27 }
 0x4e6   :  { %v2117_v32 = vmul.f32 %v2099_v35, %v6572_v51  ;;  %1633 = vst.msk [vmem:[#allocation4 + $0x3a8] sm:$0xff] %vm342_vm11, %v1624_v55  ;;  %1738 = vperm.xlu1 %4191, %v6445_v38  }
 0x4e7   :  { %1506 = vst.msk [vmem:[#allocation4 + $0x220] sm:$0xff] %vm342_vm11, %v1497_v18 }
 0x4e8   :  { %2126 = vst.msk [vmem:[#allocation4 + $0x248] sm:$0xff] %vm342_vm11, %v2117_v32  ;;  %4189 = vset.pattern.permute.xlu2 %v7365_v4 }
 0x4e9   :  { %1490 = vperm.xlu2 %4189, %v6445_v38  }
 0x4eb   :  { %v1987_v3 = vpop.permute.xlu0 %1986 }
 0x4ec   :  { %v1851_v41 = vpop.permute.xlu2 %1850  ;;  %v1996_v29 = vmul.f32 %v1987_v3, %v6617_v44 }
 0x4ed   :  { %v2347_v5 = vpop.permute.xlu1 %2346  ;;  %v1869_v12 = vmul.f32 %v1851_v41, %v6572_v51 }
 0x4ee   :  { %v2365_v19 = vmul.f32 %v2347_v5, %v6572_v51  ;;  %2005 = vst.msk [vmem:[#allocation4 + $0x3c0] sm:$0xff] %vm342_vm11, %v1996_v29  ;;  %4194 = vset.pattern.permute.xlu1 %v7372_v52 }
 0x4ef   :  { %1878 = vst.msk [vmem:[#allocation4 + $0x238] sm:$0xff] %vm342_vm11, %v1869_v12  ;;  %2110 = vperm.xlu1 %4194, %v6445_v38  }
 0x4f0   :  { %2374 = vst.msk [vmem:[#allocation4 + $0x258] sm:$0xff] %vm342_vm11, %v2365_v19 }
 0x4f1   :  { %4192 = vset.pattern.permute.xlu2 %v7368_v2 }
 0x4f2   :  { %1862 = vperm.xlu2 %4192, %v6445_v38  }
 0x4f3   :  { %v2359_v21 = vpop.permute.xlu0 %2358 }
 0x4f4   :  { %v2223_v49 = vpop.permute.xlu2 %2222  ;;  %v2368_v34 = vmul.f32 %v2359_v21, %v6617_v44 }
 0x4f5   :  { %v2471_v27 = vpop.permute.xlu1 %2470  ;;  %v2241_v59 = vmul.f32 %v2223_v49, %v6572_v51 }
 0x4f6   :  { %v2489_v4 = vmul.f32 %v2471_v27, %v6572_v51  ;;  %2377 = vst.msk [vmem:[#allocation4 + $0x3d8] sm:$0xff] %vm342_vm11, %v2368_v34 }
 0x4f7   :  { %2250 = vst.msk [vmem:[#allocation4 + $0x250] sm:$0xff] %vm342_vm11, %v2241_v59  ;;  %4197 = vset.pattern.permute.xlu1 %v7359_v50 }
 0x4f8   :  { %2498 = vst.msk [vmem:[#allocation4 + $0x260] sm:$0xff] %vm342_vm11, %v2489_v4  ;;  %2482 = vperm.xlu1 %4197, %v6445_v38  }
 0x4fa   :  { %4195 = vset.pattern.permute.xlu2 %v7371_v40 }
 0x4fb   :  { %2234 = vperm.xlu2 %4195, %v6445_v38   ;;  %v2731_v10 = vpop.permute.xlu0 %2730 }
 0x4fc   :  { %v2595_v2 = vpop.permute.xlu2 %2594  ;;  %v2740_v11 = vmul.f32 %v2731_v10, %v6617_v44 }
 0x4fd   :  { %v2719_v15 = vpop.permute.xlu1 %2718  ;;  %v2613_v20 = vmul.f32 %v2595_v2, %v6572_v51 }
 0x4fe   :  { %v2737_v52 = vmul.f32 %v2719_v15, %v6572_v51  ;;  %2749 = vst.msk [vmem:[#allocation4 + $0x3f0] sm:$0xff] %vm342_vm11, %v2740_v11 }
 0x4ff   :  { %2622 = vst.msk [vmem:[#allocation4 + $0x268] sm:$0xff] %vm342_vm11, %v2613_v20 }
 0x500   :  { %2746 = vst.msk [vmem:[#allocation4 + $0x270] sm:$0xff] %vm342_vm11, %v2737_v52  ;;  %4202 = vset.pattern.permute.xlu1 %v4802_v13 }
 0x501   :  { %2854 = vperm.xlu1 %4202, %v6445_v38  }
 0x503   :  { %4198 = vset.pattern.permute.xlu2 %v7358_v22  ;;  %v2847_v37 = vpop.permute.xlu0 %2846 }
 0x504   :  { %v1235_v50 = vpop.permute.xlu2 %1234  ;;  %2606 = vperm.xlu2 %4198, %v6445_v38  }
 0x505   :  { %v2843_v8 = vpop.permute.xlu1 %2842  ;;  %v1250_v40 = vmul.f32 %v1235_v50, %v6512_v23 }
 0x506   :  { %v2861_v6 = vmul.f32 %v2843_v8, %v6572_v51  ;;  %v2862_v51 = vmul.f32 %v2847_v37, %v6512_v23 }
 0x507   :  { %1259 = vst.msk [vmem:[#allocation4 + $0x290] sm:$0xff] %vm342_vm11, %v1250_v40 }
 0x508   :  { %2870 = vst.msk [vmem:[#allocation4 + $0x278] sm:$0xff] %vm342_vm11, %v2861_v6 }
 0x509   :  { %2871 = vst.msk [vmem:[#allocation4 + $0x2f8] sm:$0xff] %vm342_vm11, %v2862_v51  ;;  %2883 = vperm.xlu1 %4202, %v7383_v25  }
 0x50b   :  { %v2876_v38 = vpop.permute.xlu0 %2875 }
 0x50c   :  { %v1607_v0 = vpop.permute.xlu2 %1606  ;;  %4201 = vset.pattern.permute.xlu2 %v4802_v13  ;;  %2907 = vst.msk [vmem:[#allocation5 + $0x78] sm:$0xff] %vm342_vm11, %v2876_v38 }
 0x50d   :  { %v979_v47 = vpop.permute.xlu1 %978  ;;  %v1622_v22 = vmul.f32 %v1607_v0, %v6512_v23  ;;  %2850 = vperm.xlu2 %4201, %v6375_v14  }
 0x50e   :  { %v996_v53 = vmul.f32 %v979_v47, %v6512_v23 }
 0x50f   :  { %1631 = vst.msk [vmem:[#allocation4 + $0x2a8] sm:$0xff] %vm342_vm11, %v1622_v22 }
 0x510   :  { %1004 = vst.msk [vmem:[#allocation4 + $0x280] sm:$0xff] %vm342_vm11, %v996_v53 }
 0x511   :  { %2895 = vperm.xlu1 %4202, %v7384_v24  }
 0x513   :  { %v2888_v13 = vpop.permute.xlu0 %2887 }
 0x514   :  { %v1979_v54 = vpop.permute.xlu2 %1978  ;;  %2910 = vst.msk [vmem:[#allocation5 + $0x1f8] sm:$0xff] %vm342_vm11, %v2888_v13 }
 0x515   :  { %v1111_v43 = vpop.permute.xlu1 %1110  ;;  %v1994_v30 = vmul.f32 %v1979_v54, %v6512_v23  ;;  %2879 = vperm.xlu2 %4201, %v7385_v17  }
 0x516   :  { %v1126_v26 = vmul.f32 %v1111_v43, %v6512_v23 }
 0x517   :  { %2003 = vst.msk [vmem:[#allocation4 + $0x2c0] sm:$0xff] %vm342_vm11, %v1994_v30 }
 0x518   :  { %1135 = vst.msk [vmem:[#allocation4 + $0x288] sm:$0xff] %vm342_vm11, %v1126_v26 }
 0x51b   :  { %v2900_v60 = vpop.permute.xlu0 %2899 }
 0x51c   :  { %v2351_v36 = vpop.permute.xlu2 %2350  ;;  %2913 = vst.msk [vmem:[#allocation5 + $0x378] sm:$0xff] %vm342_vm11, %v2900_v60  ;;  %v6753_v60 = vmov 0.0  }
 0x51d   :  { %v1483_v14 = vpop.permute.xlu1 %1482  ;;  %v2366_v39 = vmul.f32 %v2351_v36, %v6512_v23  ;;  %2891 = vperm.xlu2 %4201, %v7386_v48  }
 0x51e   :  { %v1498_v33 = vmul.f32 %v1483_v14, %v6512_v23 }
 0x51f   :  { %2375 = vst.msk [vmem:[#allocation4 + $0x2d8] sm:$0xff] %vm342_vm11, %v2366_v39 }
 0x520   :  { %1507 = vst.msk [vmem:[#allocation4 + $0x2a0] sm:$0xff] %vm342_vm11, %v1498_v33 }
 0x524   :  { %v2723_v58 = vpop.permute.xlu2 %2722 }
 0x525   :  { %v1855_v46 = vpop.permute.xlu1 %1854  ;;  %v2738_v16 = vmul.f32 %v2723_v58, %v6512_v23  ;;  %2903 = vperm.xlu2 %4201, %v5971_v28   ;;  %v6761_v58 = vmov 0.0  }
 0x526   :  { %v1870_v42 = vmul.f32 %v1855_v46, %v6512_v23  ;;  %v6755_v46 = vmov 0.0  }
 0x527   :  { %2747 = vst.msk [vmem:[#allocation4 + $0x2f0] sm:$0xff] %vm342_vm11, %v2738_v16  ;;  %v6763_v16 = vmov 0.0  }
 0x528   :  { %1879 = vst.msk [vmem:[#allocation4 + $0x2b8] sm:$0xff] %vm342_vm11, %v1870_v42  ;;  %v6757_v42 = vmov 0.0  }
 0x52c   :  { %v984_v35 = vpop.permute.xlu2 %983 }
 0x52d   :  { %v2227_v9 = vpop.permute.xlu1 %2226  ;;  %v997_v32 = vmul.f32 %v984_v35, %v6558_v31  ;;  %v6769_v35 = vmov 0.0  }
 0x52e   :  { %v2242_v1 = vmul.f32 %v2227_v9, %v6512_v23  ;;  %v6765_v9 = vmov 0.0  }
 0x52f   :  { %1005 = vst.msk [vmem:[#allocation4 + $0x300] sm:$0xff] %vm342_vm11, %v997_v32  ;;  %v6771_v32 = vmov 0.0  }
 0x530   :  { %2251 = vst.msk [vmem:[#allocation4 + $0x2d0] sm:$0xff] %vm342_vm11, %v2242_v1  ;;  %v6767_v1 = vmov 0.0  }
 0x534   :  { %v1363_v18 = vpop.permute.xlu2 %1362 }
 0x535   :  { %v2599_v61 = vpop.permute.xlu1 %2598  ;;  %v1375_v28 = vmul.f32 %v1363_v18, %v6558_v31  ;;  %v6777_v18 = vmov 0.0  }
 0x536   :  { %v2614_v57 = vmul.f32 %v2599_v61, %v6512_v23  ;;  %v6773_v61 = vmov 0.0  }
 0x537   :  { %1384 = vst.msk [vmem:[#allocation4 + $0x318] sm:$0xff] %vm342_vm11, %v1375_v28  ;;  %v6779_v28 = vmov 0.0  }
 0x538   :  { %2623 = vst.msk [vmem:[#allocation4 + $0x2e8] sm:$0xff] %vm342_vm11, %v2614_v57  ;;  %v6775_v57 = vmov 0.0  }
 0x53c   :  { %v1735_v19 = vpop.permute.xlu2 %1734 }
 0x53d   :  { %v1239_v55 = vpop.permute.xlu1 %1238  ;;  %v1747_v41 = vmul.f32 %v1735_v19, %v6558_v31 }
 0x53e   :  { %v1251_v5 = vmul.f32 %v1239_v55, %v6558_v31  ;;  %v6781_v55 = vmov 0.0  }
 0x53f   :  { %1756 = vst.msk [vmem:[#allocation4 + $0x330] sm:$0xff] %vm342_vm11, %v1747_v41 }
 0x540   :  { %1260 = vst.msk [vmem:[#allocation4 + $0x310] sm:$0xff] %vm342_vm11, %v1251_v5  ;;  %v6783_v5 = vmov 0.0  }
 0x544   :  { %v2107_v3 = vpop.permute.xlu2 %2106 }
 0x545   :  { %v1611_v12 = vpop.permute.xlu1 %1610  ;;  %v2119_v29 = vmul.f32 %v2107_v3, %v6558_v31 }
 0x546   :  { %v1623_v23 = vmul.f32 %v1611_v12, %v6558_v31 }
 0x547   :  { %2128 = vst.msk [vmem:[#allocation4 + $0x348] sm:$0xff] %vm342_vm11, %v2119_v29 }
 0x548   :  { %1632 = vst.msk [vmem:[#allocation4 + $0x328] sm:$0xff] %vm342_vm11, %v1623_v23 }
 0x54c   :  { %v2479_v49 = vpop.permute.xlu2 %2478 }
 0x54d   :  { %v1983_v27 = vpop.permute.xlu1 %1982  ;;  %v2491_v59 = vmul.f32 %v2479_v49, %v6558_v31 }
 0x54e   :  { %v1995_v4 = vmul.f32 %v1983_v27, %v6558_v31 }
 0x54f   :  { %2500 = vst.msk [vmem:[#allocation4 + $0x360] sm:$0xff] %vm342_vm11, %v2491_v59 }
 0x550   :  { %2004 = vst.msk [vmem:[#allocation4 + $0x340] sm:$0xff] %vm342_vm11, %v1995_v4 }
 0x554   :  { %v1119_v15 = vpop.permute.xlu2 %1118 }
 0x555   :  { %v2355_v21 = vpop.permute.xlu1 %2354  ;;  %v1128_v52 = vmul.f32 %v1119_v15, %v6617_v44 }
 0x556   :  { %v2367_v34 = vmul.f32 %v2355_v21, %v6558_v31 }
 0x557   :  { %1137 = vst.msk [vmem:[#allocation4 + $0x388] sm:$0xff] %vm342_vm11, %v1128_v52 }
 0x558   :  { %2376 = vst.msk [vmem:[#allocation4 + $0x358] sm:$0xff] %vm342_vm11, %v2367_v34 }
 0x55c   :  { %v1491_v10 = vpop.permute.xlu2 %1490 }
 0x55d   :  { %v2727_v2 = vpop.permute.xlu1 %2726  ;;  %v1500_v11 = vmul.f32 %v1491_v10, %v6617_v44 }
 0x55e   :  { %v2739_v20 = vmul.f32 %v2727_v2, %v6558_v31 }
 0x55f   :  { %1509 = vst.msk [vmem:[#allocation4 + $0x3a0] sm:$0xff] %vm342_vm11, %v1500_v11 }
 0x560   :  { %2748 = vst.msk [vmem:[#allocation4 + $0x370] sm:$0xff] %vm342_vm11, %v2739_v20 }
 0x564   :  { %v1863_v50 = vpop.permute.xlu2 %1862 }
 0x565   :  { %v989_v8 = vpop.permute.xlu1 %988  ;;  %v1872_v40 = vmul.f32 %v1863_v50, %v6617_v44 }
 0x566   :  { %v998_v6 = vmul.f32 %v989_v8, %v6617_v44 }
 0x567   :  { %1881 = vst.msk [vmem:[#allocation4 + $0x3b8] sm:$0xff] %vm342_vm11, %v1872_v40 }
 0x568   :  { %1006 = vst.msk [vmem:[#allocation4 + $0x380] sm:$0xff] %vm342_vm11, %v998_v6 }
 0x56c   :  { %v2235_v51 = vpop.permute.xlu2 %2234 }
 0x56d   :  { %v1367_v37 = vpop.permute.xlu1 %1366  ;;  %v2244_v53 = vmul.f32 %v2235_v51, %v6617_v44 }
 0x56e   :  { %v1376_v47 = vmul.f32 %v1367_v37, %v6617_v44 }
 0x56f   :  { %2253 = vst.msk [vmem:[#allocation4 + $0x3d0] sm:$0xff] %vm342_vm11, %v2244_v53 }
 0x570   :  { %1385 = vst.msk [vmem:[#allocation4 + $0x398] sm:$0xff] %vm342_vm11, %v1376_v47 }
 0x574   :  { %v2607_v22 = vpop.permute.xlu2 %2606 }
 0x575   :  { %v1739_v0 = vpop.permute.xlu1 %1738  ;;  %v2616_v38 = vmul.f32 %v2607_v22, %v6617_v44 }
 0x576   :  { %v1748_v25 = vmul.f32 %v1739_v0, %v6617_v44 }
 0x577   :  { %2625 = vst.msk [vmem:[#allocation4 + $0x3e8] sm:$0xff] %vm342_vm11, %v2616_v38 }
 0x578   :  { %1757 = vst.msk [vmem:[#allocation4 + $0x3b0] sm:$0xff] %vm342_vm11, %v1748_v25 }
 0x57c   :  { %v2851_v54 = vpop.permute.xlu2 %2850 }
 0x57d   :  { %v2111_v43 = vpop.permute.xlu1 %2110  ;;  %v2863_v24 = vmul.f32 %v2851_v54, %v6558_v31 }
 0x57e   :  { %v2120_v26 = vmul.f32 %v2111_v43, %v6617_v44 }
 0x57f   :  { %2872 = vst.msk [vmem:[#allocation4 + $0x378] sm:$0xff] %vm342_vm11, %v2863_v24 }
 0x580   :  { %2129 = vst.msk [vmem:[#allocation4 + $0x3c8] sm:$0xff] %vm342_vm11, %v2120_v26 }
 0x584   :  { %v2880_v13 = vpop.permute.xlu2 %2879 }
 0x585   :  { %v2483_v30 = vpop.permute.xlu1 %2482  ;;  %2908 = vst.msk [vmem:[#allocation5 + $0xf8] sm:$0xff] %vm342_vm11, %v2880_v13 }
 0x586   :  { %v2492_v17 = vmul.f32 %v2483_v30, %v6617_v44 }
 0x588   :  { %2501 = vst.msk [vmem:[#allocation4 + $0x3e0] sm:$0xff] %vm342_vm11, %v2492_v17 }
 0x58c   :  { %v2892_v36 = vpop.permute.xlu2 %2891 }
 0x58d   :  { %v2855_v14 = vpop.permute.xlu1 %2854  ;;  %2911 = vst.msk [vmem:[#allocation5 + $0x278] sm:$0xff] %vm342_vm11, %v2892_v36 }
 0x58e   :  { %v2864_v33 = vmul.f32 %v2855_v14, %v6617_v44  ;;  %v6759_v44 = vmov 0.0  }
 0x590   :  { %2873 = vst.msk [vmem:[#allocation4 + $0x3f8] sm:$0xff] %vm342_vm11, %v2864_v33 }
 0x594   :  { %v2904_v31 = vpop.permute.xlu2 %2903 }
 0x595   :  { %v2884_v39 = vpop.permute.xlu1 %2883  ;;  %2914 = vst.msk [vmem:[#allocation5 + $0x3f8] sm:$0xff] %vm342_vm11, %v2904_v31 }
 0x596   :  { %2909 = vst.msk [vmem:[#allocation5 + $0x178] sm:$0xff] %vm342_vm11, %v2884_v39 }
 0x59d   :  { %v2896_v48 = vpop.permute.xlu1 %2895 }
 0x59e   :  { %2912 = vst.msk [vmem:[#allocation5 + $0x2f8] sm:$0xff] %vm342_vm11, %v2896_v48 }
 0x59f LB: > { %s3741_s8 = sshll.u32 %s4782_s10, 7  ;;  %s3742_s21 = sshll.u32 %s4782_s10, 3  ;;  %s4782_s10 = sphi %s6785_s10, %s2920_s10   ;;  %v4778_v5 = vphi %v6783_v5, %v6837_v5   ;;  %v4774_v55 = vphi %v6781_v55, %v6839_v55   ;;  %v4770_v28 = vphi %v6779_v28, %v6841_v28   ;;  %v4766_v18 = vphi %v6777_v18, %v6843_v18   ;;  %v4762_v57 = vphi %v6775_v57, %v6853_v57   ;;  %v4758_v61 = vphi %v6773_v61, %v6861_v61   ;;  %v4754_v32 = vphi %v6771_v32, %v6868_v32   ;;  %v4750_v35 = vphi %v6769_v35, %v7393_v35   ;;  %v4746_v1 = vphi %v6767_v1, %v6885_v1   ;;  %v4742_v9 = vphi %v6765_v9, %v7392_v9   ;;  %v4738_v16 = vphi %v6763_v16, %v7391_v16   ;;  %v4734_v58 = vphi %v6761_v58, %v7390_v58   ;;  %v4730_v44 = vphi %v6759_v44, %v7389_v44   ;;  %v4726_v42 = vphi %v6757_v42, %v7388_v42   ;;  %v4722_v46 = vphi %v6755_v46, %v3019_v46   ;;  %v4718_v60 = vphi %v6753_v60, %v3020_v60  }
 0x5a0   : > { %s6821_s4 = scalar_lea.vmem [#allocation3], %s3741_s8  ;;  %s6828_s1 = scalar_lea.vmem [#allocation4], %s3741_s8 }
 0x5a1   : > { %v2939_v19 = vld [vmem:[%s6821_s4] sm:$0xff]  ;;  %v2940_v41 = vld [vmem:[%s6821_s4 + $0x8] sm:$0xff]  ;;  %v2941_v12 = vld [vmem:[%s6821_s4 + $0x10] sm:$0xff]  ;;  %s6847_s20 = scalar_lea.vmem [#allocation5], %s3741_s8  ;;  %s3069_s2 = scalar_lea.vmem [#allocation6], %s3742_s21 }
 0x5a2   : > { %v2942_v23 = vld [vmem:[%s6821_s4 + $0x18] sm:$0xff]  ;;  %v2943_v3 = vld [vmem:[%s6821_s4 + $0x20] sm:$0xff]  ;;  %v2989_v29 = vmul.f32 %v4778_v5, %v2939_v19  ;;  %v2990_v27 = vmul.f32 %v4774_v55, %v2940_v41  ;;  %v2957_v49 = vld [vmem:[%s6828_s1 + $0x8] sm:$0xff]  ;;  %v2991_v59 = vmul.f32 %v4770_v28, %v2941_v12  ;;  %s2920_s10 = sadd.s32 1, %s4782_s10  }
 0x5a3   : > { %v2956_v4 = vld [vmem:[%s6828_s1] sm:$0xff]  ;;  %v2992_v21 = vmul.f32 %v4766_v18, %v2942_v23  ;;  %v2944_v34 = vld [vmem:[%s6821_s4 + $0x28] sm:$0xff]  ;;  %v2958_v15 = vld [vmem:[%s6828_s1 + $0x10] sm:$0xff]  ;;  %v2993_v2 = vmul.f32 %v4762_v57, %v2943_v3  ;;  %p6931_p0 = scmp.ge.s32.totalorder %s2920_s10, 8  }
 0x5a4   : > { %v2959_v52 = vld [vmem:[%s6828_s1 + $0x18] sm:$0xff]  ;;  %v2945_v20 = vld [vmem:[%s6821_s4 + $0x30] sm:$0xff]  ;;  %v2960_v10 = vld [vmem:[%s6828_s1 + $0x20] sm:$0xff]  ;;  %v6837_v5 = vadd.f32 %v2989_v29, %v2956_v4   ;;  %v6839_v55 = vadd.f32 %v2990_v27, %v2957_v49   ;;  %v2994_v11 = vmul.f32 %v4758_v61, %v2944_v34  ;;  %v6841_v28 = vadd.f32 %v2991_v59, %v2958_v15   ;;  %s3579_s10 = sshll.u32 (%p6931_p0), %s7265_s17, 4  ;;  %s4804_s8 = smov (%p6931_p0), 128   ;;  %s3580_s10 = int_to_ptr.hbm [resolvable:$true] %s3579_s10 }
 0x5a5   : > { %v6843_v18 = vadd.f32 %v2992_v21, %v2959_v52   ;;  %v2946_v8 = vld [vmem:[%s6821_s4 + $0x38] sm:$0xff]  ;;  %v2961_v6 = vld [vmem:[%s6828_s1 + $0x28] sm:$0xff]  ;;  %v2973_v50 = vld [vmem:[%s6847_s20] sm:$0xff]  ;;  %v2995_v51 = vmul.f32 %v4754_v32, %v2945_v20  ;;  %v6853_v57 = vadd.f32 %v2993_v2, %v2960_v10  }
 0x5a6   : > { %v2974_v40 = vld [vmem:[%s6847_s20 + $0x8] sm:$0xff]  ;;  %v2975_v37 = vld [vmem:[%s6847_s20 + $0x10] sm:$0xff]  ;;  %v2976_v47 = vld [vmem:[%s6847_s20 + $0x18] sm:$0xff]  ;;  %v3021_v22 = vmul.f32 %v6837_v5, %v2973_v50  ;;  %v2996_v26 = vmul.f32 %v4750_v35, %v2946_v8  ;;  %v6861_v61 = vadd.f32 %v2994_v11, %v2961_v6  }
 0x5a7   : > { %v2947_v53 = vld [vmem:[%s6821_s4 + $0x40] sm:$0xff]  ;;  %v2962_v0 = vld [vmem:[%s6828_s1 + $0x30] sm:$0xff]  ;;  %v3022_v38 = vmul.f32 %v6839_v55, %v2974_v40  ;;  %v2948_v43 = vld [vmem:[%s6821_s4 + $0x48] sm:$0xff]  ;;  %v3023_v54 = vmul.f32 %v6841_v28, %v2975_v37  ;;  %v3024_v24 = vmul.f32 %v6843_v18, %v2976_v47 }
 0x5a8   : > { %v2977_v25 = vld [vmem:[%s6847_s20 + $0x20] sm:$0xff]  ;;  %v2963_v30 = vld [vmem:[%s6828_s1 + $0x38] sm:$0xff]  ;;  %v2978_v17 = vld [vmem:[%s6847_s20 + $0x28] sm:$0xff]  ;;  %v3037_v13 = vsel %vm342_vm11, %v3021_v22, 0.0  ;;  %v2997_v14 = vmul.f32 %v4746_v1, %v2947_v53  ;;  %v6868_v32 = vadd.f32 %v2995_v51, %v2962_v0   ;;  %v2998_v35 = vmul.f32 %v4742_v9, %v2948_v43 }
 0x5a9   : > { %v3025_v33 = vmul.f32 %v6853_v57, %v2977_v25  ;;  %v3038_v36 = vsel %vm342_vm11, %v3022_v38, 0.0  ;;  %v2949_v39 = vld [vmem:[%s6821_s4 + $0x50] sm:$0xff]  ;;  %v2964_v31 = vld [vmem:[%s6828_s1 + $0x40] sm:$0xff]  ;;  %v6876_v41 = vadd.f32 %v2996_v26, %v2963_v30   ;;  %v3026_v12 = vmul.f32 %v6861_v61, %v2978_v17  ;;  %v2950_v3 = vld [vmem:[%s6821_s4 + $0x58] sm:$0xff] }
 0x5aa   : > { %v2979_v48 = vld [vmem:[%s6847_s20 + $0x30] sm:$0xff]  ;;  %v3039_v19 = vadd.f32 %v3038_v36, %v3037_v13  ;;  %v3040_v1 = vsel %vm342_vm11, %v3023_v54, 0.0  ;;  %v3042_v23 = vsel %vm342_vm11, %v3024_v24, 0.0  ;;  %v2965_v29 = vld [vmem:[%s6828_s1 + $0x48] sm:$0xff]  ;;  %v2980_v27 = vld [vmem:[%s6847_s20 + $0x38] sm:$0xff]  ;;  %v2999_v49 = vmul.f32 %v4738_v16, %v2949_v39 }
 0x5ab   : > { %v3027_v9 = vmul.f32 %v6868_v32, %v2979_v48  ;;  %v3044_v59 = vsel %vm342_vm11, %v3025_v33, 0.0  ;;  %v2951_v21 = vld [vmem:[%s6821_s4 + $0x60] sm:$0xff]  ;;  %v2966_v34 = vld [vmem:[%s6828_s1 + $0x50] sm:$0xff]  ;;  %v3000_v2 = vmul.f32 %v4734_v58, %v2950_v3  ;;  %v6893_v20 = vadd.f32 %v2998_v35, %v2965_v29   ;;  %v2952_v11 = vld [vmem:[%s6821_s4 + $0x68] sm:$0xff] }
 0x5ac   : > { %v3041_v4 = vadd.f32 %v3040_v1, %v3039_v19  ;;  %v6885_v1 = vadd.f32 %v2997_v14, %v2964_v31   ;;  %v2981_v15 = vld [vmem:[%s6847_s20 + $0x40] sm:$0xff]  ;;  %v3028_v10 = vmul.f32 %v6876_v41, %v2980_v27  ;;  %v3046_v16 = vsel %vm342_vm11, %v3026_v12, 0.0  ;;  %v2967_v8 = vld [vmem:[%s6828_s1 + $0x58] sm:$0xff]  ;;  %v2982_v6 = vld [vmem:[%s6847_s20 + $0x48] sm:$0xff] }
 0x5ad   : > { %v3001_v40 = vmul.f32 %v4730_v44, %v2951_v21  ;;  %v3015_v37 = vadd.f32 %v2999_v49, %v2966_v34   ;;  %v3048_v58 = vsel %vm342_vm11, %v3027_v9, 0.0  ;;  %v2953_v51 = vld [vmem:[%s6821_s4 + $0x70] sm:$0xff]  ;;  %v2968_v53 = vld [vmem:[%s6828_s1 + $0x60] sm:$0xff]  ;;  %v3002_v22 = vmul.f32 %v4726_v42, %v2952_v11  ;;  %v2954_v44 = vld [vmem:[%s6821_s4 + $0x78] sm:$0xff]  ;;  %s4805_s4 = smov (%p6931_p0), 8  }
 0x5ae   : > { %v3043_v52 = vadd.f32 %v3042_v23, %v3041_v4  ;;  %v3029_v47 = vmul.f32 %v6885_v1, %v2981_v15  ;;  %v2983_v0 = vld [vmem:[%s6847_s20 + $0x50] sm:$0xff]  ;;  %v3016_v38 = vadd.f32 %v3000_v2, %v2967_v8   ;;  %v3030_v43 = vmul.f32 %v6893_v20, %v2982_v6  ;;  %v2969_v54 = vld [vmem:[%s6828_s1 + $0x68] sm:$0xff]  ;;  %v2984_v24 = vld [vmem:[%s6847_s20 + $0x58] sm:$0xff] }
 0x5af   : > { %v3050_v26 = vsel %vm342_vm11, %v3028_v10, 0.0  ;;  %v3003_v17 = vmul.f32 %v4722_v46, %v2953_v51  ;;  %v3017_v13 = vadd.f32 %v3001_v40, %v2968_v53   ;;  %v3031_v14 = vmul.f32 %v3015_v37, %v2983_v0  ;;  %v2970_v36 = vld [vmem:[%s6828_s1 + $0x70] sm:$0xff]  ;;  %v2985_v42 = vld [vmem:[%s6847_s20 + $0x60] sm:$0xff]  ;;  %v2971_v12 = vld [vmem:[%s6828_s1 + $0x78] sm:$0xff] }
 0x5b0   : > { %v3045_v50 = vadd.f32 %v3044_v59, %v3043_v52  ;;  %v3052_v33 = vsel %vm342_vm11, %v3029_v47, 0.0  ;;  %v3004_v31 = vmul.f32 %v4718_v60, %v2954_v44  ;;  %v3018_v48 = vadd.f32 %v3002_v22, %v2969_v54   ;;  %v2986_v23 = vld [vmem:[%s6847_s20 + $0x68] sm:$0xff]  ;;  %v2987_v4 = vld [vmem:[%s6847_s20 + $0x70] sm:$0xff]  ;;  %v2988_v21 = vld [vmem:[%s6847_s20 + $0x78] sm:$0xff] }
 0x5b1   : > { %v3032_v35 = vmul.f32 %v3016_v38, %v2984_v24  ;;  %v3054_v19 = vsel %vm342_vm11, %v3030_v43, 0.0  ;;  %v3019_v46 = vadd.f32 %v3003_v17, %v2970_v36   ;;  %v3033_v29 = vmul.f32 %v3017_v13, %v2985_v42  ;;  %v7395_v51 = vld [vmem:[#allocation23_spill] sm:$0xff] (%p6931_p0)  ;;  %v7396_v0 = vld [vmem:[#allocation24_spill] sm:$0xff] (%p6931_p0)  ;;  %v7397_v22 = vld [vmem:[#allocation25_spill] sm:$0xff] (%p6931_p0) }
 0x5b2   : > { %v3047_v25 = vadd.f32 %v3046_v16, %v3045_v50  ;;  %v3056_v27 = vsel %vm342_vm11, %v3031_v14, 0.0  ;;  %v3020_v60 = vadd.f32 %v3004_v31, %v2971_v12   ;;  %v3034_v9 = vmul.f32 %v3018_v48, %v2986_v23  ;;  %v3793_v5 = vld [vmem:[%s7261_s13 + $0x10] sm:$0xff] (%p6931_p0)  ;;  %v3792_v18 = vld [vmem:[%s7261_s13 + $0x8] sm:$0xff] (%p6931_p0)  ;;  %v7002_v17 = vld [vmem:[%s7260_s12] ss:$0 sm:$0xff] (%p6931_p0) }
 0x5b3   : > { %v3058_v59 = vsel %vm342_vm11, %v3032_v35, 0.0  ;;  %v3035_v15 = vmul.f32 %v3019_v46, %v2987_v4  ;;  %v3060_v52 = vsel %vm342_vm11, %v3033_v29, 0.0  ;;  %v7388_v42 = vmov %v3018_v48  ;;  %v7399_v61 = vld [vmem:[#allocation27_spill] sm:$0xff] (%p6931_p0) }
 0x5b4   : > { %v3049_v30 = vadd.f32 %v3048_v58, %v3047_v25  ;;  %v3036_v10 = vmul.f32 %v3020_v60, %v2988_v21  ;;  %v3062_v16 = vsel %vm342_vm11, %v3034_v9, 0.0  ;;  %v7389_v44 = vmov %v3017_v13 }
 0x5b5   : > { %v3064_v8 = vsel %vm342_vm11, %v3035_v15, 0.0  ;;  %v7390_v58 = vmov %v3016_v38  ;;  %v7392_v9 = vmov %v6893_v20  ;;  %v7393_v35 = vmov %v6876_v41  ;;  %v3794_v41 = vld [vmem:[%s7261_s13 + $0x18] sm:$0xff] (%p6931_p0)  ;;  %v7394_v20 = vld [vmem:[#allocation22_spill] sm:$0xff] (%p6931_p0) }
 0x5b6   : > { %v3051_v39 = vadd.f32 %v3050_v26, %v3049_v30  ;;  %v3066_v50 = vsel %vm342_vm11, %v3036_v10, 0.0  ;;  %v3100_v53 = vsub.f32 (%p6931_p0), 0.0, %v7395_v51  ;;  %v3101_v25 = vsub.f32 (%p6931_p0), 0.0, %v7396_v0  ;;  %3319 = vmatpush.bf16.msrb.mxu1 (%p6931_p0), %v3794_v41  ;;  %v7398_v26 = vld [vmem:[#allocation26_spill] sm:$0xff] (%p6931_p0) }
 0x5b7   :  { %v3102_v38 = vsub.f32 (%p6931_p0), 0.0, %v7397_v22  ;;  %v3103_v54 = vsub.f32 (%p6931_p0), 0.0, %v7398_v26  ;;  %v3104_v57 = vsub.f32 (%p6931_p0), 0.0, %v7399_v61  ;;  %v3791_v58 = vld [vmem:[%s7261_s13] sm:$0xff] (%p6931_p0)  ;;  %v3083_v42 = vmul.f32 (%p6931_p0), %v7002_v17, %v5169_v62 }
 0x5b8   : > { %v3053_v3 = vadd.f32 %v3052_v33, %v3051_v39  ;;  %v3109_v60 = vmul.f32 (%p6931_p0), 1.442695, %v3100_v53  ;;  %v3111_v46 = vmul.f32 (%p6931_p0), 1.442695, %v3101_v25  ;;  %v3084_v48 = vmul.f32 (%p6931_p0), %v7002_v17, %v5173_v63 }
 0x5b9   :  { %v3113_v32 = vmul.f32 (%p6931_p0), 1.442695, %v3102_v38  ;;  %v3115_v28 = vmul.f32 (%p6931_p0), 1.442695, %v3103_v54  ;;  %v3117_v55 = vmul.f32 (%p6931_p0), 1.442695, %v3104_v57 }
 0x5ba   : > { %v3055_v49 = vadd.f32 %v3054_v19, %v3053_v3  ;;  %3320 = vmatpush.bf16.msrb.mxu1 (%p6931_p0), %v3793_v5 }
 0x5bc   : > { %v3057_v34 = vadd.f32 %v3056_v27, %v3055_v49 }
 0x5be   : > { %v3059_v2 = vadd.f32 %v3058_v59, %v3057_v34  ;;  %3321 = vmatpush.bf16.msrb.mxu1 (%p6931_p0), %v3792_v18 }
 0x5c0   : > { %v3061_v11 = vadd.f32 %v3060_v52, %v3059_v2 }
 0x5c2   : > { %v3063_v6 = vadd.f32 %v3062_v16, %v3061_v11  ;;  %v7391_v16 = vmov %v3015_v37  ;;  %v3099_v37 = vsub.f32 (%p6931_p0), 0.0, %v7394_v20  ;;  %3322 = vmatpush.bf16.msrb.mxu1 (%p6931_p0), %v3791_v58 }
 0x5c4   : > { %v3065_v40 = vadd.f32 %v3064_v8, %v3063_v6  ;;  %2919 = sbr.rel (!%p6931_p0) target bundleno = 1439 (0x59f), region = 148  ;;  %v3107_v43 = vmul.f32 (%p6931_p0), 1.442695, %v3099_v37 }
 0x5c6   : > { %v3067_v47 = vadd.f32 %v3066_v50, %v3065_v40  ;;  %4548 = vpow2.f32 (%p6931_p0), %v3107_v43 }
 0x5c7   :  { %4550 = vpow2.f32 (%p6931_p0), %v3109_v60 }
 0x5c8   : > { %3070 = vst.msk [vmem:[%s3069_s2] sm:$0xff] %vm342_vm11, %v3067_v47  ;;  %4552 = vpow2.f32 (%p6931_p0), %v3111_v46 }
 0x5c9   :  { %4554 = vpow2.f32 %v3113_v32 }
 0x5ca   :  { %4556 = vpow2.f32 %v3115_v28 }
 0x5cb   :  { %4558 = vpow2.f32 %v3117_v55 }
 0x5cc   :  { %v4549_v1 = vpop.eup %4548 }
 0x5cd   :  { %v4551_v44 = vpop.eup %4550  ;;  %v3123_v24 = vadd.f32 1.0, %v4549_v1 }
 0x5ce   :  { %v4553_v30 = vpop.eup %4552  ;;  %v3124_v13 = vadd.f32 1.0, %v4551_v44 }
 0x5cf   :  { %v4555_v14 = vpop.eup %4554  ;;  %4560 = vrcp.f32 %v3123_v24  ;;  %v7004_v33 = vadd.f32 1.0, %v4553_v30  ;;  %v3071_v31 = vld [vmem:[#allocation6] sm:$0xff]  ;;  %v3072_v19 = vld [vmem:[#allocation6 + $0x8] sm:$0xff]  ;;  %v3140_v23 = vand.u32 2147483647, %v3123_v24  ;;  %v3142_v4 = vand.u32 2147483648, %v3123_v24 }
 0x5d0   :  { %4562 = vrcp.f32 %v3124_v13  ;;  %v7006_v36 = vadd.f32 1.0, %v4555_v14  ;;  %v4557_v39 = vpop.eup %4556  ;;  %v3091_v29 = vadd.f32 %v3083_v42, %v3071_v31  ;;  %v3155_v49 = vand.u32 2147483647, %v3124_v13  ;;  %v7412_v31 = vld [vmem:[#allocation29_spill] sm:$0xff]  ;;  %v3073_v52 = vld [vmem:[#allocation6 + $0x10] sm:$0xff] }
 0x5d1   :  { %4564 = vrcp.f32 %v7004_v33  ;;  %v4559_v35 = vpop.eup %4558  ;;  %v3092_v9 = vadd.f32 %v3084_v48, %v3072_v19  ;;  %v3157_v59 = vand.u32 2147483648, %v3124_v13  ;;  %v7014_v21 = vadd.f32 1.0, %v4557_v39 }
 0x5d2   :  { %4566 = vrcp.f32 %v7006_v36  ;;  %vm3136_vm12 = vweird.f32 %v3123_v24  ;;  %v7016_v63 = vadd.f32 1.0, %v4559_v35  ;;  %vm7020_vm14 = vcmp.eq.f32.partialorder %v3140_v23, 8.507059e+37  ;;  %v7417_v23 = vld [vmem:[#allocation30_spill] sm:$0xff] }
 0x5d3   :  { %vm3151_vm15 = vweird.f32 %v3124_v13  ;;  %v3143_v11 = vor.u32 1.1754944e-38, %v3142_v4  ;;  %vm7024_vm2 = vcmp.eq.f32.partialorder %v3155_v49, 8.507059e+37  ;;  %v3158_v47 = vor.u32 1.1754944e-38, %v3157_v59 }
 0x5d4   :  { %4568 = vrcp.f32 %v7014_v21  ;;  %vm3166_vm5 = vweird.f32 %v7004_v33  ;;  %v3170_v5 = vand.u32 2147483647, %v7004_v33  ;;  %v3172_v43 = vand.u32 2147483648, %v7004_v33 }
 0x5d5   :  { %v4561_v12 = vpop.eup %4560  ;;  %4570 = vrcp.f32 %v7016_v63  ;;  %vm3181_vm7 = vweird.f32 %v7006_v36  ;;  %v3185_v1 = vand.u32 2147483647, %v7006_v36  ;;  %v3187_v58 = vand.u32 2147483648, %v7006_v36 }
 0x5d6   :  { %v4563_v3 = vpop.eup %4562  ;;  %v3132_v27 = vmul.f32 %v4561_v12, %v3123_v24  ;;  %vm3137_vm13 = vweird.f32 %v4561_v12  ;;  %v3085_v59 = vmul.f32 %v7002_v17, %v5218_v7 }
 0x5d7   :  { %v3147_v62 = vmul.f32 %v4563_v3, %v3124_v13  ;;  %v7018_v15 = vpop.eup %4564  ;;  %vm3152_vm1 = vweird.f32 %v4563_v3  ;;  %vm7030_vm3 = vmor %vm3136_vm12, %vm3137_vm13  ;;  %vm7077_vm12 = vcmp.eq.f32.partialorder %v3170_v5, 8.507059e+37  ;;  %vm7081_vm13 = vcmp.eq.f32.partialorder %v3185_v1, 8.507059e+37  ;;  %v3076_v13 = vld [vmem:[#allocation6 + $0x28] sm:$0xff] }
 0x5d8   :  { %v3133_v34 = vsub.f32 1.0, %v3132_v27  ;;  %v4567_v10 = vpop.eup %4566  ;;  %v3162_v6 = vmul.f32 %v7018_v15, %v7004_v33  ;;  %vm7036_vm4 = vmor %vm3151_vm15, %vm3152_vm1  ;;  %vm3167_vm6 = vweird.f32 %v7018_v15  ;;  %v3173_v33 = vor.u32 1.1754944e-38, %v3172_v43 }
 0x5d9   :  { %v3148_v2 = vsub.f32 1.0, %v3147_v62  ;;  %v3177_v41 = vmul.f32 %v4567_v10, %v7006_v36  ;;  %vm3182_vm8 = vweird.f32 %v4567_v10  ;;  %vm7064_vm9 = vmor %vm3166_vm5, %vm3167_vm6  ;;  %v3093_v8 = vadd.f32 %v3085_v59, %v3073_v52 }
 0x5da   :  { %v3134_v16 = vmul.f32 %v4561_v12, %v3133_v34  ;;  %v3163_v25 = vsub.f32 1.0, %v3162_v6  ;;  %v7058_v44 = vpop.eup %4568  ;;  %vm7072_vm10 = vmor %vm3181_vm7, %vm3182_vm8  ;;  %v3086_v34 = vmul.f32 %v7002_v17, %v5221_v45  ;;  %vm3211_vm1 = vweird.f32 %v7016_v63 }
 0x5db   :  { %v3149_v40 = vmul.f32 %v4563_v3, %v3148_v2  ;;  %v3178_v54 = vsub.f32 1.0, %v3177_v41  ;;  %v7068_v42 = vpop.eup %4570  ;;  %v3192_v36 = vmul.f32 %v7058_v44, %v7014_v21  ;;  %v3074_v2 = vld [vmem:[#allocation6 + $0x18] sm:$0xff]  ;;  %vm3197_vm15 = vweird.f32 %v7058_v44 }
 0x5dc   :  { %v3135_v37 = vadd.f32 %v4561_v12, %v3134_v16  ;;  %v3164_v46 = vmul.f32 %v7018_v15, %v3163_v25  ;;  %v3207_v49 = vmul.f32 %v7068_v42, %v7016_v63  ;;  %v3094_v6 = vadd.f32 %v3086_v34, %v3074_v2 }
 0x5dd   :  { %v3150_v38 = vadd.f32 %v4563_v3, %v3149_v40  ;;  %v3179_v18 = vmul.f32 %v4567_v10, %v3178_v54  ;;  %v3193_v16 = vsub.f32 1.0, %v3192_v36  ;;  %v3217_v5 = vand.u32 2147483648, %v7016_v63 }
 0x5de   :  { %v3139_v60 = vsel %vm7030_vm3, %v4561_v12, %v3135_v37  ;;  %v3165_v30 = vadd.f32 %v7018_v15, %v3164_v46  ;;  %v3188_v12 = vor.u32 1.1754944e-38, %v3187_v58 }
 0x5df   :  { %v3144_v32 = vsel %vm7020_vm14, %v3143_v11, %v3139_v60  ;;  %v3154_v57 = vsel %vm7036_vm4, %v4563_v3, %v3150_v38  ;;  %v3180_v14 = vadd.f32 %v4567_v10, %v3179_v18  ;;  %v3106_v3 = vsub.f32 0.0, %v7417_v23 }
 0x5e0   :  { %v3159_v28 = vsel %vm7024_vm2, %v3158_v47, %v3154_v57  ;;  %v3251_v55 = vmul.f32 %v3144_v32, %v7394_v20  ;;  %v3169_v27 = vsel %vm7064_vm9, %v7018_v15, %v3165_v30  ;;  %v3208_v11 = vsub.f32 1.0, %v3207_v49  ;;  %v3075_v30 = vld [vmem:[#allocation6 + $0x20] sm:$0xff] }
 0x5e1   :  { %v3252_v24 = vmul.f32 %v3159_v28, %v7395_v51  ;;  %v3105_v51 = vsub.f32 0.0, %v7412_v31  ;;  %v3184_v4 = vsel %vm7072_vm10, %v4567_v10, %v3180_v14  ;;  %v3121_v62 = vmul.f32 1.442695, %v3106_v3 }
 0x5e2   :  { %v3259_v20 = vmul.f32 %v3251_v55, %v3091_v29  ;;  %v3174_v15 = vsel %vm7077_vm12, %v3173_v33, %v3169_v27  ;;  %v3189_v10 = vsel %vm7081_vm13, %v3188_v12, %v3184_v4  ;;  %v3194_v45 = vmul.f32 %v7058_v44, %v3193_v16 }
 0x5e3   :  { %v3260_v48 = vmul.f32 %v3252_v24, %v3092_v9  ;;  %v3119_v9 = vmul.f32 1.442695, %v3105_v51  ;;  %v3253_v50 = vmul.f32 %v3174_v15, %v7396_v0  ;;  %v3254_v7 = vmul.f32 %v3189_v10, %v7397_v22  ;;  %v7425_v10 = vld [vmem:[#allocation31_spill] sm:$0xff] }
 0x5e4   :  { %v3209_v40 = vmul.f32 %v7068_v42, %v3208_v11  ;;  %vm3196_vm14 = vweird.f32 %v7014_v21  ;;  %vm3212_vm2 = vweird.f32 %v7068_v42  ;;  %v3200_v0 = vand.u32 2147483647, %v7014_v21  ;;  %v7426_v11 = vld [vmem:[#allocation32_spill] sm:$0xff] }
 0x5e5   :  { %v3267_v29 = vpack.c.bf16 %v3260_v48, %v3259_v20  ;;  %4572 = vpow2.f32 %v3119_v9  ;;  %v3261_v41 = vmul.f32 %v3253_v50, %v3093_v8  ;;  %v3262_v37 = vmul.f32 %v3254_v7, %v3094_v6  ;;  %vm7117_vm3 = vmor %vm3196_vm14, %vm3197_vm15  ;;  %v3077_v6 = vld [vmem:[#allocation6 + $0x30] sm:$0xff]  ;;  %v3078_v50 = vld [vmem:[#allocation6 + $0x38] sm:$0xff] }
 0x5e6   :  { %4574 = vpow2.f32 %v3121_v62  ;;  %v3202_v22 = vand.u32 2147483648, %v7014_v21  ;;  %v3215_v38 = vand.u32 2147483647, %v7016_v63  ;;  %v3195_v43 = vadd.f32 %v7058_v44, %v3194_v45  ;;  %vm7124_vm4 = vmor %vm3211_vm1, %vm3212_vm2  ;;  %v7422_v63 = vld [vmem:[#allocation28_spill] sm:$0xff]  ;;  %v3796_v9 = vld [vmem:[%s7263_s15 + $0x8] sm:$0xff] }
 0x5e7   :  { %3759 = vmatmul.msk.bf16.vlgmr.msrb.gmra.mxu1 %vm342_vm11, %v3267_v29  ;;  %v3210_v60 = vadd.f32 %v7068_v42, %v3209_v40  ;;  %v3268_v21 = vpack.c.bf16 %v3262_v37, %v3261_v41  ;;  %v3218_v18 = vor.u32 1.1754944e-38, %v3217_v5  ;;  %vm3201_vm5 = vcmp.eq.f32.partialorder %v3200_v0, 8.507059e+37  ;;  %3542 = vmatpush.bf16.msrb.mxu2 %v3796_v9 }
 0x5e8   :  { %v3203_v57 = vor.u32 1.1754944e-38, %v3202_v22  ;;  %v3199_v28 = vsel %vm7117_vm3, %v7058_v44, %v3195_v43  ;;  %vm3216_vm6 = vcmp.eq.f32.partialorder %v3215_v38, 8.507059e+37  ;;  %v3087_v58 = vmul.f32 %v7002_v17, %v7422_v63  ;;  %v7427_v38 = vld [vmem:[#allocation13_spill] sm:$0xff] }
 0x5e9   :  { %v3214_v55 = vsel %vm7124_vm4, %v7068_v42, %v3210_v60  ;;  %v3088_v24 = vmul.f32 %v7002_v17, %v5249_v56  ;;  %v3089_v16 = vmul.f32 %v7002_v17, %v7425_v10  ;;  %v3090_v8 = vmul.f32 %v7002_v17, %v7426_v11  ;;  %v7428_v60 = vld [vmem:[#allocation16_spill] sm:$0xff] }
 0x5ea   :  { %v3204_v14 = vsel %vm3201_vm5, %v3203_v57, %v3199_v28  ;;  %v3219_v20 = vsel %vm3216_vm6, %v3218_v18, %v3214_v55  ;;  %v3095_v35 = vadd.f32 %v3087_v58, %v3075_v30 }
 0x5eb   :  { %v4573_v47 = vpop.eup %4572  ;;  %v3096_v42 = vadd.f32 %v3088_v24, %v3076_v13  ;;  %v3255_v33 = vmul.f32 %v3204_v14, %v7398_v26  ;;  %v3256_v19 = vmul.f32 %v3219_v20, %v7399_v61  ;;  %v3097_v40 = vadd.f32 %v3089_v16, %v3077_v6  ;;  %v7431_v13 = vld [vmem:[#allocation15_spill] sm:$0xff] }
 0x5ec   :  { %v3129_v53 = vadd.f32 1.0, %v4573_v47  ;;  %v4575_v25 = vpop.eup %4574  ;;  %v3098_v47 = vadd.f32 %v3090_v8, %v3078_v50 }
 0x5ed   :  { %v3130_v46 = vadd.f32 1.0, %v4575_v25  ;;  %v3263_v56 = vmul.f32 %v3255_v33, %v3095_v35  ;;  %v3264_v29 = vmul.f32 %v3256_v19, %v3096_v42  ;;  %v7433_v19 = vld [vmem:[#allocation20_spill] sm:$0xff] }
 0x5ee   :  { %4576 = vrcp.f32 %v3129_v53  ;;  %vm3226_vm7 = vweird.f32 %v3129_v53  ;;  %v3232_v27 = vand.u32 2147483648, %v3129_v53  ;;  %v3230_v62 = vand.u32 2147483647, %v3129_v53 }
 0x5ef   :  { %4578 = vrcp.f32 %v3130_v46  ;;  %vm3241_vm9 = vweird.f32 %v3130_v46  ;;  %v3247_v4 = vand.u32 2147483648, %v3130_v46  ;;  %v3245_v59 = vand.u32 2147483647, %v3130_v46 }
 0x5f0   :  { %v3269_v61 = vpack.c.bf16 %v3264_v29, %v3263_v56  ;;  %v3233_v34 = vor.u32 1.1754944e-38, %v3232_v27  ;;  %vm3231_vm14 = vcmp.eq.f32.partialorder %v3230_v62, 8.507059e+37  ;;  %v7434_v29 = vld [vmem:[#allocation19_spill] sm:$0xff] }
 0x5f1   :  { %v3248_v52 = vor.u32 1.1754944e-38, %v3247_v4  ;;  %vm3246_vm15 = vcmp.eq.f32.partialorder %v3245_v59, 8.507059e+37  ;;  %v7435_v59 = vld [vmem:[#allocation21_spill] sm:$0xff] }
 0x5f4   :  { %v4577_v1 = vpop.eup %4576 }
 0x5f5   :  { %v3222_v44 = vmul.f32 %v4577_v1, %v3129_v53  ;;  %v4579_v39 = vpop.eup %4578  ;;  %vm3227_vm8 = vweird.f32 %v4577_v1 }
 0x5f6   :  { %v3237_v48 = vmul.f32 %v4579_v39, %v3130_v46  ;;  %vm3242_vm10 = vweird.f32 %v4579_v39  ;;  %vm7141_vm12 = vmor %vm3226_vm7, %vm3227_vm8 }
 0x5f7   :  { %3760 = vmatmul.msk.bf16.gmra.mxu1 %vm342_vm11, %v3268_v21  ;;  %v3223_v51 = vsub.f32 1.0, %v3222_v44  ;;  %vm3243_vm13 = vmor %vm3241_vm9, %vm3242_vm10  ;;  %v7429_v21 = vld [vmem:[#allocation14_spill] sm:$0xff] }
 0x5f8   :  { %v3238_v12 = vsub.f32 1.0, %v3237_v48 }
 0x5f9   :  { %v3224_v36 = vmul.f32 %v4577_v1, %v3223_v51  ;;  %v7432_v51 = vld [vmem:[#allocation18_spill] sm:$0xff] }
 0x5fa   :  { %v3239_v3 = vmul.f32 %v4579_v39, %v3238_v12 }
 0x5fb   :  { %v3225_v49 = vadd.f32 %v4577_v1, %v3224_v36 }
 0x5fc   :  { %v3240_v26 = vadd.f32 %v4579_v39, %v3239_v3 }
 0x5fd   :  { %v3229_v2 = vsel %vm7141_vm12, %v4577_v1, %v3225_v49  ;;  %v7430_v1 = vld [vmem:[#allocation17_spill] sm:$0xff] }
 0x5fe   :  { %v3244_v15 = vsel %vm3243_vm13, %v4579_v39, %v3240_v26  ;;  %v3234_v7 = vsel %vm3231_vm14, %v3233_v34, %v3229_v2  ;;  %v3795_v26 = vld [vmem:[%s7263_s15] sm:$0xff] }
 0x5ff   :  { %v3249_v45 = vsel %vm3246_vm15, %v3248_v52, %v3244_v15  ;;  %v3257_v41 = vmul.f32 %v3234_v7, %v7412_v31  ;;  %3543 = vmatpush.bf16.msrb.mxu2 %v3795_v26 }
 0x600   :  { %v3258_v37 = vmul.f32 %v3249_v45, %v7417_v23 }
 0x601   :  { %v3265_v53 = vmul.f32 %v3257_v41, %v3097_v40 }
 0x602   :  { %v3266_v25 = vmul.f32 %v3258_v37, %v3098_v47 }
 0x604   :  { %v3270_v0 = vpack.c.bf16 %v3266_v25, %v3265_v53 }
 0x607   :  { %3761 = vmatmul.msk.bf16.gmra.mxu1 %vm342_vm11, %v3269_v61 }
 0x617   :  { %3762 = vmatmul.msk.bf16.gmra.mxu1 %vm342_vm11, %v3270_v0 }
 0x664   :  { %v3324_v22 = vpop.f32.mrf.mxu1 }
 0x665   :  { %v7156_v5 = vadd.f32 %v3324_v22, %v7427_v38 }
 0x667   :  { %v3353_v17 = vmul.f32 %v7156_v5, %v7156_v5 }
 0x669   :  { %v3361_v43 = vsel %vm89_vm0, %v3353_v17, 0.0 }
 0x66a   :  { %3362 = vadd.xlane.f32.xlu0 %v3361_v43 }
 0x66c   :  { %v3326_v54 = vpop.f32.mrf.mxu1 }
 0x66d   :  { %v7162_v31 = vadd.f32 %v3326_v54, %v7428_v60 }
 0x66f   :  { %v3354_v23 = vmul.f32 %v7162_v31, %v7162_v31 }
 0x671   :  { %v3364_v46 = vsel %vm89_vm0, %v3354_v23, 0.0 }
 0x672   :  { %3365 = vadd.xlane.f32.xlu0 %v3364_v46  ;;  %v7217_v46 = vld [vmem:[%s7262_s14] ss:$0 sm:$0xff] }
 0x674   :  { %v3329_v32 = vpop.f32.mrf.mxu1 }
 0x675   :  { %v7168_v57 = vadd.f32 %v3329_v32, %v7429_v21 }
 0x677   :  { %v3355_v18 = vmul.f32 %v7168_v57, %v7168_v57 }
 0x679   :  { %v3367_v28 = vsel %vm89_vm0, %v3355_v18, 0.0 }
 0x67a   :  { %3368 = vadd.xlane.f32.xlu1 %v3367_v28 }
 0x67c   :  { %v3331_v55 = vpop.f32.mrf.mxu1 }
 0x67d   :  { %v7174_v63 = vadd.f32 %v3331_v55, %v7430_v1 }
 0x67f   :  { %v3356_v58 = vmul.f32 %v7174_v63, %v7174_v63 }
 0x681   :  { %v3370_v24 = vsel %vm89_vm0, %v3356_v58, 0.0 }
 0x682   :  { %3371 = vadd.xlane.f32.xlu1 %v3370_v24 }
 0x684   :  { %v3334_v30 = vpop.f32.mrf.mxu1 }
 0x685   :  { %v7180_v14 = vadd.f32 %v3334_v30, %v7431_v13 }
 0x687   :  { %v3357_v20 = vmul.f32 %v7180_v14, %v7180_v14 }
 0x689   :  { %v3373_v44 = vsel %vm89_vm0, %v3357_v20, 0.0 }
 0x68a   :  { %3374 = vadd.xlane.f32.xlu2 %v3373_v44 }
 0x68c   :  { %v3336_v39 = vpop.f32.mrf.mxu1 }
 0x68d   :  { %v7186_v48 = vadd.f32 %v3336_v39, %v7432_v51 }
 0x68f   :  { %v3358_v35 = vmul.f32 %v7186_v48, %v7186_v48 }
 0x691   :  { %v3376_v42 = vsel %vm89_vm0, %v3358_v35, 0.0 }
 0x692   :  { %3377 = vadd.xlane.f32.xlu2 %v3376_v42 }
 0x694   :  { %v3339_v33 = vpop.f32.mrf.mxu1 }
 0x695   :  { %v7192_v12 = vadd.f32 %v3339_v33, %v7433_v19 }
 0x697   :  { %v3359_v36 = vmul.f32 %v7192_v12, %v7192_v12 }
 0x699   :  { %v3379_v3 = vsel %vm89_vm0, %v3359_v36, 0.0 }
 0x69a   :  { %3380 = vadd.xlane.f32.xlu0 %v3379_v3 }
 0x69c   :  { %v3341_v56 = vpop.f32.mrf.mxu1 }
 0x69d   :  { %v7198_v27 = vadd.f32 %v3341_v56, %v7434_v29 }
 0x69f   :  { %v3360_v4 = vmul.f32 %v7198_v27, %v7198_v27 }
 0x6a1   :  { %v3382_v49 = vsel %vm89_vm0, %v3360_v4, 0.0 }
 0x6a2   :  { %3383 = vadd.xlane.f32.xlu1 %v3382_v49 }
 0x6dd   :  { %v3363_v62 = vpop.xlane.xlu0 %3362 }
 0x6de   :  { %v3385_v61 = vmul.f32 %v3363_v62, %v7435_v59 }
 0x6e0   :  { %v3393_v34 = vadd.f32 1e-05, %v3385_v61 }
 0x6e2   :  { %4580 = vrsqrt.f32 %v3393_v34  ;;  %vm3407_vm1 = vweird.f32 %v3393_v34 }
 0x6e5   :  { %v3366_v52 = vpop.xlane.xlu0 %3365 }
 0x6e6   :  { %v3386_v2 = vmul.f32 %v3366_v52, %v7435_v59 }
 0x6e8   :  { %v4581_v15 = vpop.eup %4580  ;;  %v3394_v10 = vadd.f32 1e-05, %v3386_v2 }
 0x6e9   :  { %v3402_v16 = vmul.f32 %v4581_v15, %v3393_v34  ;;  %vm3408_vm11 = vweird.f32 %v4581_v15 }
 0x6ea   :  { %4582 = vrsqrt.f32 %v3394_v10  ;;  %vm3409_vm2 = vmor %vm3407_vm1, %vm3408_vm11  ;;  %vm3417_vm4 = vweird.f32 %v3394_v10 }
 0x6eb   :  { %v3403_v11 = vmul.f32 %v4581_v15, %v3402_v16 }
 0x6ed   :  { %v3404_v8 = vmul.f32 0.5, %v3403_v11  ;;  %v3369_v6 = vpop.xlane.xlu1 %3368 }
 0x6ee   :  { %v3387_v50 = vmul.f32 %v3369_v6, %v7435_v59 }
 0x6ef   :  { %v3405_v7 = vsub.f32 1.5, %v3404_v8 }
 0x6f0   :  { %v4583_v45 = vpop.eup %4582  ;;  %v3395_v40 = vadd.f32 1e-05, %v3387_v50 }
 0x6f1   :  { %v3412_v47 = vmul.f32 %v4583_v45, %v3394_v10  ;;  %v3406_v41 = vmul.f32 %v4581_v15, %v3405_v7  ;;  %vm3418_vm3 = vweird.f32 %v4583_v45 }
 0x6f2   :  { %4584 = vrsqrt.f32 %v3395_v40  ;;  %vm3419_vm5 = vmor %vm3417_vm4, %vm3418_vm3  ;;  %vm3427_vm7 = vweird.f32 %v3395_v40 }
 0x6f3   :  { %v3413_v37 = vmul.f32 %v4583_v45, %v3412_v47  ;;  %v3410_v38 = vsel %vm3409_vm2, %v4581_v15, %v3406_v41 }
 0x6f4   :  { %v3481_v23 = vmul.f32 %v3410_v38, %v7156_v5 }
 0x6f5   :  { %v3414_v53 = vmul.f32 0.5, %v3413_v37  ;;  %v3372_v25 = vpop.xlane.xlu1 %3371 }
 0x6f6   :  { %v3388_v0 = vmul.f32 %v3372_v25, %v7435_v59  ;;  %v3492_v58 = vmul.f32 %v7217_v46, %v3481_v23 }
 0x6f7   :  { %v3415_v22 = vsub.f32 1.5, %v3414_v53 }
 0x6f8   :  { %v4585_v17 = vpop.eup %4584  ;;  %v3396_v43 = vadd.f32 1e-05, %v3388_v0 }
 0x6f9   :  { %v3416_v54 = vmul.f32 %v4583_v45, %v3415_v22  ;;  %v3422_v60 = vmul.f32 %v4585_v17, %v3395_v40  ;;  %vm3428_vm6 = vweird.f32 %v4585_v17 }
 0x6fa   :  { %4586 = vrsqrt.f32 %v3396_v43  ;;  %vm3429_vm8 = vmor %vm3427_vm7, %vm3428_vm6  ;;  %vm3437_vm10 = vweird.f32 %v3396_v43 }
 0x6fb   :  { %v3423_v32 = vmul.f32 %v4585_v17, %v3422_v60  ;;  %v3420_v21 = vsel %vm3419_vm5, %v4583_v45, %v3416_v54 }
 0x6fc   :  { %v3482_v18 = vmul.f32 %v3420_v21, %v7162_v31 }
 0x6fd   :  { %v3424_v28 = vmul.f32 0.5, %v3423_v32  ;;  %v3375_v55 = vpop.xlane.xlu2 %3374 }
 0x6fe   :  { %v3389_v1 = vmul.f32 %v3375_v55, %v7435_v59  ;;  %v3493_v24 = vmul.f32 %v7217_v46, %v3482_v18 }
 0x6ff   :  { %v3425_v30 = vsub.f32 1.5, %v3424_v28 }
 0x700   :  { %v4587_v13 = vpop.eup %4586  ;;  %v3397_v5 = vadd.f32 1e-05, %v3389_v1  ;;  %v3500_v20 = vpack.c.bf16 %v3493_v24, %v3492_v58 }
 0x701   :  { %v3432_v44 = vmul.f32 %v4587_v13, %v3396_v43  ;;  %v3426_v39 = vmul.f32 %v4585_v17, %v3425_v30  ;;  %vm3438_vm9 = vweird.f32 %v4587_v13 }
 0x702   :  { %4588 = vrsqrt.f32 %v3397_v5  ;;  %3771 = vmatmul.msk.bf16.vlgmr.msrb.gmra.mxu2 %vm89_vm0, %v3500_v20  ;;  %vm3439_vm12 = vmor %vm3437_vm10, %vm3438_vm9  ;;  %vm3447_vm14 = vweird.f32 %v3397_v5  ;;  %v4547_v20 = vld [vmem:[%s7264_s16] ss:$0 sm:$0xff]  ;;  %s4803_s16 = smov [#allocation10]  }
 0x703   :  { %v3433_v51 = vmul.f32 %v4587_v13, %v3432_v44  ;;  %v3430_v19 = vsel %vm3429_vm8, %v4585_v17, %v3426_v39  ;;  %s3577_s18 = sshll.u32 %s4803_s16, 4  ;;  %s3578_s18 = int_to_ptr.vmem [resolvable:$true] %s3577_s18 }
 0x704   :  { %v3483_v4 = vmul.f32 %v3430_v19, %v7168_v57 }
 0x705   :  { %v3434_v31 = vmul.f32 0.5, %v3433_v51  ;;  %v3378_v35 = vpop.xlane.xlu2 %3377 }
 0x706   :  { %v3390_v42 = vmul.f32 %v3378_v35, %v7435_v59  ;;  %v3494_v52 = vmul.f32 %v7217_v46, %v3483_v4 }
 0x707   :  { %v3435_v33 = vsub.f32 1.5, %v3434_v31 }
 0x708   :  { %v4589_v36 = vpop.eup %4588  ;;  %v3398_v3 = vadd.f32 1e-05, %v3390_v42 }
 0x709   :  { %v3436_v56 = vmul.f32 %v4587_v13, %v3435_v33  ;;  %v3442_v29 = vmul.f32 %v4589_v36, %v3397_v5  ;;  %vm3448_vm13 = vweird.f32 %v4589_v36 }
 0x70a   :  { %4590 = vrsqrt.f32 %v3398_v3  ;;  %vm3449_vm15 = vmor %vm3447_vm14, %vm3448_vm13  ;;  %vm3457_vm1 = vweird.f32 %v3398_v3 }
 0x70b   :  { %v3443_v49 = vmul.f32 %v4589_v36, %v3442_v29  ;;  %v3440_v9 = vsel %vm3439_vm12, %v4587_v13, %v3436_v56 }
 0x70c   :  { %v3484_v62 = vmul.f32 %v3440_v9, %v7174_v63 }
 0x70d   :  { %v3444_v26 = vmul.f32 0.5, %v3443_v49  ;;  %v3381_v61 = vpop.xlane.xlu0 %3380 }
 0x70e   :  { %v3391_v34 = vmul.f32 %v3381_v61, %v7435_v59  ;;  %v3495_v2 = vmul.f32 %v7217_v46, %v3484_v62 }
 0x70f   :  { %v3445_v15 = vsub.f32 1.5, %v3444_v26 }
 0x710   :  { %v4591_v10 = vpop.eup %4590  ;;  %v3399_v16 = vadd.f32 1e-05, %v3391_v34  ;;  %v3501_v11 = vpack.c.bf16 %v3495_v2, %v3494_v52 }
 0x711   :  { %v3452_v8 = vmul.f32 %v4591_v10, %v3398_v3  ;;  %v3446_v57 = vmul.f32 %v4589_v36, %v3445_v15  ;;  %vm3458_vm11 = vweird.f32 %v4591_v10 }
 0x712   :  { %4592 = vrsqrt.f32 %v3399_v16  ;;  %3772 = vmatmul.msk.bf16.gmra.mxu2 %vm89_vm0, %v3501_v11  ;;  %vm3459_vm2 = vmor %vm3457_vm1, %vm3458_vm11  ;;  %vm3467_vm4 = vweird.f32 %v3399_v16 }
 0x713   :  { %v3453_v6 = vmul.f32 %v4591_v10, %v3452_v8  ;;  %v3450_v40 = vsel %vm3449_vm15, %v4589_v36, %v3446_v57 }
 0x714   :  { %v3485_v25 = vmul.f32 %v3450_v40, %v7180_v14 }
 0x715   :  { %v3454_v63 = vmul.f32 0.5, %v3453_v6  ;;  %v3384_v50 = vpop.xlane.xlu1 %3383 }
 0x716   :  { %v3392_v7 = vmul.f32 %v3384_v50, %v7435_v59  ;;  %v3496_v43 = vmul.f32 %v7217_v46, %v3485_v25 }
 0x717   :  { %v3455_v45 = vsub.f32 1.5, %v3454_v63 }
 0x718   :  { %v4593_v47 = vpop.eup %4592  ;;  %v3400_v41 = vadd.f32 1e-05, %v3392_v7 }
 0x719   :  { %v3456_v37 = vmul.f32 %v4591_v10, %v3455_v45  ;;  %v3462_v53 = vmul.f32 %v4593_v47, %v3399_v16  ;;  %vm3468_vm3 = vweird.f32 %v4593_v47 }
 0x71a   :  { %4594 = vrsqrt.f32 %v3400_v41  ;;  %vm3469_vm5 = vmor %vm3467_vm4, %vm3468_vm3  ;;  %vm3477_vm7 = vweird.f32 %v3400_v41 }
 0x71b   :  { %v3463_v0 = vmul.f32 %v4593_v47, %v3462_v53  ;;  %v3460_v22 = vsel %vm3459_vm2, %v4591_v10, %v3456_v37 }
 0x71c   :  { %v3486_v38 = vmul.f32 %v3460_v22, %v7186_v48 }
 0x71d   :  { %v3464_v17 = vmul.f32 0.5, %v3463_v0 }
 0x71e   :  { %v3497_v59 = vmul.f32 %v7217_v46, %v3486_v38 }
 0x71f   :  { %v3465_v54 = vsub.f32 1.5, %v3464_v17 }
 0x720   :  { %v4595_v60 = vpop.eup %4594  ;;  %v3502_v23 = vpack.c.bf16 %v3497_v59, %v3496_v43 }
 0x721   :  { %v3472_v32 = vmul.f32 %v4595_v60, %v3400_v41  ;;  %v3466_v21 = vmul.f32 %v4593_v47, %v3465_v54  ;;  %vm3478_vm6 = vweird.f32 %v4595_v60 }
 0x722   :  { %3773 = vmatmul.msk.bf16.gmra.mxu2 %vm89_vm0, %v3502_v23  ;;  %vm3479_vm8 = vmor %vm3477_vm7, %vm3478_vm6 }
 0x723   :  { %v3473_v18 = vmul.f32 %v4595_v60, %v3472_v32  ;;  %v3470_v48 = vsel %vm3469_vm5, %v4593_v47, %v3466_v21 }
 0x724   :  { %v3487_v1 = vmul.f32 %v3470_v48, %v7192_v12 }
 0x725   :  { %v3474_v14 = vmul.f32 0.5, %v3473_v18 }
 0x726   :  { %v3498_v30 = vmul.f32 %v7217_v46, %v3487_v1 }
 0x727   :  { %v3475_v28 = vsub.f32 1.5, %v3474_v14 }
 0x729   :  { %v3476_v55 = vmul.f32 %v4595_v60, %v3475_v28 }
 0x72b   :  { %v3480_v58 = vsel %vm3479_vm8, %v4595_v60, %v3476_v55 }
 0x72c   :  { %v3488_v24 = vmul.f32 %v3480_v58, %v7198_v27 }
 0x72e   :  { %v3499_v13 = vmul.f32 %v7217_v46, %v3488_v24 }
 0x730   :  { %v3503_v5 = vpack.c.bf16 %v3499_v13, %v3498_v30 }
 0x732   :  { %3774 = vmatmul.msk.bf16.gmra.mxu2 %vm89_vm0, %v3503_v5 }
 0x785   :  { %v3545_v44 = vpop.f32.mrf.mxu2 }
 0x786   :  { %v3546_v39 = vadd.f32 %v4547_v20, %v3545_v44 }
 0x788   :  { %3565 = vst [vmem:[#allocation10] sm:$0xff] %v3546_v39 }
 0x78d   :  { %v3547_v51 = vpop.f32.mrf.mxu2 }
 0x78e   :  { %v3548_v31 = vadd.f32 %v4547_v20, %v3547_v51 }
 0x790   :  { %3566 = vst [vmem:[#allocation10 + $0x8] sm:$0xff] %v3548_v31 }
 0x795   :  { %v3550_v12 = vpop.f32.mrf.mxu2 }
 0x796   :  { %v3551_v35 = vadd.f32 %v4547_v20, %v3550_v12 }
 0x798   :  { %3567 = vst [vmem:[#allocation10 + $0x10] sm:$0xff] %v3551_v35 }
 0x79d   :  { %v3552_v27 = vpop.f32.mrf.mxu2 }
 0x79e   :  { %v3553_v42 = vadd.f32 %v4547_v20, %v3552_v27 }
 0x7a0   :  { %3568 = vst [vmem:[#allocation10 + $0x18] sm:$0xff] %v3553_v42 }
 0x7a5   :  { %v3555_v46 = vpop.f32.mrf.mxu2 }
 0x7a6   :  { %v3556_v33 = vadd.f32 %v4547_v20, %v3555_v46 }
 0x7a8   :  { %3569 = vst [vmem:[#allocation10 + $0x20] sm:$0xff] %v3556_v33 }
 0x7ad   :  { %v3557_v19 = vpop.f32.mrf.mxu2 }
 0x7ae   :  { %v3558_v36 = vadd.f32 %v4547_v20, %v3557_v19 }
 0x7b0   :  { %3570 = vst [vmem:[#allocation10 + $0x28] sm:$0xff] %v3558_v36 }
 0x7b5   :  { %v3560_v3 = vpop.f32.mrf.mxu2 }
 0x7b6   :  { %v3561_v56 = vadd.f32 %v4547_v20, %v3560_v3 }
 0x7b8   :  { %3571 = vst [vmem:[#allocation10 + $0x30] sm:$0xff] %v3561_v56 }
 0x7bd   :  { %v3562_v29 = vpop.f32.mrf.mxu2 }
 0x7be   :  { %v3563_v4 = vadd.f32 %v4547_v20, %v3562_v29 }
 0x7c0   :  { %3572 = vst [vmem:[#allocation10 + $0x38] sm:$0xff] %v3563_v4 }
 0x7c1   :  { %3585 = dma.vmem_to_hbm [thread:$0]  %s3578_s18, 1024, %s3580_s10, [#allocation9], %s4804_s8, %s4804_s8, %s4805_s4  }
 0x7c2   :  { %4714 = dma.done.wait [#allocation9], 1024  }
 0x7c3   :  { %4715 = vsyncadd [#allocation9], 4294966272 }
 0x7c4   :  { %3590 = vsyncpa [#allocation8], 1 }
 0x7c5   :  { %3591 = vsyncpa [#allocation9], 1 }

</bundles_post_ra>
